<compile_context>
chip_gen: v7x
topology: tpu7x:2x2x1
jax: 0.10.0
libtpu: 0.0.40
codegen_flags: <defaults>
</compile_context>

<pallas_src>
import functools

import jax
import jax.numpy as jnp
from jax.experimental import pallas as pl
from jax.experimental.pallas import tpu as pltpu

NEG_SLOPE = 0.2
BN_EPS = 1e-5
TK_MAX = 2048
VMEM_LIMIT = 32 * 1024 * 1024


# ------------------------------ tiling helpers ------------------------------ #

def _pick_tn(m):
    """Lane (M) tile: prefer >=2 lane-dense 128-multiple tiles (megacore), else 1 block."""
    if m % 128 == 0:
        for tn in (512, 256, 128):
            if m % tn == 0 and m // tn >= 2:
                return tn
    return m  # single full-width block (block_shape == full dim is always legal)


def _pick_tk(k):
    if k <= TK_MAX or k % TK_MAX != 0:
        return k
    return TK_MAX


# ----------------------------- Pallas kernels ------------------------------ #

def _convT_matmul_kernel(w_ref, p_ref, bias_ref, o_ref, acc_ref, *, apply_leaky):
    """out^T(OC, tn) += W(OC, tk) @ patches^T(tk, tn); bias + LeakyReLU epilogue."""
    @pl.when(pl.program_id(1) == 0)
    def _():
        acc_ref[...] = jnp.zeros_like(acc_ref)

    acc_ref[...] += jnp.dot(w_ref[...], p_ref[...],
                            preferred_element_type=jnp.float32)

    @pl.when(pl.program_id(1) == pl.num_programs(1) - 1)
    def _():
        y = acc_ref[...] + bias_ref[...]
        if apply_leaky:
            y = jnp.where(y >= 0, y, NEG_SLOPE * y)
        o_ref[...] = y.astype(o_ref.dtype)


def pallas_convT_matmul(w2, patches_t, bias, *, apply_leaky, out_dtype):
    """w2: (OC, K) bf16, patches_t: (K, M) bf16, bias: (OC,) f32 or None -> (OC, M)."""
    oc, k = w2.shape
    _, m = patches_t.shape
    tn = _pick_tn(m)
    tk = _pick_tk(k)
    nm, nk = m // tn, k // tk
    bias_col = (bias if bias is not None
                else jnp.zeros((oc,), jnp.float32)).reshape(oc, 1).astype(jnp.float32)

    return pl.pallas_call(
        functools.partial(_convT_matmul_kernel, apply_leaky=apply_leaky),
        out_shape=jax.ShapeDtypeStruct((oc, m), out_dtype),
        grid_spec=pltpu.PrefetchScalarGridSpec(
            num_scalar_prefetch=0,
            grid=(nm, nk),
            in_specs=[
                pl.BlockSpec((oc, tk), lambda i, kk: (0, kk)),
                pl.BlockSpec((tk, tn), lambda i, kk: (kk, i)),
                pl.BlockSpec((oc, 1), lambda i, kk: (0, 0)),   # resident, fetched once
            ],
            out_specs=pl.BlockSpec((oc, tn), lambda i, kk: (0, i)),
            scratch_shapes=[pltpu.VMEM((oc, tn), jnp.float32)],
        ),
        compiler_params=pltpu.CompilerParams(
            dimension_semantics=("parallel", "arbitrary"),
            vmem_limit_bytes=VMEM_LIMIT),
    )(w2, patches_t, bias_col)


def _bn_stats_kernel(x_ref, gamma_ref, beta_ref, scale_ref, shift_ref,
                     sum_ref, sq_ref, *, m_total):
    j = pl.program_id(0)

    @pl.when(j == 0)
    def _():
        sum_ref[...] = jnp.zeros_like(sum_ref)
        sq_ref[...] = jnp.zeros_like(sq_ref)

    x = x_ref[...]
    sum_ref[...] += jnp.sum(x, axis=1, keepdims=True)
    sq_ref[...] += jnp.sum(x * x, axis=1, keepdims=True)

    @pl.when(j == pl.num_programs(0) - 1)
    def _():
        inv_m = 1.0 / m_total
        mean = sum_ref[...] * inv_m
        var = jnp.maximum(sq_ref[...] * inv_m - mean * mean, 0.0)  # biased (training BN)
        rstd = jax.lax.rsqrt(var + BN_EPS)
        scale = gamma_ref[...] * rstd
        scale_ref[...] = scale
        shift_ref[...] = beta_ref[...] - mean * scale


def _bn_apply_kernel(x_ref, scale_ref, shift_ref, o_ref):
    y = x_ref[...] * scale_ref[...] + shift_ref[...]
    o_ref[...] = jnp.where(y >= 0, y, NEG_SLOPE * y).astype(o_ref.dtype)


def pallas_bn_lrelu_T(x, gamma, beta):
    """x: (C, M) f32 conv output -> BN(batch stats) + LeakyReLU, bf16 (C, M)."""
    # TODO(synk): BatchNorm running_mean/var buffer updates are training state, not a
    # forward output, so they are not modeled here.
    c, m = x.shape
    tn = _pick_tn(m)
    nm = m // tn
    gamma_c = gamma.reshape(c, 1).astype(jnp.float32)
    beta_c = beta.reshape(c, 1).astype(jnp.float32)

    scale, shift = pl.pallas_call(
        functools.partial(_bn_stats_kernel, m_total=m),
        out_shape=(jax.ShapeDtypeStruct((c, 1), jnp.float32),
                   jax.ShapeDtypeStruct((c, 1), jnp.float32)),
        grid_spec=pltpu.PrefetchScalarGridSpec(
            num_scalar_prefetch=0,
            grid=(nm,),
            in_specs=[pl.BlockSpec((c, tn), lambda j: (0, j)),
                      pl.BlockSpec((c, 1), lambda j: (0, 0)),
                      pl.BlockSpec((c, 1), lambda j: (0, 0))],
            out_specs=(pl.BlockSpec((c, 1), lambda j: (0, 0)),
                       pl.BlockSpec((c, 1), lambda j: (0, 0))),
            scratch_shapes=[pltpu.VMEM((c, 1), jnp.float32),
                            pltpu.VMEM((c, 1), jnp.float32)],
        ),
        compiler_params=pltpu.CompilerParams(
            dimension_semantics=("arbitrary",),
            vmem_limit_bytes=VMEM_LIMIT),
    )(x, gamma_c, beta_c)

    return pl.pallas_call(
        _bn_apply_kernel,
        out_shape=jax.ShapeDtypeStruct((c, m), jnp.bfloat16),
        grid_spec=pltpu.PrefetchScalarGridSpec(
            num_scalar_prefetch=0,
            grid=(nm,),
            in_specs=[pl.BlockSpec((c, tn), lambda j: (0, j)),
                      pl.BlockSpec((c, 1), lambda j: (0, 0)),
                      pl.BlockSpec((c, 1), lambda j: (0, 0))],
            out_specs=pl.BlockSpec((c, tn), lambda j: (0, j)),
        ),
        compiler_params=pltpu.CompilerParams(
            dimension_semantics=("parallel",),
            vmem_limit_bytes=VMEM_LIMIT),
    )(x, scale, shift)


# ------------------------------ conv plumbing ------------------------------ #

def _im2col_T(x, kh, kw, stride, padding, reflect):
    """x: (C, N, H, W) -> patches^T (C*KH*KW, N*OH*OW); K order matches PyTorch flatten."""
    if padding > 0:
        mode = "reflect" if reflect else "constant"
        x = jnp.pad(x, ((0, 0), (0, 0), (padding, padding), (padding, padding)), mode=mode)
    c, n, h, w = x.shape
    oh = (h - kh) // stride + 1
    ow = (w - kw) // stride + 1
    cols = []
    for i in range(kh):
        for j in range(kw):
            cols.append(x[:, :, i:i + stride * (oh - 1) + 1:stride,
                             j:j + stride * (ow - 1) + 1:stride])
    p = jnp.stack(cols, axis=1)                  # (c, kh*kw, n, oh, ow)
    return p.reshape(c * kh * kw, n * oh * ow), (n, oh, ow)


def conv_lrelu(x, w, b, *, stride, padding, reflect):
    """Conv2d(bias) + LeakyReLU on (C, N, H, W) bf16 activations -> bf16."""
    oc = w.shape[0]
    patches_t, (n, oh, ow) = _im2col_T(x, 4, 4, stride, padding, reflect)
    w2 = w.reshape(oc, -1).astype(jnp.bfloat16)
    out = pallas_convT_matmul(w2, patches_t, b, apply_leaky=True, out_dtype=jnp.bfloat16)
    return out.reshape(oc, n, oh, ow)


def conv_bn_lrelu(x, w, gamma, beta, *, stride):
    """Conv2d(no bias) -> BatchNorm(batch stats) -> LeakyReLU on (C, N, H, W)."""
    oc = w.shape[0]
    patches_t, (n, oh, ow) = _im2col_T(x, 4, 4, stride, 0, False)
    w2 = w.reshape(oc, -1).astype(jnp.bfloat16)
    conv = pallas_convT_matmul(w2, patches_t, None, apply_leaky=False,
                               out_dtype=jnp.float32)
    y = pallas_bn_lrelu_T(conv, gamma, beta)
    return y.reshape(oc, n, oh, ow)


def final_conv(x, w, b):
    """Final 1-output-channel conv: trivially small -> plain jnp.dot (per perf review)."""
    oc = w.shape[0]  # == 1
    patches_t, (n, oh, ow) = _im2col_T(x, 4, 4, 1, 0, False)
    w2 = w.reshape(oc, -1).astype(jnp.bfloat16)
    out = jnp.dot(w2, patches_t, preferred_element_type=jnp.float32) + b.reshape(oc, 1)
    return out.reshape(oc, n, oh, ow)


# ------------------------------- parameters -------------------------------- #

def _conv_init(key, oc, ic, k, with_bias):
    k1, k2 = jax.random.split(key)
    fan_in = ic * k * k
    w = jax.random.normal(k1, (oc, ic, k, k), jnp.float32) / jnp.sqrt(fan_in)
    b = 0.01 * jax.random.normal(k2, (oc,), jnp.float32) if with_bias else None
    return w, b


def init_params(key, in_channels, features):
    keys = jax.random.split(key, 16)
    p = {}
    p["w0"], p["b0"] = _conv_init(keys[0], features[0], in_channels * 2, 4, True)
    ic = features[0]
    for idx, f in enumerate(features[1:], start=1):
        w, _ = _conv_init(keys[idx], f, ic, 4, False)
        p[f"w{idx}"] = w
        p[f"g{idx}"] = 1.0 + 0.1 * jax.random.normal(keys[4 + idx], (f,), jnp.float32)
        p[f"be{idx}"] = 0.1 * jax.random.normal(keys[8 + idx], (f,), jnp.float32)
        ic = f
    p["w4"], p["b4"] = _conv_init(keys[15], 1, ic, 4, True)
    return p


# -------------------------------- forward ---------------------------------- #

def discriminator_forward(x, y, params, features):
    h = jnp.concatenate([x, y], axis=1)                       # (N, 2C, H, W)
    h = jnp.transpose(h, (1, 0, 2, 3)).astype(jnp.bfloat16)   # (C, N, H, W) layout
    h = conv_lrelu(h, params["w0"], params["b0"], stride=2, padding=1, reflect=True)
    for idx, f in enumerate(features[1:], start=1):
        stride = 1 if f == features[-1] else 2
        h = conv_bn_lrelu(h, params[f"w{idx}"], params[f"g{idx}"], params[f"be{idx}"],
                          stride=stride)
    out = final_conv(h, params["w4"], params["b4"])           # (1, N, OH, OW)
    return jnp.transpose(out, (1, 0, 2, 3)).astype(jnp.float32)


if __name__ == "__main__":
    in_channels = 3
    features = [16, 32, 64, 128]   # reduced widths, same structure as [64,128,256,512]
    batch, H, W = 2, 68, 68        # smallest-ish spatial size that survives all convs

    key = jax.random.PRNGKey(0)
    kx, ky, kp = jax.random.split(key, 3)
    x = jax.random.normal(kx, (batch, in_channels, H, W), jnp.float32)
    y = jax.random.normal(ky, (batch, in_channels, H, W), jnp.float32)
    params = init_params(kp, in_channels, features)

    fwd = jax.jit(functools.partial(discriminator_forward, features=features))
    out = fwd(x, y, params)
    out = jax.block_until_ready(out)
    assert out.shape == (batch, 1, 1, 1), out.shape
    assert bool(jnp.all(jnp.isfinite(out)))
    print("KERNEL_OK")
</pallas_src>

<mosaic_0001>
module attributes {stable_mosaic.version = 11 : i64} {
  func.func @_convT_matmul_kernel(%arg0: i32, %arg1: i32, %arg2: memref<16x96xbf16, #tpu.memory_space<vmem>>, %arg3: memref<96x2312xbf16, #tpu.memory_space<vmem>>, %arg4: memref<16x1xf32, #tpu.memory_space<vmem>>, %arg5: memref<16x2312xbf16, #tpu.memory_space<vmem>>, %arg6: memref<16x2312xf32, #tpu.memory_space<vmem>>) attributes {dimension_semantics = [#tpu.dimension_semantics<parallel>, #tpu.dimension_semantics<arbitrary>], iteration_bounds = array<i64: 1, 1>, scalar_prefetch = 0 : i64, scratch_operands = 1 : i64, tpu.core_type = #tpu.core_type<tc>, window_params = [{transform_indices = @transform_0, window_bounds = array<i64: 16, 96>}, {transform_indices = @transform_1, window_bounds = array<i64: 96, 2312>}, {pipeline_mode = #tpu.pipeline_mode<synchronous>, transform_indices = @transform_2, window_bounds = array<i64: 16, 1>}, {transform_indices = @transform_3, window_bounds = array<i64: 16, 2312>}]} {
    %c0_i32 = arith.constant 0 : i32
    %0 = arith.cmpi eq, %arg1, %c0_i32 : i32
    %1 = arith.extui %0 : i1 to i32
    %c0_i32_0 = arith.constant 0 : i32
    %2 = arith.cmpi ne, %1, %c0_i32_0 : i32
    scf.if %2 {
      %cst_10 = arith.constant 0.000000e+00 : f32
      %12 = vector.broadcast %cst_10 : f32 to vector<16x2312xf32>
      %c0_11 = arith.constant 0 : index
      %c0_12 = arith.constant 0 : index
      %13 = vector.load %arg6[%c0_11, %c0_12] : memref<16x2312xf32, #tpu.memory_space<vmem>>, vector<16x2312xf32>
      tpu.vector_store %arg6[%c0_11, %c0_12], %12 {strides = array<i32>} : memref<16x2312xf32, #tpu.memory_space<vmem>>, vector<16x2312xf32>,
    } else {
    }
    %c0 = arith.constant 0 : index
    %c0_1 = arith.constant 0 : index
    %3 = vector.load %arg6[%c0, %c0_1] : memref<16x2312xf32, #tpu.memory_space<vmem>>, vector<16x2312xf32>
    %c0_2 = arith.constant 0 : index
    %c0_3 = arith.constant 0 : index
    %4 = vector.load %arg2[%c0_2, %c0_3] : memref<16x96xbf16, #tpu.memory_space<vmem>>, vector<16x96xbf16>
    %c0_4 = arith.constant 0 : index
    %c0_5 = arith.constant 0 : index
    %5 = vector.load %arg3[%c0_4, %c0_5] : memref<96x2312xbf16, #tpu.memory_space<vmem>>, vector<96x2312xbf16>
    %cst = arith.constant dense<0.000000e+00> : vector<16x2312xf32>
    %6 = tpu.matmul %4, %5, %cst {dimension_numbers = #tpu.dot_dimension_numbers<[1], [0], [0], [1], [0, 0, 1, 1], [], []>} : vector<16x96xbf16>, vector<96x2312xbf16>, vector<16x2312xf32> -> vector<16x2312xf32>
    %7 = arith.addf %3, %6 : vector<16x2312xf32>
    %c0_6 = arith.constant 0 : index
    %c0_7 = arith.constant 0 : index
    %8 = vector.load %arg6[%c0_6, %c0_7] : memref<16x2312xf32, #tpu.memory_space<vmem>>, vector<16x2312xf32>
    tpu.vector_store %arg6[%c0_6, %c0_7], %7 {strides = array<i32>} : memref<16x2312xf32, #tpu.memory_space<vmem>>, vector<16x2312xf32>,
    %c0_i32_8 = arith.constant 0 : i32
    %9 = arith.cmpi eq, %arg1, %c0_i32_8 : i32
    %10 = arith.extui %9 : i1 to i32
    %c0_i32_9 = arith.constant 0 : i32
    %11 = arith.cmpi ne, %10, %c0_i32_9 : i32
    scf.if %11 {
      %c0_10 = arith.constant 0 : index
      %c0_11 = arith.constant 0 : index
      %12 = vector.load %arg6[%c0_10, %c0_11] : memref<16x2312xf32, #tpu.memory_space<vmem>>, vector<16x2312xf32>
      %c0_12 = arith.constant 0 : index
      %c0_13 = arith.constant 0 : index
      %13 = vector.load %arg4[%c0_12, %c0_13] : memref<16x1xf32, #tpu.memory_space<vmem>>, vector<16x1xf32>
      %14 = vector.broadcast %13 : vector<16x1xf32> to vector<16x2312xf32>
      %15 = arith.addf %12, %14 : vector<16x2312xf32>
      %cst_14 = arith.constant 0.000000e+00 : f32
      %16 = vector.broadcast %cst_14 : f32 to vector<16x2312xf32>
      %17 = arith.cmpf oge, %15, %16 : vector<16x2312xf32>
      %cst_15 = arith.constant 2.000000e-01 : f32
      %18 = vector.broadcast %cst_15 : f32 to vector<16x2312xf32>
      %19 = arith.mulf %18, %15 : vector<16x2312xf32>
      %20 = arith.select %17, %15, %19 : vector<16x2312xi1>, vector<16x2312xf32>
      %21 = arith.truncf %20 : vector<16x2312xf32> to vector<16x2312xbf16>
      %c0_16 = arith.constant 0 : index
      %c0_17 = arith.constant 0 : index
      %22 = vector.load %arg5[%c0_16, %c0_17] : memref<16x2312xbf16, #tpu.memory_space<vmem>>, vector<16x2312xbf16>
      tpu.vector_store %arg5[%c0_16, %c0_17], %21 {strides = array<i32>} : memref<16x2312xbf16, #tpu.memory_space<vmem>>, vector<16x2312xbf16>,
    } else {
    }
    return
  }
  func.func @transform_0(%arg0: i32, %arg1: i32) -> (i32, i32) {
    %c0_i32 = arith.constant 0 : i32
    %c0_i32_0 = arith.constant 0 : i32
    return %c0_i32, %arg1 : i32, i32
  }
  func.func @transform_1(%arg0: i32, %arg1: i32) -> (i32, i32) {
    %c0_i32 = arith.constant 0 : i32
    return %arg1, %arg0 : i32, i32
  }
  func.func @transform_2(%arg0: i32, %arg1: i32) -> (i32, i32) {
    %c0_i32 = arith.constant 0 : i32
    %c0_i32_0 = arith.constant 0 : i32
    %c0_i32_1 = arith.constant 0 : i32
    return %c0_i32, %c0_i32_0 : i32, i32
  }
  func.func @transform_3(%arg0: i32, %arg1: i32) -> (i32, i32) {
    %c0_i32 = arith.constant 0 : i32
    %c0_i32_0 = arith.constant 0 : i32
    return %c0_i32, %arg0 : i32, i32
  }
}

module attributes {stable_mosaic.version = 11 : i64} {
  func.func @_convT_matmul_kernel(%arg0: i32, %arg1: i32, %arg2: memref<32x256xbf16, #tpu.memory_space<vmem>>, %arg3: memref<256x256xbf16, #tpu.memory_space<vmem>>, %arg4: memref<32x1xf32, #tpu.memory_space<vmem>>, %arg5: memref<32x256xf32, #tpu.memory_space<vmem>>, %arg6: memref<32x256xf32, #tpu.memory_space<vmem>>) attributes {dimension_semantics = [#tpu.dimension_semantics<parallel>, #tpu.dimension_semantics<arbitrary>], iteration_bounds = array<i64: 2, 1>, scalar_prefetch = 0 : i64, scratch_operands = 1 : i64, tpu.core_type = #tpu.core_type<tc>, window_params = [{transform_indices = @transform_0, window_bounds = array<i64: 32, 256>}, {transform_indices = @transform_1, window_bounds = array<i64: 256, 256>}, {pipeline_mode = #tpu.pipeline_mode<synchronous>, transform_indices = @transform_2, window_bounds = array<i64: 32, 1>}, {transform_indices = @transform_3, window_bounds = array<i64: 32, 256>}]} {
    %c0_i32 = arith.constant 0 : i32
    %0 = arith.cmpi eq, %arg1, %c0_i32 : i32
    %1 = arith.extui %0 : i1 to i32
    %c0_i32_0 = arith.constant 0 : i32
    %2 = arith.cmpi ne, %1, %c0_i32_0 : i32
    scf.if %2 {
      %cst_10 = arith.constant 0.000000e+00 : f32
      %12 = vector.broadcast %cst_10 : f32 to vector<32x256xf32>
      %c0_11 = arith.constant 0 : index
      %c0_12 = arith.constant 0 : index
      %13 = vector.load %arg6[%c0_11, %c0_12] : memref<32x256xf32, #tpu.memory_space<vmem>>, vector<32x256xf32>
      tpu.vector_store %arg6[%c0_11, %c0_12], %12 {strides = array<i32>} : memref<32x256xf32, #tpu.memory_space<vmem>>, vector<32x256xf32>,
    } else {
    }
    %c0 = arith.constant 0 : index
    %c0_1 = arith.constant 0 : index
    %3 = vector.load %arg6[%c0, %c0_1] : memref<32x256xf32, #tpu.memory_space<vmem>>, vector<32x256xf32>
    %c0_2 = arith.constant 0 : index
    %c0_3 = arith.constant 0 : index
    %4 = vector.load %arg2[%c0_2, %c0_3] : memref<32x256xbf16, #tpu.memory_space<vmem>>, vector<32x256xbf16>
    %c0_4 = arith.constant 0 : index
    %c0_5 = arith.constant 0 : index
    %5 = vector.load %arg3[%c0_4, %c0_5] : memref<256x256xbf16, #tpu.memory_space<vmem>>, vector<256x256xbf16>
    %cst = arith.constant dense<0.000000e+00> : vector<32x256xf32>
    %6 = tpu.matmul %4, %5, %cst {dimension_numbers = #tpu.dot_dimension_numbers<[1], [0], [0], [1], [0, 0, 1, 1], [], []>} : vector<32x256xbf16>, vector<256x256xbf16>, vector<32x256xf32> -> vector<32x256xf32>
    %7 = arith.addf %3, %6 : vector<32x256xf32>
    %c0_6 = arith.constant 0 : index
    %c0_7 = arith.constant 0 : index
    %8 = vector.load %arg6[%c0_6, %c0_7] : memref<32x256xf32, #tpu.memory_space<vmem>>, vector<32x256xf32>
    tpu.vector_store %arg6[%c0_6, %c0_7], %7 {strides = array<i32>} : memref<32x256xf32, #tpu.memory_space<vmem>>, vector<32x256xf32>,
    %c0_i32_8 = arith.constant 0 : i32
    %9 = arith.cmpi eq, %arg1, %c0_i32_8 : i32
    %10 = arith.extui %9 : i1 to i32
    %c0_i32_9 = arith.constant 0 : i32
    %11 = arith.cmpi ne, %10, %c0_i32_9 : i32
    scf.if %11 {
      %c0_10 = arith.constant 0 : index
      %c0_11 = arith.constant 0 : index
      %12 = vector.load %arg6[%c0_10, %c0_11] : memref<32x256xf32, #tpu.memory_space<vmem>>, vector<32x256xf32>
      %c0_12 = arith.constant 0 : index
      %c0_13 = arith.constant 0 : index
      %13 = vector.load %arg4[%c0_12, %c0_13] : memref<32x1xf32, #tpu.memory_space<vmem>>, vector<32x1xf32>
      %14 = vector.broadcast %13 : vector<32x1xf32> to vector<32x256xf32>
      %15 = arith.addf %12, %14 : vector<32x256xf32>
      %c0_14 = arith.constant 0 : index
      %c0_15 = arith.constant 0 : index
      %16 = vector.load %arg5[%c0_14, %c0_15] : memref<32x256xf32, #tpu.memory_space<vmem>>, vector<32x256xf32>
      tpu.vector_store %arg5[%c0_14, %c0_15], %15 {strides = array<i32>} : memref<32x256xf32, #tpu.memory_space<vmem>>, vector<32x256xf32>,
    } else {
    }
    return
  }
  func.func @transform_0(%arg0: i32, %arg1: i32) -> (i32, i32) {
    %c0_i32 = arith.constant 0 : i32
    %c0_i32_0 = arith.constant 0 : i32
    return %c0_i32, %arg1 : i32, i32
  }
  func.func @transform_1(%arg0: i32, %arg1: i32) -> (i32, i32) {
    %c0_i32 = arith.constant 0 : i32
    return %arg1, %arg0 : i32, i32
  }
  func.func @transform_2(%arg0: i32, %arg1: i32) -> (i32, i32) {
    %c0_i32 = arith.constant 0 : i32
    %c0_i32_0 = arith.constant 0 : i32
    %c0_i32_1 = arith.constant 0 : i32
    return %c0_i32, %c0_i32_0 : i32, i32
  }
  func.func @transform_3(%arg0: i32, %arg1: i32) -> (i32, i32) {
    %c0_i32 = arith.constant 0 : i32
    %c0_i32_0 = arith.constant 0 : i32
    return %c0_i32, %arg0 : i32, i32
  }
}

module attributes {stable_mosaic.version = 11 : i64} {
  func.func @_bn_stats_kernel(%arg0: i32, %arg1: memref<32x256xf32, #tpu.memory_space<vmem>>, %arg2: memref<32x1xf32, #tpu.memory_space<vmem>>, %arg3: memref<32x1xf32, #tpu.memory_space<vmem>>, %arg4: memref<32x1xf32, #tpu.memory_space<vmem>>, %arg5: memref<32x1xf32, #tpu.memory_space<vmem>>, %arg6: memref<32x1xf32, #tpu.memory_space<vmem>>, %arg7: memref<32x1xf32, #tpu.memory_space<vmem>>) attributes {dimension_semantics = [#tpu.dimension_semantics<arbitrary>], iteration_bounds = array<i64: 2>, scalar_prefetch = 0 : i64, scratch_operands = 2 : i64, tpu.core_type = #tpu.core_type<tc>, window_params = [{transform_indices = @transform_0, window_bounds = array<i64: 32, 256>}, {pipeline_mode = #tpu.pipeline_mode<synchronous>, transform_indices = @transform_1, window_bounds = array<i64: 32, 1>}, {pipeline_mode = #tpu.pipeline_mode<synchronous>, transform_indices = @transform_2, window_bounds = array<i64: 32, 1>}, {pipeline_mode = #tpu.pipeline_mode<synchronous>, transform_indices = @transform_3, window_bounds = array<i64: 32, 1>}, {pipeline_mode = #tpu.pipeline_mode<synchronous>, transform_indices = @transform_4, window_bounds = array<i64: 32, 1>}]} {
    %c0_i32 = arith.constant 0 : i32
    %0 = arith.cmpi eq, %arg0, %c0_i32 : i32
    %1 = arith.extui %0 : i1 to i32
    %c0_i32_0 = arith.constant 0 : i32
    %2 = arith.cmpi ne, %1, %c0_i32_0 : i32
    scf.if %2 {
      %cst_12 = arith.constant 0.000000e+00 : f32
      %18 = vector.broadcast %cst_12 : f32 to vector<32x1xf32>
      %c0_13 = arith.constant 0 : index
      %c0_14 = arith.constant 0 : index
      %19 = vector.load %arg6[%c0_13, %c0_14] : memref<32x1xf32, #tpu.memory_space<vmem>>, vector<32x1xf32>
      tpu.vector_store %arg6[%c0_13, %c0_14], %18 {strides = array<i32>} : memref<32x1xf32, #tpu.memory_space<vmem>>, vector<32x1xf32>,
      %cst_15 = arith.constant 0.000000e+00 : f32
      %20 = vector.broadcast %cst_15 : f32 to vector<32x1xf32>
      %c0_16 = arith.constant 0 : index
      %c0_17 = arith.constant 0 : index
      %21 = vector.load %arg7[%c0_16, %c0_17] : memref<32x1xf32, #tpu.memory_space<vmem>>, vector<32x1xf32>
      tpu.vector_store %arg7[%c0_16, %c0_17], %20 {strides = array<i32>} : memref<32x1xf32, #tpu.memory_space<vmem>>, vector<32x1xf32>,
    } else {
    }
    %c0 = arith.constant 0 : index
    %c0_1 = arith.constant 0 : index
    %3 = vector.load %arg1[%c0, %c0_1] : memref<32x256xf32, #tpu.memory_space<vmem>>, vector<32x256xf32>
    %c0_2 = arith.constant 0 : index
    %c0_3 = arith.constant 0 : index
    %4 = vector.load %arg6[%c0_2, %c0_3] : memref<32x1xf32, #tpu.memory_space<vmem>>, vector<32x1xf32>
    %cst = arith.constant dense<0.000000e+00> : vector<32xf32>
    %5 = vector.multi_reduction <add>, %3, %cst [1] : vector<32x256xf32> to vector<32xf32>
    %6 = vector.shape_cast %5 : vector<32xf32> to vector<32x1xf32>
    %7 = arith.addf %4, %6 : vector<32x1xf32>
    %c0_4 = arith.constant 0 : index
    %c0_5 = arith.constant 0 : index
    %8 = vector.load %arg6[%c0_4, %c0_5] : memref<32x1xf32, #tpu.memory_space<vmem>>, vector<32x1xf32>
    tpu.vector_store %arg6[%c0_4, %c0_5], %7 {strides = array<i32>} : memref<32x1xf32, #tpu.memory_space<vmem>>, vector<32x1xf32>,
    %c0_6 = arith.constant 0 : index
    %c0_7 = arith.constant 0 : index
    %9 = vector.load %arg7[%c0_6, %c0_7] : memref<32x1xf32, #tpu.memory_space<vmem>>, vector<32x1xf32>
    %10 = arith.mulf %3, %3 : vector<32x256xf32>
    %cst_8 = arith.constant dense<0.000000e+00> : vector<32xf32>
    %11 = vector.multi_reduction <add>, %10, %cst_8 [1] : vector<32x256xf32> to vector<32xf32>
    %12 = vector.shape_cast %11 : vector<32xf32> to vector<32x1xf32>
    %13 = arith.addf %9, %12 : vector<32x1xf32>
    %c0_9 = arith.constant 0 : index
    %c0_10 = arith.constant 0 : index
    %14 = vector.load %arg7[%c0_9, %c0_10] : memref<32x1xf32, #tpu.memory_space<vmem>>, vector<32x1xf32>
    tpu.vector_store %arg7[%c0_9, %c0_10], %13 {strides = array<i32>} : memref<32x1xf32, #tpu.memory_space<vmem>>, vector<32x1xf32>,
    %c1_i32 = arith.constant 1 : i32
    %15 = arith.cmpi eq, %arg0, %c1_i32 : i32
    %16 = arith.extui %15 : i1 to i32
    %c0_i32_11 = arith.constant 0 : i32
    %17 = arith.cmpi ne, %16, %c0_i32_11 : i32
    scf.if %17 {
      %c0_12 = arith.constant 0 : index
      %c0_13 = arith.constant 0 : index
      %18 = vector.load %arg6[%c0_12, %c0_13] : memref<32x1xf32, #tpu.memory_space<vmem>>, vector<32x1xf32>
      %cst_14 = arith.constant 0.001953125 : f32
      %19 = vector.broadcast %cst_14 : f32 to vector<32x1xf32>
      %20 = arith.mulf %18, %19 : vector<32x1xf32>
      %c0_15 = arith.constant 0 : index
      %c0_16 = arith.constant 0 : index
      %21 = vector.load %arg7[%c0_15, %c0_16] : memref<32x1xf32, #tpu.memory_space<vmem>>, vector<32x1xf32>
      %cst_17 = arith.constant 0.001953125 : f32
      %22 = vector.broadcast %cst_17 : f32 to vector<32x1xf32>
      %23 = arith.mulf %21, %22 : vector<32x1xf32>
      %24 = arith.mulf %20, %20 : vector<32x1xf32>
      %25 = arith.subf %23, %24 : vector<32x1xf32>
      %cst_18 = arith.constant 0.000000e+00 : f32
      %26 = vector.broadcast %cst_18 : f32 to vector<32x1xf32>
      %27 = arith.maximumf %25, %26 : vector<32x1xf32>
      %cst_19 = arith.constant 9.99999974E-6 : f32
      %28 = vector.broadcast %cst_19 : f32 to vector<32x1xf32>
      %29 = arith.addf %27, %28 : vector<32x1xf32>
      %30 = math.rsqrt %29 : vector<32x1xf32>
      %c0_20 = arith.constant 0 : index
      %c0_21 = arith.constant 0 : index
      %31 = vector.load %arg2[%c0_20, %c0_21] : memref<32x1xf32, #tpu.memory_space<vmem>>, vector<32x1xf32>
      %32 = arith.mulf %31, %30 : vector<32x1xf32>
      %c0_22 = arith.constant 0 : index
      %c0_23 = arith.constant 0 : index
      %33 = vector.load %arg4[%c0_22, %c0_23] : memref<32x1xf32, #tpu.memory_space<vmem>>, vector<32x1xf32>
      tpu.vector_store %arg4[%c0_22, %c0_23], %32 {strides = array<i32>} : memref<32x1xf32, #tpu.memory_space<vmem>>, vector<32x1xf32>,
      %c0_24 = arith.constant 0 : index
      %c0_25 = arith.constant 0 : index
      %34 = vector.load %arg3[%c0_24, %c0_25] : memref<32x1xf32, #tpu.memory_space<vmem>>, vector<32x1xf32>
      %35 = arith.mulf %20, %32 : vector<32x1xf32>
      %36 = arith.subf %34, %35 : vector<32x1xf32>
      %c0_26 = arith.constant 0 : index
      %c0_27 = arith.constant 0 : index
      %37 = vector.load %arg5[%c0_26, %c0_27] : memref<32x1xf32, #tpu.memory_space<vmem>>, vector<32x1xf32>
      tpu.vector_store %arg5[%c0_26, %c0_27], %36 {strides = array<i32>} : memref<32x1xf32, #tpu.memory_space<vmem>>, vector<32x1xf32>,
    } else {
    }
    return
  }
  func.func @transform_0(%arg0: i32) -> (i32, i32) {
    %c0_i32 = arith.constant 0 : i32
    %c0_i32_0 = arith.constant 0 : i32
    return %c0_i32, %arg0 : i32, i32
  }
  func.func @transform_1(%arg0: i32) -> (i32, i32) {
    %c0_i32 = arith.constant 0 : i32
    %c0_i32_0 = arith.constant 0 : i32
    %c0_i32_1 = arith.constant 0 : i32
    return %c0_i32, %c0_i32_0 : i32, i32
  }
  func.func @transform_2(%arg0: i32) -> (i32, i32) {
    %c0_i32 = arith.constant 0 : i32
    %c0_i32_0 = arith.constant 0 : i32
    %c0_i32_1 = arith.constant 0 : i32
    return %c0_i32, %c0_i32_0 : i32, i32
  }
  func.func @transform_3(%arg0: i32) -> (i32, i32) {
    %c0_i32 = arith.constant 0 : i32
    %c0_i32_0 = arith.constant 0 : i32
    %c0_i32_1 = arith.constant 0 : i32
    return %c0_i32, %c0_i32_0 : i32, i32
  }
  func.func @transform_4(%arg0: i32) -> (i32, i32) {
    %c0_i32 = arith.constant 0 : i32
    %c0_i32_0 = arith.constant 0 : i32
    %c0_i32_1 = arith.constant 0 : i32
    return %c0_i32, %c0_i32_0 : i32, i32
  }
}

module attributes {stable_mosaic.version = 11 : i64} {
  func.func @_bn_apply_kernel(%arg0: i32, %arg1: memref<32x256xf32, #tpu.memory_space<vmem>>, %arg2: memref<32x1xf32, #tpu.memory_space<vmem>>, %arg3: memref<32x1xf32, #tpu.memory_space<vmem>>, %arg4: memref<32x256xbf16, #tpu.memory_space<vmem>>) attributes {dimension_semantics = [#tpu.dimension_semantics<parallel>], iteration_bounds = array<i64: 2>, scalar_prefetch = 0 : i64, scratch_operands = 0 : i64, tpu.core_type = #tpu.core_type<tc>, window_params = [{transform_indices = @transform_0, window_bounds = array<i64: 32, 256>}, {pipeline_mode = #tpu.pipeline_mode<synchronous>, transform_indices = @transform_1, window_bounds = array<i64: 32, 1>}, {pipeline_mode = #tpu.pipeline_mode<synchronous>, transform_indices = @transform_2, window_bounds = array<i64: 32, 1>}, {transform_indices = @transform_3, window_bounds = array<i64: 32, 256>}]} {
    %c0 = arith.constant 0 : index
    %c0_0 = arith.constant 0 : index
    %0 = vector.load %arg1[%c0, %c0_0] : memref<32x256xf32, #tpu.memory_space<vmem>>, vector<32x256xf32>
    %c0_1 = arith.constant 0 : index
    %c0_2 = arith.constant 0 : index
    %1 = vector.load %arg2[%c0_1, %c0_2] : memref<32x1xf32, #tpu.memory_space<vmem>>, vector<32x1xf32>
    %2 = vector.broadcast %1 : vector<32x1xf32> to vector<32x256xf32>
    %3 = arith.mulf %0, %2 : vector<32x256xf32>
    %c0_3 = arith.constant 0 : index
    %c0_4 = arith.constant 0 : index
    %4 = vector.load %arg3[%c0_3, %c0_4] : memref<32x1xf32, #tpu.memory_space<vmem>>, vector<32x1xf32>
    %5 = vector.broadcast %4 : vector<32x1xf32> to vector<32x256xf32>
    %6 = arith.addf %3, %5 : vector<32x256xf32>
    %cst = arith.constant 0.000000e+00 : f32
    %7 = vector.broadcast %cst : f32 to vector<32x256xf32>
    %8 = arith.cmpf oge, %6, %7 : vector<32x256xf32>
    %cst_5 = arith.constant 2.000000e-01 : f32
    %9 = vector.broadcast %cst_5 : f32 to vector<32x256xf32>
    %10 = arith.mulf %9, %6 : vector<32x256xf32>
    %11 = arith.select %8, %6, %10 : vector<32x256xi1>, vector<32x256xf32>
    %12 = arith.truncf %11 : vector<32x256xf32> to vector<32x256xbf16>
    %c0_6 = arith.constant 0 : index
    %c0_7 = arith.constant 0 : index
    %13 = vector.load %arg4[%c0_6, %c0_7] : memref<32x256xbf16, #tpu.memory_space<vmem>>, vector<32x256xbf16>
    tpu.vector_store %arg4[%c0_6, %c0_7], %12 {strides = array<i32>} : memref<32x256xbf16, #tpu.memory_space<vmem>>, vector<32x256xbf16>,
    return
  }
  func.func @transform_0(%arg0: i32) -> (i32, i32) {
    %c0_i32 = arith.constant 0 : i32
    %c0_i32_0 = arith.constant 0 : i32
    return %c0_i32, %arg0 : i32, i32
  }
  func.func @transform_1(%arg0: i32) -> (i32, i32) {
    %c0_i32 = arith.constant 0 : i32
    %c0_i32_0 = arith.constant 0 : i32
    %c0_i32_1 = arith.constant 0 : i32
    return %c0_i32, %c0_i32_0 : i32, i32
  }
  func.func @transform_2(%arg0: i32) -> (i32, i32) {
    %c0_i32 = arith.constant 0 : i32
    %c0_i32_0 = arith.constant 0 : i32
    %c0_i32_1 = arith.constant 0 : i32
    return %c0_i32, %c0_i32_0 : i32, i32
  }
  func.func @transform_3(%arg0: i32) -> (i32, i32) {
    %c0_i32 = arith.constant 0 : i32
    %c0_i32_0 = arith.constant 0 : i32
    return %c0_i32, %arg0 : i32, i32
  }
}

module attributes {stable_mosaic.version = 11 : i64} {
  func.func @_convT_matmul_kernel(%arg0: i32, %arg1: i32, %arg2: memref<64x512xbf16, #tpu.memory_space<vmem>>, %arg3: memref<512x98xbf16, #tpu.memory_space<vmem>>, %arg4: memref<64x1xf32, #tpu.memory_space<vmem>>, %arg5: memref<64x98xf32, #tpu.memory_space<vmem>>, %arg6: memref<64x98xf32, #tpu.memory_space<vmem>>) attributes {dimension_semantics = [#tpu.dimension_semantics<parallel>, #tpu.dimension_semantics<arbitrary>], iteration_bounds = array<i64: 1, 1>, scalar_prefetch = 0 : i64, scratch_operands = 1 : i64, tpu.core_type = #tpu.core_type<tc>, window_params = [{transform_indices = @transform_0, window_bounds = array<i64: 64, 512>}, {transform_indices = @transform_1, window_bounds = array<i64: 512, 98>}, {pipeline_mode = #tpu.pipeline_mode<synchronous>, transform_indices = @transform_2, window_bounds = array<i64: 64, 1>}, {transform_indices = @transform_3, window_bounds = array<i64: 64, 98>}]} {
    %c0_i32 = arith.constant 0 : i32
    %0 = arith.cmpi eq, %arg1, %c0_i32 : i32
    %1 = arith.extui %0 : i1 to i32
    %c0_i32_0 = arith.constant 0 : i32
    %2 = arith.cmpi ne, %1, %c0_i32_0 : i32
    scf.if %2 {
      %cst_10 = arith.constant 0.000000e+00 : f32
      %12 = vector.broadcast %cst_10 : f32 to vector<64x98xf32>
      %c0_11 = arith.constant 0 : index
      %c0_12 = arith.constant 0 : index
      %13 = vector.load %arg6[%c0_11, %c0_12] : memref<64x98xf32, #tpu.memory_space<vmem>>, vector<64x98xf32>
      tpu.vector_store %arg6[%c0_11, %c0_12], %12 {strides = array<i32>} : memref<64x98xf32, #tpu.memory_space<vmem>>, vector<64x98xf32>,
    } else {
    }
    %c0 = arith.constant 0 : index
    %c0_1 = arith.constant 0 : index
    %3 = vector.load %arg6[%c0, %c0_1] : memref<64x98xf32, #tpu.memory_space<vmem>>, vector<64x98xf32>
    %c0_2 = arith.constant 0 : index
    %c0_3 = arith.constant 0 : index
    %4 = vector.load %arg2[%c0_2, %c0_3] : memref<64x512xbf16, #tpu.memory_space<vmem>>, vector<64x512xbf16>
    %c0_4 = arith.constant 0 : index
    %c0_5 = arith.constant 0 : index
    %5 = vector.load %arg3[%c0_4, %c0_5] : memref<512x98xbf16, #tpu.memory_space<vmem>>, vector<512x98xbf16>
    %cst = arith.constant dense<0.000000e+00> : vector<64x98xf32>
    %6 = tpu.matmul %4, %5, %cst {dimension_numbers = #tpu.dot_dimension_numbers<[1], [0], [0], [1], [0, 0, 1, 1], [], []>} : vector<64x512xbf16>, vector<512x98xbf16>, vector<64x98xf32> -> vector<64x98xf32>
    %7 = arith.addf %3, %6 : vector<64x98xf32>
    %c0_6 = arith.constant 0 : index
    %c0_7 = arith.constant 0 : index
    %8 = vector.load %arg6[%c0_6, %c0_7] : memref<64x98xf32, #tpu.memory_space<vmem>>, vector<64x98xf32>
    tpu.vector_store %arg6[%c0_6, %c0_7], %7 {strides = array<i32>} : memref<64x98xf32, #tpu.memory_space<vmem>>, vector<64x98xf32>,
    %c0_i32_8 = arith.constant 0 : i32
    %9 = arith.cmpi eq, %arg1, %c0_i32_8 : i32
    %10 = arith.extui %9 : i1 to i32
    %c0_i32_9 = arith.constant 0 : i32
    %11 = arith.cmpi ne, %10, %c0_i32_9 : i32
    scf.if %11 {
      %c0_10 = arith.constant 0 : index
      %c0_11 = arith.constant 0 : index
      %12 = vector.load %arg6[%c0_10, %c0_11] : memref<64x98xf32, #tpu.memory_space<vmem>>, vector<64x98xf32>
      %c0_12 = arith.constant 0 : index
      %c0_13 = arith.constant 0 : index
      %13 = vector.load %arg4[%c0_12, %c0_13] : memref<64x1xf32, #tpu.memory_space<vmem>>, vector<64x1xf32>
      %14 = vector.broadcast %13 : vector<64x1xf32> to vector<64x98xf32>
      %15 = arith.addf %12, %14 : vector<64x98xf32>
      %c0_14 = arith.constant 0 : index
      %c0_15 = arith.constant 0 : index
      %16 = vector.load %arg5[%c0_14, %c0_15] : memref<64x98xf32, #tpu.memory_space<vmem>>, vector<64x98xf32>
      tpu.vector_store %arg5[%c0_14, %c0_15], %15 {strides = array<i32>} : memref<64x98xf32, #tpu.memory_space<vmem>>, vector<64x98xf32>,
    } else {
    }
    return
  }
  func.func @transform_0(%arg0: i32, %arg1: i32) -> (i32, i32) {
    %c0_i32 = arith.constant 0 : i32
    %c0_i32_0 = arith.constant 0 : i32
    return %c0_i32, %arg1 : i32, i32
  }
  func.func @transform_1(%arg0: i32, %arg1: i32) -> (i32, i32) {
    %c0_i32 = arith.constant 0 : i32
    return %arg1, %arg0 : i32, i32
  }
  func.func @transform_2(%arg0: i32, %arg1: i32) -> (i32, i32) {
    %c0_i32 = arith.constant 0 : i32
    %c0_i32_0 = arith.constant 0 : i32
    %c0_i32_1 = arith.constant 0 : i32
    return %c0_i32, %c0_i32_0 : i32, i32
  }
  func.func @transform_3(%arg0: i32, %arg1: i32) -> (i32, i32) {
    %c0_i32 = arith.constant 0 : i32
    %c0_i32_0 = arith.constant 0 : i32
    return %c0_i32, %arg0 : i32, i32
  }
}

module attributes {stable_mosaic.version = 11 : i64} {
  func.func @_bn_stats_kernel(%arg0: i32, %arg1: memref<64x98xf32, #tpu.memory_space<vmem>>, %arg2: memref<64x1xf32, #tpu.memory_space<vmem>>, %arg3: memref<64x1xf32, #tpu.memory_space<vmem>>, %arg4: memref<64x1xf32, #tpu.memory_space<vmem>>, %arg5: memref<64x1xf32, #tpu.memory_space<vmem>>, %arg6: memref<64x1xf32, #tpu.memory_space<vmem>>, %arg7: memref<64x1xf32, #tpu.memory_space<vmem>>) attributes {dimension_semantics = [#tpu.dimension_semantics<arbitrary>], iteration_bounds = array<i64: 1>, scalar_prefetch = 0 : i64, scratch_operands = 2 : i64, tpu.core_type = #tpu.core_type<tc>, window_params = [{transform_indices = @transform_0, window_bounds = array<i64: 64, 98>}, {pipeline_mode = #tpu.pipeline_mode<synchronous>, transform_indices = @transform_1, window_bounds = array<i64: 64, 1>}, {pipeline_mode = #tpu.pipeline_mode<synchronous>, transform_indices = @transform_2, window_bounds = array<i64: 64, 1>}, {pipeline_mode = #tpu.pipeline_mode<synchronous>, transform_indices = @transform_3, window_bounds = array<i64: 64, 1>}, {pipeline_mode = #tpu.pipeline_mode<synchronous>, transform_indices = @transform_4, window_bounds = array<i64: 64, 1>}]} {
    %c0_i32 = arith.constant 0 : i32
    %0 = arith.cmpi eq, %arg0, %c0_i32 : i32
    %1 = arith.extui %0 : i1 to i32
    %c0_i32_0 = arith.constant 0 : i32
    %2 = arith.cmpi ne, %1, %c0_i32_0 : i32
    scf.if %2 {
      %cst_13 = arith.constant 0.000000e+00 : f32
      %18 = vector.broadcast %cst_13 : f32 to vector<64x1xf32>
      %c0_14 = arith.constant 0 : index
      %c0_15 = arith.constant 0 : index
      %19 = vector.load %arg6[%c0_14, %c0_15] : memref<64x1xf32, #tpu.memory_space<vmem>>, vector<64x1xf32>
      tpu.vector_store %arg6[%c0_14, %c0_15], %18 {strides = array<i32>} : memref<64x1xf32, #tpu.memory_space<vmem>>, vector<64x1xf32>,
      %cst_16 = arith.constant 0.000000e+00 : f32
      %20 = vector.broadcast %cst_16 : f32 to vector<64x1xf32>
      %c0_17 = arith.constant 0 : index
      %c0_18 = arith.constant 0 : index
      %21 = vector.load %arg7[%c0_17, %c0_18] : memref<64x1xf32, #tpu.memory_space<vmem>>, vector<64x1xf32>
      tpu.vector_store %arg7[%c0_17, %c0_18], %20 {strides = array<i32>} : memref<64x1xf32, #tpu.memory_space<vmem>>, vector<64x1xf32>,
    } else {
    }
    %c0 = arith.constant 0 : index
    %c0_1 = arith.constant 0 : index
    %3 = vector.load %arg1[%c0, %c0_1] : memref<64x98xf32, #tpu.memory_space<vmem>>, vector<64x98xf32>
    %c0_2 = arith.constant 0 : index
    %c0_3 = arith.constant 0 : index
    %4 = vector.load %arg6[%c0_2, %c0_3] : memref<64x1xf32, #tpu.memory_space<vmem>>, vector<64x1xf32>
    %cst = arith.constant dense<0.000000e+00> : vector<64xf32>
    %5 = vector.multi_reduction <add>, %3, %cst [1] : vector<64x98xf32> to vector<64xf32>
    %6 = vector.shape_cast %5 : vector<64xf32> to vector<64x1xf32>
    %7 = arith.addf %4, %6 : vector<64x1xf32>
    %c0_4 = arith.constant 0 : index
    %c0_5 = arith.constant 0 : index
    %8 = vector.load %arg6[%c0_4, %c0_5] : memref<64x1xf32, #tpu.memory_space<vmem>>, vector<64x1xf32>
    tpu.vector_store %arg6[%c0_4, %c0_5], %7 {strides = array<i32>} : memref<64x1xf32, #tpu.memory_space<vmem>>, vector<64x1xf32>,
    %c0_6 = arith.constant 0 : index
    %c0_7 = arith.constant 0 : index
    %9 = vector.load %arg7[%c0_6, %c0_7] : memref<64x1xf32, #tpu.memory_space<vmem>>, vector<64x1xf32>
    %10 = arith.mulf %3, %3 : vector<64x98xf32>
    %cst_8 = arith.constant dense<0.000000e+00> : vector<64xf32>
    %11 = vector.multi_reduction <add>, %10, %cst_8 [1] : vector<64x98xf32> to vector<64xf32>
    %12 = vector.shape_cast %11 : vector<64xf32> to vector<64x1xf32>
    %13 = arith.addf %9, %12 : vector<64x1xf32>
    %c0_9 = arith.constant 0 : index
    %c0_10 = arith.constant 0 : index
    %14 = vector.load %arg7[%c0_9, %c0_10] : memref<64x1xf32, #tpu.memory_space<vmem>>, vector<64x1xf32>
    tpu.vector_store %arg7[%c0_9, %c0_10], %13 {strides = array<i32>} : memref<64x1xf32, #tpu.memory_space<vmem>>, vector<64x1xf32>,
    %c0_i32_11 = arith.constant 0 : i32
    %15 = arith.cmpi eq, %arg0, %c0_i32_11 : i32
    %16 = arith.extui %15 : i1 to i32
    %c0_i32_12 = arith.constant 0 : i32
    %17 = arith.cmpi ne, %16, %c0_i32_12 : i32
    scf.if %17 {
      %c0_13 = arith.constant 0 : index
      %c0_14 = arith.constant 0 : index
      %18 = vector.load %arg6[%c0_13, %c0_14] : memref<64x1xf32, #tpu.memory_space<vmem>>, vector<64x1xf32>
      %cst_15 = arith.constant 0.0102040814 : f32
      %19 = vector.broadcast %cst_15 : f32 to vector<64x1xf32>
      %20 = arith.mulf %18, %19 : vector<64x1xf32>
      %c0_16 = arith.constant 0 : index
      %c0_17 = arith.constant 0 : index
      %21 = vector.load %arg7[%c0_16, %c0_17] : memref<64x1xf32, #tpu.memory_space<vmem>>, vector<64x1xf32>
      %cst_18 = arith.constant 0.0102040814 : f32
      %22 = vector.broadcast %cst_18 : f32 to vector<64x1xf32>
      %23 = arith.mulf %21, %22 : vector<64x1xf32>
      %24 = arith.mulf %20, %20 : vector<64x1xf32>
      %25 = arith.subf %23, %24 : vector<64x1xf32>
      %cst_19 = arith.constant 0.000000e+00 : f32
      %26 = vector.broadcast %cst_19 : f32 to vector<64x1xf32>
      %27 = arith.maximumf %25, %26 : vector<64x1xf32>
      %cst_20 = arith.constant 9.99999974E-6 : f32
      %28 = vector.broadcast %cst_20 : f32 to vector<64x1xf32>
      %29 = arith.addf %27, %28 : vector<64x1xf32>
      %30 = math.rsqrt %29 : vector<64x1xf32>
      %c0_21 = arith.constant 0 : index
      %c0_22 = arith.constant 0 : index
      %31 = vector.load %arg2[%c0_21, %c0_22] : memref<64x1xf32, #tpu.memory_space<vmem>>, vector<64x1xf32>
      %32 = arith.mulf %31, %30 : vector<64x1xf32>
      %c0_23 = arith.constant 0 : index
      %c0_24 = arith.constant 0 : index
      %33 = vector.load %arg4[%c0_23, %c0_24] : memref<64x1xf32, #tpu.memory_space<vmem>>, vector<64x1xf32>
      tpu.vector_store %arg4[%c0_23, %c0_24], %32 {strides = array<i32>} : memref<64x1xf32, #tpu.memory_space<vmem>>, vector<64x1xf32>,
      %c0_25 = arith.constant 0 : index
      %c0_26 = arith.constant 0 : index
      %34 = vector.load %arg3[%c0_25, %c0_26] : memref<64x1xf32, #tpu.memory_space<vmem>>, vector<64x1xf32>
      %35 = arith.mulf %20, %32 : vector<64x1xf32>
      %36 = arith.subf %34, %35 : vector<64x1xf32>
      %c0_27 = arith.constant 0 : index
      %c0_28 = arith.constant 0 : index
      %37 = vector.load %arg5[%c0_27, %c0_28] : memref<64x1xf32, #tpu.memory_space<vmem>>, vector<64x1xf32>
      tpu.vector_store %arg5[%c0_27, %c0_28], %36 {strides = array<i32>} : memref<64x1xf32, #tpu.memory_space<vmem>>, vector<64x1xf32>,
    } else {
    }
    return
  }
  func.func @transform_0(%arg0: i32) -> (i32, i32) {
    %c0_i32 = arith.constant 0 : i32
    %c0_i32_0 = arith.constant 0 : i32
    return %c0_i32, %arg0 : i32, i32
  }
  func.func @transform_1(%arg0: i32) -> (i32, i32) {
    %c0_i32 = arith.constant 0 : i32
    %c0_i32_0 = arith.constant 0 : i32
    %c0_i32_1 = arith.constant 0 : i32
    return %c0_i32, %c0_i32_0 : i32, i32
  }
  func.func @transform_2(%arg0: i32) -> (i32, i32) {
    %c0_i32 = arith.constant 0 : i32
    %c0_i32_0 = arith.constant 0 : i32
    %c0_i32_1 = arith.constant 0 : i32
    return %c0_i32, %c0_i32_0 : i32, i32
  }
  func.func @transform_3(%arg0: i32) -> (i32, i32) {
    %c0_i32 = arith.constant 0 : i32
    %c0_i32_0 = arith.constant 0 : i32
    %c0_i32_1 = arith.constant 0 : i32
    return %c0_i32, %c0_i32_0 : i32, i32
  }
  func.func @transform_4(%arg0: i32) -> (i32, i32) {
    %c0_i32 = arith.constant 0 : i32
    %c0_i32_0 = arith.constant 0 : i32
    %c0_i32_1 = arith.constant 0 : i32
    return %c0_i32, %c0_i32_0 : i32, i32
  }
}

module attributes {stable_mosaic.version = 11 : i64} {
  func.func @_bn_apply_kernel(%arg0: i32, %arg1: memref<64x98xf32, #tpu.memory_space<vmem>>, %arg2: memref<64x1xf32, #tpu.memory_space<vmem>>, %arg3: memref<64x1xf32, #tpu.memory_space<vmem>>, %arg4: memref<64x98xbf16, #tpu.memory_space<vmem>>) attributes {dimension_semantics = [#tpu.dimension_semantics<parallel>], iteration_bounds = array<i64: 1>, scalar_prefetch = 0 : i64, scratch_operands = 0 : i64, tpu.core_type = #tpu.core_type<tc>, window_params = [{transform_indices = @transform_0, window_bounds = array<i64: 64, 98>}, {pipeline_mode = #tpu.pipeline_mode<synchronous>, transform_indices = @transform_1, window_bounds = array<i64: 64, 1>}, {pipeline_mode = #tpu.pipeline_mode<synchronous>, transform_indices = @transform_2, window_bounds = array<i64: 64, 1>}, {transform_indices = @transform_3, window_bounds = array<i64: 64, 98>}]} {
    %c0 = arith.constant 0 : index
    %c0_0 = arith.constant 0 : index
    %0 = vector.load %arg1[%c0, %c0_0] : memref<64x98xf32, #tpu.memory_space<vmem>>, vector<64x98xf32>
    %c0_1 = arith.constant 0 : index
    %c0_2 = arith.constant 0 : index
    %1 = vector.load %arg2[%c0_1, %c0_2] : memref<64x1xf32, #tpu.memory_space<vmem>>, vector<64x1xf32>
    %2 = vector.broadcast %1 : vector<64x1xf32> to vector<64x98xf32>
    %3 = arith.mulf %0, %2 : vector<64x98xf32>
    %c0_3 = arith.constant 0 : index
    %c0_4 = arith.constant 0 : index
    %4 = vector.load %arg3[%c0_3, %c0_4] : memref<64x1xf32, #tpu.memory_space<vmem>>, vector<64x1xf32>
    %5 = vector.broadcast %4 : vector<64x1xf32> to vector<64x98xf32>
    %6 = arith.addf %3, %5 : vector<64x98xf32>
    %cst = arith.constant 0.000000e+00 : f32
    %7 = vector.broadcast %cst : f32 to vector<64x98xf32>
    %8 = arith.cmpf oge, %6, %7 : vector<64x98xf32>
    %cst_5 = arith.constant 2.000000e-01 : f32
    %9 = vector.broadcast %cst_5 : f32 to vector<64x98xf32>
    %10 = arith.mulf %9, %6 : vector<64x98xf32>
    %11 = arith.select %8, %6, %10 : vector<64x98xi1>, vector<64x98xf32>
    %12 = arith.truncf %11 : vector<64x98xf32> to vector<64x98xbf16>
    %c0_6 = arith.constant 0 : index
    %c0_7 = arith.constant 0 : index
    %13 = vector.load %arg4[%c0_6, %c0_7] : memref<64x98xbf16, #tpu.memory_space<vmem>>, vector<64x98xbf16>
    tpu.vector_store %arg4[%c0_6, %c0_7], %12 {strides = array<i32>} : memref<64x98xbf16, #tpu.memory_space<vmem>>, vector<64x98xbf16>,
    return
  }
  func.func @transform_0(%arg0: i32) -> (i32, i32) {
    %c0_i32 = arith.constant 0 : i32
    %c0_i32_0 = arith.constant 0 : i32
    return %c0_i32, %arg0 : i32, i32
  }
  func.func @transform_1(%arg0: i32) -> (i32, i32) {
    %c0_i32 = arith.constant 0 : i32
    %c0_i32_0 = arith.constant 0 : i32
    %c0_i32_1 = arith.constant 0 : i32
    return %c0_i32, %c0_i32_0 : i32, i32
  }
  func.func @transform_2(%arg0: i32) -> (i32, i32) {
    %c0_i32 = arith.constant 0 : i32
    %c0_i32_0 = arith.constant 0 : i32
    %c0_i32_1 = arith.constant 0 : i32
    return %c0_i32, %c0_i32_0 : i32, i32
  }
  func.func @transform_3(%arg0: i32) -> (i32, i32) {
    %c0_i32 = arith.constant 0 : i32
    %c0_i32_0 = arith.constant 0 : i32
    return %c0_i32, %arg0 : i32, i32
  }
}

module attributes {stable_mosaic.version = 11 : i64} {
  func.func @_convT_matmul_kernel(%arg0: i32, %arg1: i32, %arg2: memref<128x1024xbf16, #tpu.memory_space<vmem>>, %arg3: memref<1024x32xbf16, #tpu.memory_space<vmem>>, %arg4: memref<128x1xf32, #tpu.memory_space<vmem>>, %arg5: memref<128x32xf32, #tpu.memory_space<vmem>>, %arg6: memref<128x32xf32, #tpu.memory_space<vmem>>) attributes {dimension_semantics = [#tpu.dimension_semantics<parallel>, #tpu.dimension_semantics<arbitrary>], iteration_bounds = array<i64: 1, 1>, scalar_prefetch = 0 : i64, scratch_operands = 1 : i64, tpu.core_type = #tpu.core_type<tc>, window_params = [{transform_indices = @transform_0, window_bounds = array<i64: 128, 1024>}, {transform_indices = @transform_1, window_bounds = array<i64: 1024, 32>}, {pipeline_mode = #tpu.pipeline_mode<synchronous>, transform_indices = @transform_2, window_bounds = array<i64: 128, 1>}, {transform_indices = @transform_3, window_bounds = array<i64: 128, 32>}]} {
    %c0_i32 = arith.constant 0 : i32
    %0 = arith.cmpi eq, %arg1, %c0_i32 : i32
    %1 = arith.extui %0 : i1 to i32
    %c0_i32_0 = arith.constant 0 : i32
    %2 = arith.cmpi ne, %1, %c0_i32_0 : i32
    scf.if %2 {
      %cst_10 = arith.constant 0.000000e+00 : f32
      %12 = vector.broadcast %cst_10 : f32 to vector<128x32xf32>
      %c0_11 = arith.constant 0 : index
      %c0_12 = arith.constant 0 : index
      %13 = vector.load %arg6[%c0_11, %c0_12] : memref<128x32xf32, #tpu.memory_space<vmem>>, vector<128x32xf32>
      tpu.vector_store %arg6[%c0_11, %c0_12], %12 {strides = array<i32>} : memref<128x32xf32, #tpu.memory_space<vmem>>, vector<128x32xf32>,
    } else {
    }
    %c0 = arith.constant 0 : index
    %c0_1 = arith.constant 0 : index
    %3 = vector.load %arg6[%c0, %c0_1] : memref<128x32xf32, #tpu.memory_space<vmem>>, vector<128x32xf32>
    %c0_2 = arith.constant 0 : index
    %c0_3 = arith.constant 0 : index
    %4 = vector.load %arg2[%c0_2, %c0_3] : memref<128x1024xbf16, #tpu.memory_space<vmem>>, vector<128x1024xbf16>
    %c0_4 = arith.constant 0 : index
    %c0_5 = arith.constant 0 : index
    %5 = vector.load %arg3[%c0_4, %c0_5] : memref<1024x32xbf16, #tpu.memory_space<vmem>>, vector<1024x32xbf16>
    %cst = arith.constant dense<0.000000e+00> : vector<128x32xf32>
    %6 = tpu.matmul %4, %5, %cst {dimension_numbers = #tpu.dot_dimension_numbers<[1], [0], [0], [1], [0, 0, 1, 1], [], []>} : vector<128x1024xbf16>, vector<1024x32xbf16>, vector<128x32xf32> -> vector<128x32xf32>
    %7 = arith.addf %3, %6 : vector<128x32xf32>
    %c0_6 = arith.constant 0 : index
    %c0_7 = arith.constant 0 : index
    %8 = vector.load %arg6[%c0_6, %c0_7] : memref<128x32xf32, #tpu.memory_space<vmem>>, vector<128x32xf32>
    tpu.vector_store %arg6[%c0_6, %c0_7], %7 {strides = array<i32>} : memref<128x32xf32, #tpu.memory_space<vmem>>, vector<128x32xf32>,
    %c0_i32_8 = arith.constant 0 : i32
    %9 = arith.cmpi eq, %arg1, %c0_i32_8 : i32
    %10 = arith.extui %9 : i1 to i32
    %c0_i32_9 = arith.constant 0 : i32
    %11 = arith.cmpi ne, %10, %c0_i32_9 : i32
    scf.if %11 {
      %c0_10 = arith.constant 0 : index
      %c0_11 = arith.constant 0 : index
      %12 = vector.load %arg6[%c0_10, %c0_11] : memref<128x32xf32, #tpu.memory_space<vmem>>, vector<128x32xf32>
      %c0_12 = arith.constant 0 : index
      %c0_13 = arith.constant 0 : index
      %13 = vector.load %arg4[%c0_12, %c0_13] : memref<128x1xf32, #tpu.memory_space<vmem>>, vector<128x1xf32>
      %14 = vector.broadcast %13 : vector<128x1xf32> to vector<128x32xf32>
      %15 = arith.addf %12, %14 : vector<128x32xf32>
      %c0_14 = arith.constant 0 : index
      %c0_15 = arith.constant 0 : index
      %16 = vector.load %arg5[%c0_14, %c0_15] : memref<128x32xf32, #tpu.memory_space<vmem>>, vector<128x32xf32>
      tpu.vector_store %arg5[%c0_14, %c0_15], %15 {strides = array<i32>} : memref<128x32xf32, #tpu.memory_space<vmem>>, vector<128x32xf32>,
    } else {
    }
    return
  }
  func.func @transform_0(%arg0: i32, %arg1: i32) -> (i32, i32) {
    %c0_i32 = arith.constant 0 : i32
    %c0_i32_0 = arith.constant 0 : i32
    return %c0_i32, %arg1 : i32, i32
  }
  func.func @transform_1(%arg0: i32, %arg1: i32) -> (i32, i32) {
    %c0_i32 = arith.constant 0 : i32
    return %arg1, %arg0 : i32, i32
  }
  func.func @transform_2(%arg0: i32, %arg1: i32) -> (i32, i32) {
    %c0_i32 = arith.constant 0 : i32
    %c0_i32_0 = arith.constant 0 : i32
    %c0_i32_1 = arith.constant 0 : i32
    return %c0_i32, %c0_i32_0 : i32, i32
  }
  func.func @transform_3(%arg0: i32, %arg1: i32) -> (i32, i32) {
    %c0_i32 = arith.constant 0 : i32
    %c0_i32_0 = arith.constant 0 : i32
    return %c0_i32, %arg0 : i32, i32
  }
}

module attributes {stable_mosaic.version = 11 : i64} {
  func.func @_bn_stats_kernel(%arg0: i32, %arg1: memref<128x32xf32, #tpu.memory_space<vmem>>, %arg2: memref<128x1xf32, #tpu.memory_space<vmem>>, %arg3: memref<128x1xf32, #tpu.memory_space<vmem>>, %arg4: memref<128x1xf32, #tpu.memory_space<vmem>>, %arg5: memref<128x1xf32, #tpu.memory_space<vmem>>, %arg6: memref<128x1xf32, #tpu.memory_space<vmem>>, %arg7: memref<128x1xf32, #tpu.memory_space<vmem>>) attributes {dimension_semantics = [#tpu.dimension_semantics<arbitrary>], iteration_bounds = array<i64: 1>, scalar_prefetch = 0 : i64, scratch_operands = 2 : i64, tpu.core_type = #tpu.core_type<tc>, window_params = [{transform_indices = @transform_0, window_bounds = array<i64: 128, 32>}, {pipeline_mode = #tpu.pipeline_mode<synchronous>, transform_indices = @transform_1, window_bounds = array<i64: 128, 1>}, {pipeline_mode = #tpu.pipeline_mode<synchronous>, transform_indices = @transform_2, window_bounds = array<i64: 128, 1>}, {pipeline_mode = #tpu.pipeline_mode<synchronous>, transform_indices = @transform_3, window_bounds = array<i64: 128, 1>}, {pipeline_mode = #tpu.pipeline_mode<synchronous>, transform_indices = @transform_4, window_bounds = array<i64: 128, 1>}]} {
    %c0_i32 = arith.constant 0 : i32
    %0 = arith.cmpi eq, %arg0, %c0_i32 : i32
    %1 = arith.extui %0 : i1 to i32
    %c0_i32_0 = arith.constant 0 : i32
    %2 = arith.cmpi ne, %1, %c0_i32_0 : i32
    scf.if %2 {
      %cst_13 = arith.constant 0.000000e+00 : f32
      %18 = vector.broadcast %cst_13 : f32 to vector<128x1xf32>
      %c0_14 = arith.constant 0 : index
      %c0_15 = arith.constant 0 : index
      %19 = vector.load %arg6[%c0_14, %c0_15] : memref<128x1xf32, #tpu.memory_space<vmem>>, vector<128x1xf32>
      tpu.vector_store %arg6[%c0_14, %c0_15], %18 {strides = array<i32>} : memref<128x1xf32, #tpu.memory_space<vmem>>, vector<128x1xf32>,
      %cst_16 = arith.constant 0.000000e+00 : f32
      %20 = vector.broadcast %cst_16 : f32 to vector<128x1xf32>
      %c0_17 = arith.constant 0 : index
      %c0_18 = arith.constant 0 : index
      %21 = vector.load %arg7[%c0_17, %c0_18] : memref<128x1xf32, #tpu.memory_space<vmem>>, vector<128x1xf32>
      tpu.vector_store %arg7[%c0_17, %c0_18], %20 {strides = array<i32>} : memref<128x1xf32, #tpu.memory_space<vmem>>, vector<128x1xf32>,
    } else {
    }
    %c0 = arith.constant 0 : index
    %c0_1 = arith.constant 0 : index
    %3 = vector.load %arg1[%c0, %c0_1] : memref<128x32xf32, #tpu.memory_space<vmem>>, vector<128x32xf32>
    %c0_2 = arith.constant 0 : index
    %c0_3 = arith.constant 0 : index
    %4 = vector.load %arg6[%c0_2, %c0_3] : memref<128x1xf32, #tpu.memory_space<vmem>>, vector<128x1xf32>
    %cst = arith.constant dense<0.000000e+00> : vector<128xf32>
    %5 = vector.multi_reduction <add>, %3, %cst [1] : vector<128x32xf32> to vector<128xf32>
    %6 = vector.shape_cast %5 : vector<128xf32> to vector<128x1xf32>
    %7 = arith.addf %4, %6 : vector<128x1xf32>
    %c0_4 = arith.constant 0 : index
    %c0_5 = arith.constant 0 : index
    %8 = vector.load %arg6[%c0_4, %c0_5] : memref<128x1xf32, #tpu.memory_space<vmem>>, vector<128x1xf32>
    tpu.vector_store %arg6[%c0_4, %c0_5], %7 {strides = array<i32>} : memref<128x1xf32, #tpu.memory_space<vmem>>, vector<128x1xf32>,
    %c0_6 = arith.constant 0 : index
    %c0_7 = arith.constant 0 : index
    %9 = vector.load %arg7[%c0_6, %c0_7] : memref<128x1xf32, #tpu.memory_space<vmem>>, vector<128x1xf32>
    %10 = arith.mulf %3, %3 : vector<128x32xf32>
    %cst_8 = arith.constant dense<0.000000e+00> : vector<128xf32>
    %11 = vector.multi_reduction <add>, %10, %cst_8 [1] : vector<128x32xf32> to vector<128xf32>
    %12 = vector.shape_cast %11 : vector<128xf32> to vector<128x1xf32>
    %13 = arith.addf %9, %12 : vector<128x1xf32>
    %c0_9 = arith.constant 0 : index
    %c0_10 = arith.constant 0 : index
    %14 = vector.load %arg7[%c0_9, %c0_10] : memref<128x1xf32, #tpu.memory_space<vmem>>, vector<128x1xf32>
    tpu.vector_store %arg7[%c0_9, %c0_10], %13 {strides = array<i32>} : memref<128x1xf32, #tpu.memory_space<vmem>>, vector<128x1xf32>,
    %c0_i32_11 = arith.constant 0 : i32
    %15 = arith.cmpi eq, %arg0, %c0_i32_11 : i32
    %16 = arith.extui %15 : i1 to i32
    %c0_i32_12 = arith.constant 0 : i32
    %17 = arith.cmpi ne, %16, %c0_i32_12 : i32
    scf.if %17 {
      %c0_13 = arith.constant 0 : index
      %c0_14 = arith.constant 0 : index
      %18 = vector.load %arg6[%c0_13, %c0_14] : memref<128x1xf32, #tpu.memory_space<vmem>>, vector<128x1xf32>
      %cst_15 = arith.constant 3.125000e-02 : f32
      %19 = vector.broadcast %cst_15 : f32 to vector<128x1xf32>
      %20 = arith.mulf %18, %19 : vector<128x1xf32>
      %c0_16 = arith.constant 0 : index
      %c0_17 = arith.constant 0 : index
      %21 = vector.load %arg7[%c0_16, %c0_17] : memref<128x1xf32, #tpu.memory_space<vmem>>, vector<128x1xf32>
      %cst_18 = arith.constant 3.125000e-02 : f32
      %22 = vector.broadcast %cst_18 : f32 to vector<128x1xf32>
      %23 = arith.mulf %21, %22 : vector<128x1xf32>
      %24 = arith.mulf %20, %20 : vector<128x1xf32>
      %25 = arith.subf %23, %24 : vector<128x1xf32>
      %cst_19 = arith.constant 0.000000e+00 : f32
      %26 = vector.broadcast %cst_19 : f32 to vector<128x1xf32>
      %27 = arith.maximumf %25, %26 : vector<128x1xf32>
      %cst_20 = arith.constant 9.99999974E-6 : f32
      %28 = vector.broadcast %cst_20 : f32 to vector<128x1xf32>
      %29 = arith.addf %27, %28 : vector<128x1xf32>
      %30 = math.rsqrt %29 : vector<128x1xf32>
      %c0_21 = arith.constant 0 : index
      %c0_22 = arith.constant 0 : index
      %31 = vector.load %arg2[%c0_21, %c0_22] : memref<128x1xf32, #tpu.memory_space<vmem>>, vector<128x1xf32>
      %32 = arith.mulf %31, %30 : vector<128x1xf32>
      %c0_23 = arith.constant 0 : index
      %c0_24 = arith.constant 0 : index
      %33 = vector.load %arg4[%c0_23, %c0_24] : memref<128x1xf32, #tpu.memory_space<vmem>>, vector<128x1xf32>
      tpu.vector_store %arg4[%c0_23, %c0_24], %32 {strides = array<i32>} : memref<128x1xf32, #tpu.memory_space<vmem>>, vector<128x1xf32>,
      %c0_25 = arith.constant 0 : index
      %c0_26 = arith.constant 0 : index
      %34 = vector.load %arg3[%c0_25, %c0_26] : memref<128x1xf32, #tpu.memory_space<vmem>>, vector<128x1xf32>
      %35 = arith.mulf %20, %32 : vector<128x1xf32>
      %36 = arith.subf %34, %35 : vector<128x1xf32>
      %c0_27 = arith.constant 0 : index
      %c0_28 = arith.constant 0 : index
      %37 = vector.load %arg5[%c0_27, %c0_28] : memref<128x1xf32, #tpu.memory_space<vmem>>, vector<128x1xf32>
      tpu.vector_store %arg5[%c0_27, %c0_28], %36 {strides = array<i32>} : memref<128x1xf32, #tpu.memory_space<vmem>>, vector<128x1xf32>,
    } else {
    }
    return
  }
  func.func @transform_0(%arg0: i32) -> (i32, i32) {
    %c0_i32 = arith.constant 0 : i32
    %c0_i32_0 = arith.constant 0 : i32
    return %c0_i32, %arg0 : i32, i32
  }
  func.func @transform_1(%arg0: i32) -> (i32, i32) {
    %c0_i32 = arith.constant 0 : i32
    %c0_i32_0 = arith.constant 0 : i32
    %c0_i32_1 = arith.constant 0 : i32
    return %c0_i32, %c0_i32_0 : i32, i32
  }
  func.func @transform_2(%arg0: i32) -> (i32, i32) {
    %c0_i32 = arith.constant 0 : i32
    %c0_i32_0 = arith.constant 0 : i32
    %c0_i32_1 = arith.constant 0 : i32
    return %c0_i32, %c0_i32_0 : i32, i32
  }
  func.func @transform_3(%arg0: i32) -> (i32, i32) {
    %c0_i32 = arith.constant 0 : i32
    %c0_i32_0 = arith.constant 0 : i32
    %c0_i32_1 = arith.constant 0 : i32
    return %c0_i32, %c0_i32_0 : i32, i32
  }
  func.func @transform_4(%arg0: i32) -> (i32, i32) {
    %c0_i32 = arith.constant 0 : i32
    %c0_i32_0 = arith.constant 0 : i32
    %c0_i32_1 = arith.constant 0 : i32
    return %c0_i32, %c0_i32_0 : i32, i32
  }
}

module attributes {stable_mosaic.version = 11 : i64} {
  func.func @_bn_apply_kernel(%arg0: i32, %arg1: memref<128x32xf32, #tpu.memory_space<vmem>>, %arg2: memref<128x1xf32, #tpu.memory_space<vmem>>, %arg3: memref<128x1xf32, #tpu.memory_space<vmem>>, %arg4: memref<128x32xbf16, #tpu.memory_space<vmem>>) attributes {dimension_semantics = [#tpu.dimension_semantics<parallel>], iteration_bounds = array<i64: 1>, scalar_prefetch = 0 : i64, scratch_operands = 0 : i64, tpu.core_type = #tpu.core_type<tc>, window_params = [{transform_indices = @transform_0, window_bounds = array<i64: 128, 32>}, {pipeline_mode = #tpu.pipeline_mode<synchronous>, transform_indices = @transform_1, window_bounds = array<i64: 128, 1>}, {pipeline_mode = #tpu.pipeline_mode<synchronous>, transform_indices = @transform_2, window_bounds = array<i64: 128, 1>}, {transform_indices = @transform_3, window_bounds = array<i64: 128, 32>}]} {
    %c0 = arith.constant 0 : index
    %c0_0 = arith.constant 0 : index
    %0 = vector.load %arg1[%c0, %c0_0] : memref<128x32xf32, #tpu.memory_space<vmem>>, vector<128x32xf32>
    %c0_1 = arith.constant 0 : index
    %c0_2 = arith.constant 0 : index
    %1 = vector.load %arg2[%c0_1, %c0_2] : memref<128x1xf32, #tpu.memory_space<vmem>>, vector<128x1xf32>
    %2 = vector.broadcast %1 : vector<128x1xf32> to vector<128x32xf32>
    %3 = arith.mulf %0, %2 : vector<128x32xf32>
    %c0_3 = arith.constant 0 : index
    %c0_4 = arith.constant 0 : index
    %4 = vector.load %arg3[%c0_3, %c0_4] : memref<128x1xf32, #tpu.memory_space<vmem>>, vector<128x1xf32>
    %5 = vector.broadcast %4 : vector<128x1xf32> to vector<128x32xf32>
    %6 = arith.addf %3, %5 : vector<128x32xf32>
    %cst = arith.constant 0.000000e+00 : f32
    %7 = vector.broadcast %cst : f32 to vector<128x32xf32>
    %8 = arith.cmpf oge, %6, %7 : vector<128x32xf32>
    %cst_5 = arith.constant 2.000000e-01 : f32
    %9 = vector.broadcast %cst_5 : f32 to vector<128x32xf32>
    %10 = arith.mulf %9, %6 : vector<128x32xf32>
    %11 = arith.select %8, %6, %10 : vector<128x32xi1>, vector<128x32xf32>
    %12 = arith.truncf %11 : vector<128x32xf32> to vector<128x32xbf16>
    %c0_6 = arith.constant 0 : index
    %c0_7 = arith.constant 0 : index
    %13 = vector.load %arg4[%c0_6, %c0_7] : memref<128x32xbf16, #tpu.memory_space<vmem>>, vector<128x32xbf16>
    tpu.vector_store %arg4[%c0_6, %c0_7], %12 {strides = array<i32>} : memref<128x32xbf16, #tpu.memory_space<vmem>>, vector<128x32xbf16>,
    return
  }
  func.func @transform_0(%arg0: i32) -> (i32, i32) {
    %c0_i32 = arith.constant 0 : i32
    %c0_i32_0 = arith.constant 0 : i32
    return %c0_i32, %arg0 : i32, i32
  }
  func.func @transform_1(%arg0: i32) -> (i32, i32) {
    %c0_i32 = arith.constant 0 : i32
    %c0_i32_0 = arith.constant 0 : i32
    %c0_i32_1 = arith.constant 0 : i32
    return %c0_i32, %c0_i32_0 : i32, i32
  }
  func.func @transform_2(%arg0: i32) -> (i32, i32) {
    %c0_i32 = arith.constant 0 : i32
    %c0_i32_0 = arith.constant 0 : i32
    %c0_i32_1 = arith.constant 0 : i32
    return %c0_i32, %c0_i32_0 : i32, i32
  }
  func.func @transform_3(%arg0: i32) -> (i32, i32) {
    %c0_i32 = arith.constant 0 : i32
    %c0_i32_0 = arith.constant 0 : i32
    return %c0_i32, %arg0 : i32, i32
  }
}

</mosaic_0001>

<bundles_post_ra>
// kernel: discriminator_forward.10
= control target key start
LH: loop header
LB: loop body
LE: loop exit
PB: predicated region body
PF: predicated region fallthrough
CT: control target
= control target key end

     0   :  { %v2015_v1 = vmov 0   ;;  %vm799_vm0 = vcmask 785408   ;;  %vm2017_vm1 = vmmov 0   ;;  %vm37_vm2 = vcmask 64512   ;;  %s2527_s1 = inlined_call_operand.vmem [shape: bf16[96,2312], index: 1, kind: input, shape index: {}]   ;;  %s2528_s0 = inlined_call_operand.vmem [shape: bf16[16,96], index: 0, kind: input, shape index: {}]   ;;  %s2529_s2 = inlined_call_operand.vmem [shape: f32[16,1], index: 2, kind: input, shape index: {}]   ;;  %s2530_s3 = inlined_call_operand.vmem [shape: bf16[16,2312], index: 3, kind: output, shape index: {}]  }
   0x1   :  { %v1846_v0 = vld [vmem:[%s2527_s1 + $0x4] ss:$76 sps:$4 sm:$0xff]   ;;  %835 = vmatprep.mubr.bf16.mxu0 %v2015_v1  ;;  %878 = vmatprep.mubr.bf16.mxu1 %v2015_v1  ;;  %v1848_v2 = vld [vmem:[%s2527_s1 + $0xc] ss:$76 sps:$4 sm:$0xff]   ;;  %v1851_v4 = vld [vmem:[%s2527_s1 + $0x8] ss:$76 sps:$4 sm:$0xff]  }
   0x2   :  { %1845 = vset.pattern.permute.xlu0 %v2015_v1  ;;  %803 = vmatprep.subr.bf16.mxu0 %v1846_v0  ;;  %v1850_v3 = vld [vmem:[%s2527_s1] ss:$76 sps:$4 sm:$0xff]   ;;  %v1852_v5 = vld [vmem:[%s2527_s1 + $0x9c] ss:$76 sps:$4 sm:$0xff]   ;;  %v1854_v6 = vld [vmem:[%s2527_s1 + $0xa4] ss:$76 sps:$4 sm:$0xff]  }
   0x3   :  { %846 = vmatprep.subr.bf16.mxu1 %v1848_v2  ;;  %804 = vmatpush1.bf16.msra.mxu0 %v1850_v3  ;;  %v1856_v7 = vld [vmem:[%s2527_s1 + $0x98] ss:$76 sps:$4 sm:$0xff]   ;;  %v1857_v8 = vld [vmem:[%s2527_s1 + $0xa0] ss:$76 sps:$4 sm:$0xff]   ;;  %v1860_v10 = vld [vmem:[%s2527_s1 + $0x13c] ss:$76 sps:$4 sm:$0xff]  }
   0x4   :  { %847 = vmatpush1.bf16.msra.mxu1 %v1851_v4  ;;  %805 = vmatprep.subr.bf16.mxu0 %v1852_v5  ;;  %v1858_v9 = vld [vmem:[%s2527_s1 + $0x134] ss:$76 sps:$4 sm:$0xff]   ;;  %v1862_v11 = vld [vmem:[%s2527_s1 + $0x130] ss:$76 sps:$4 sm:$0xff]   ;;  %v1863_v12 = vld [vmem:[%s2527_s1 + $0x138] ss:$76 sps:$4 sm:$0xff]  }
   0x5   :  { %848 = vmatprep.subr.bf16.mxu1 %v1854_v6  ;;  %v1864_v13 = vld [vmem:[%s2527_s1 + $0x1cc] ss:$76 sps:$4 sm:$0xff]   ;;  %v1866_v14 = vld [vmem:[%s2527_s1 + $0x1d4] ss:$76 sps:$4 sm:$0xff]   ;;  %v1869_v16 = vld [vmem:[%s2527_s1 + $0x1d0] ss:$76 sps:$4 sm:$0xff]  }
   0x6   :  { %v1868_v15 = vld [vmem:[%s2527_s1 + $0x1c8] ss:$76 sps:$4 sm:$0xff]   ;;  %v1870_v17 = vld [vmem:[%s2527_s1 + $0x264] ss:$76 sps:$4 sm:$0xff]   ;;  %v1872_v18 = vld [vmem:[%s2527_s1 + $0x26c] ss:$76 sps:$4 sm:$0xff]  }
   0x7   :  { %806 = vmatpush1.bf16.msra.mxu0 %v1856_v7  ;;  %v1874_v19 = vld [vmem:[%s2527_s1 + $0x260] ss:$76 sps:$4 sm:$0xff]   ;;  %v1875_v20 = vld [vmem:[%s2527_s1 + $0x268] ss:$76 sps:$4 sm:$0xff]   ;;  %v1878_v22 = vld [vmem:[%s2527_s1 + $0x304] ss:$76 sps:$4 sm:$0xff]  }
   0x8   :  { %849 = vmatpush1.bf16.msra.mxu1 %v1857_v8  ;;  %807 = vmatprep.subr.bf16.mxu0 %v1858_v9  ;;  %v1876_v21 = vld [vmem:[%s2527_s1 + $0x2fc] ss:$76 sps:$4 sm:$0xff]   ;;  %v1880_v23 = vld [vmem:[%s2527_s1 + $0x2f8] ss:$76 sps:$4 sm:$0xff]   ;;  %v1881_v24 = vld [vmem:[%s2527_s1 + $0x300] ss:$76 sps:$4 sm:$0xff]  }
   0x9   :  { %850 = vmatprep.subr.bf16.mxu1 %v1860_v10  ;;  %v1885_v25 = vld [vmem:[%s2527_s1 + $0x14] ss:$76 sps:$4 sm:$0xff]   ;;  %v1888_v26 = vld [vmem:[%s2527_s1 + $0x1c] ss:$76 sps:$4 sm:$0xff]   ;;  %v1886_v29 = vld [vmem:[%s2527_s1 + $0x18] ss:$76 sps:$4 sm:$0xff]  }
   0xa   :  { %v2122_v27 = vld [vmem:[%s2528_s0] sm:$0xff]   ;;  %v1883_v28 = vld [vmem:[%s2527_s1 + $0x10] ss:$76 sps:$4 sm:$0xff]   ;;  %v1891_v30 = vld [vmem:[%s2527_s1 + $0xac] ss:$76 sps:$4 sm:$0xff]  }
   0xb   :  { %808 = vmatpush1.bf16.msra.mxu0 %v1862_v11  ;;  %v1894_v31 = vld [vmem:[%s2527_s1 + $0xb4] ss:$76 sps:$4 sm:$0xff]   ;;  %v1892_v33 = vld [vmem:[%s2527_s1 + $0xb0] ss:$76 sps:$4 sm:$0xff]   ;;  %v1900_v35 = vld [vmem:[%s2527_s1 + $0x14c] ss:$76 sps:$4 sm:$0xff]  }
   0xc   :  { %851 = vmatpush1.bf16.msra.mxu1 %v1863_v12  ;;  %809 = vmatprep.subr.bf16.mxu0 %v1864_v13  ;;  %v1889_v32 = vld [vmem:[%s2527_s1 + $0xa8] ss:$76 sps:$4 sm:$0xff]   ;;  %v1897_v34 = vld [vmem:[%s2527_s1 + $0x144] ss:$76 sps:$4 sm:$0xff]   ;;  %v1895_v36 = vld [vmem:[%s2527_s1 + $0x140] ss:$76 sps:$4 sm:$0xff]  }
   0xd   :  { %852 = vmatprep.subr.bf16.mxu1 %v1866_v14  ;;  %v1898_v37 = vld [vmem:[%s2527_s1 + $0x148] ss:$76 sps:$4 sm:$0xff]   ;;  %v1906_v39 = vld [vmem:[%s2527_s1 + $0x1e4] ss:$76 sps:$4 sm:$0xff]   ;;  %v1904_v41 = vld [vmem:[%s2527_s1 + $0x1e0] ss:$76 sps:$4 sm:$0xff]  }
   0xe   :  { %v1903_v38 = vld [vmem:[%s2527_s1 + $0x1dc] ss:$76 sps:$4 sm:$0xff]   ;;  %v1901_v40 = vld [vmem:[%s2527_s1 + $0x1d8] ss:$76 sps:$4 sm:$0xff]   ;;  %v1909_v42 = vld [vmem:[%s2527_s1 + $0x274] ss:$76 sps:$4 sm:$0xff]  }
   0xf   :  { %810 = vmatpush1.bf16.msra.mxu0 %v1868_v15  ;;  %v1912_v43 = vld [vmem:[%s2527_s1 + $0x27c] ss:$76 sps:$4 sm:$0xff]   ;;  %v1910_v45 = vld [vmem:[%s2527_s1 + $0x278] ss:$76 sps:$4 sm:$0xff]   ;;  %v1918_v47 = vld [vmem:[%s2527_s1 + $0x314] ss:$76 sps:$4 sm:$0xff]  }
  0x10   :  { %853 = vmatpush1.bf16.msra.mxu1 %v1869_v16  ;;  %811 = vmatprep.subr.bf16.mxu0 %v1870_v17  ;;  %v1907_v44 = vld [vmem:[%s2527_s1 + $0x270] ss:$76 sps:$4 sm:$0xff]   ;;  %v1915_v46 = vld [vmem:[%s2527_s1 + $0x30c] ss:$76 sps:$4 sm:$0xff]   ;;  %v1913_v48 = vld [vmem:[%s2527_s1 + $0x308] ss:$76 sps:$4 sm:$0xff]  }
  0x11   :  { %854 = vmatprep.subr.bf16.mxu1 %v1872_v18  ;;  %v1916_v49 = vld [vmem:[%s2527_s1 + $0x310] ss:$76 sps:$4 sm:$0xff]   ;;  %v1924_v51 = vld [vmem:[%s2527_s1 + $0x2c] ss:$76 sps:$4 sm:$0xff]   ;;  %v1922_v53 = vld [vmem:[%s2527_s1 + $0x28] ss:$76 sps:$4 sm:$0xff]  }
  0x12   :  { %v1921_v50 = vld [vmem:[%s2527_s1 + $0x24] ss:$76 sps:$4 sm:$0xff]   ;;  %v1919_v52 = vld [vmem:[%s2527_s1 + $0x20] ss:$76 sps:$4 sm:$0xff]   ;;  %v1927_v54 = vld [vmem:[%s2527_s1 + $0xbc] ss:$76 sps:$4 sm:$0xff]  }
  0x13   :  { %812 = vmatpush1.bf16.msra.mxu0 %v1874_v19  ;;  %v1930_v55 = vld [vmem:[%s2527_s1 + $0xc4] ss:$76 sps:$4 sm:$0xff]   ;;  %v1928_v57 = vld [vmem:[%s2527_s1 + $0xc0] ss:$76 sps:$4 sm:$0xff]   ;;  %v1936_v59 = vld [vmem:[%s2527_s1 + $0x15c] ss:$76 sps:$4 sm:$0xff]  }
  0x14   :  { %855 = vmatpush1.bf16.msra.mxu1 %v1875_v20  ;;  %813 = vmatprep.subr.bf16.mxu0 %v1876_v21  ;;  %v1925_v56 = vld [vmem:[%s2527_s1 + $0xb8] ss:$76 sps:$4 sm:$0xff]   ;;  %v1933_v58 = vld [vmem:[%s2527_s1 + $0x154] ss:$76 sps:$4 sm:$0xff]   ;;  %v1931_v60 = vld [vmem:[%s2527_s1 + $0x150] ss:$76 sps:$4 sm:$0xff]  }
  0x15   :  { %856 = vmatprep.subr.bf16.mxu1 %v1878_v22  ;;  %v1934_v61 = vld [vmem:[%s2527_s1 + $0x158] ss:$76 sps:$4 sm:$0xff]   ;;  %v1942_v63 = vld [vmem:[%s2527_s1 + $0x1f4] ss:$76 sps:$4 sm:$0xff]   ;;  %v1940_v2 = vld [vmem:[%s2527_s1 + $0x1f0] ss:$76 sps:$4 sm:$0xff]  }
  0x16   :  { %v1939_v62 = vld [vmem:[%s2527_s1 + $0x1ec] ss:$76 sps:$4 sm:$0xff]   ;;  %v1937_v0 = vld [vmem:[%s2527_s1 + $0x1e8] ss:$76 sps:$4 sm:$0xff]   ;;  %v1945_v3 = vld [vmem:[%s2527_s1 + $0x284] ss:$76 sps:$4 sm:$0xff]  }
  0x17   :  { %814 = vmatpush1.bf16.msra.mxu0 %v1880_v23  ;;  %v1948_v4 = vld [vmem:[%s2527_s1 + $0x28c] ss:$76 sps:$4 sm:$0xff]   ;;  %v1946_v6 = vld [vmem:[%s2527_s1 + $0x288] ss:$76 sps:$4 sm:$0xff]   ;;  %v1954_v8 = vld [vmem:[%s2527_s1 + $0x324] ss:$76 sps:$4 sm:$0xff]  }
  0x18   :  { %857 = vmatpush1.bf16.msra.mxu1 %v1881_v24  ;;  %889 = vmatprep.subr.bf16.mxu0 %v1885_v25  ;;  %v1943_v5 = vld [vmem:[%s2527_s1 + $0x280] ss:$76 sps:$4 sm:$0xff]   ;;  %v1951_v7 = vld [vmem:[%s2527_s1 + $0x31c] ss:$76 sps:$4 sm:$0xff]   ;;  %v1949_v9 = vld [vmem:[%s2527_s1 + $0x318] ss:$76 sps:$4 sm:$0xff]  }
  0x19   :  { %932 = vmatprep.subr.bf16.mxu1 %v1888_v26  ;;  %v1952_v10 = vld [vmem:[%s2527_s1 + $0x320] ss:$76 sps:$4 sm:$0xff]   ;;  %v1960_v12 = vld [vmem:[%s2527_s1 + $0x3c] ss:$76 sps:$4 sm:$0xff]   ;;  %v1958_v14 = vld [vmem:[%s2527_s1 + $0x38] ss:$76 sps:$4 sm:$0xff]  }
  0x1a   :  { %1769 = vmatmul.mubr.msk.bf16.vlgmr.msra.gmra.mrb[0].mxu0 %vm799_vm0, %v2122_v27  ;;  %v1957_v11 = vld [vmem:[%s2527_s1 + $0x34] ss:$76 sps:$4 sm:$0xff]   ;;  %v1955_v13 = vld [vmem:[%s2527_s1 + $0x30] ss:$76 sps:$4 sm:$0xff]   ;;  %v1963_v15 = vld [vmem:[%s2527_s1 + $0xcc] ss:$76 sps:$4 sm:$0xff]  }
  0x1b   :  { %1770 = vmatmul.mubr.msk.bf16.vlgmr.msra.gmra.mrb[0].mxu1 %vm799_vm0, %v2122_v27  ;;  %890 = vmatpush1.bf16.msra.mxu0 %v1883_v28  ;;  %v1966_v16 = vld [vmem:[%s2527_s1 + $0xd4] ss:$76 sps:$4 sm:$0xff]   ;;  %v1964_v18 = vld [vmem:[%s2527_s1 + $0xd0] ss:$76 sps:$4 sm:$0xff]   ;;  %v1972_v21 = vld [vmem:[%s2527_s1 + $0x16c] ss:$76 sps:$4 sm:$0xff]  }
  0x1c   :  { %933 = vmatpush1.bf16.msra.mxu1 %v1886_v29  ;;  %891 = vmatprep.subr.bf16.mxu0 %v1891_v30  ;;  %v1961_v17 = vld [vmem:[%s2527_s1 + $0xc8] ss:$76 sps:$4 sm:$0xff]   ;;  %v1969_v19 = vld [vmem:[%s2527_s1 + $0x164] ss:$76 sps:$4 sm:$0xff]   ;;  %v1967_v22 = vld [vmem:[%s2527_s1 + $0x160] ss:$76 sps:$4 sm:$0xff]  }
  0x1d   :  { %934 = vmatprep.subr.bf16.mxu1 %v1894_v31  ;;  %921 = vmatprep.mubr.bf16.mxu0 %v2015_v1  ;;  %v1349_v20 = vld [vmem:[%s2529_s2] sm:$0xff]  ;;  %v1970_v23 = vld [vmem:[%s2527_s1 + $0x168] ss:$76 sps:$4 sm:$0xff]  }
  0x1e   :  { %964 = vmatprep.mubr.bf16.mxu1 %v2015_v1  ;;  %1353 = vperm.xlu0 %1845, %v1349_v20   ;;  %v1350_v24 = vld [vmem:[%s2529_s2 + $0x8] sm:$0xff]  ;;  %v1978_v26 = vld [vmem:[%s2527_s1 + $0x204] ss:$76 sps:$4 sm:$0xff]   ;;  %v1981_v30 = vld [vmem:[%s2527_s1 + $0x294] ss:$76 sps:$4 sm:$0xff]  }
  0x1f   :  { %892 = vmatpush1.bf16.msra.mxu0 %v1889_v32  ;;  %v1975_v25 = vld [vmem:[%s2527_s1 + $0x1fc] ss:$76 sps:$4 sm:$0xff]   ;;  %v1973_v28 = vld [vmem:[%s2527_s1 + $0x1f8] ss:$76 sps:$4 sm:$0xff]   ;;  %v1976_v29 = vld [vmem:[%s2527_s1 + $0x200] ss:$76 sps:$4 sm:$0xff]  }
  0x20   :  { %935 = vmatpush1.bf16.msra.mxu1 %v1892_v33  ;;  %893 = vmatprep.subr.bf16.mxu0 %v1897_v34  ;;  %v1984_v31 = vld [vmem:[%s2527_s1 + $0x29c] ss:$76 sps:$4 sm:$0xff]   ;;  %v1982_v33 = vld [vmem:[%s2527_s1 + $0x298] ss:$76 sps:$4 sm:$0xff]  }
  0x21   :  { %936 = vmatprep.subr.bf16.mxu1 %v1900_v35  ;;  %v1979_v32 = vld [vmem:[%s2527_s1 + $0x290] ss:$76 sps:$4 sm:$0xff]   ;;  %v1987_v34 = vld [vmem:[%s2527_s1 + $0x32c] ss:$76 sps:$4 sm:$0xff]   ;;  %v1990_v35 = vld [vmem:[%s2527_s1 + $0x334] ss:$76 sps:$4 sm:$0xff]  }
  0x22   :  { %1358 = vperm.xlu0 %1845, %v1350_v24  }
  0x23   :  { %894 = vmatpush1.bf16.msra.mxu0 %v1895_v36  ;;  %v1985_v36 = vld [vmem:[%s2527_s1 + $0x328] ss:$76 sps:$4 sm:$0xff]  }
  0x24   :  { %937 = vmatpush1.bf16.msra.mxu1 %v1898_v37  ;;  %895 = vmatprep.subr.bf16.mxu0 %v1903_v38  ;;  %v1988_v37 = vld [vmem:[%s2527_s1 + $0x330] ss:$76 sps:$4 sm:$0xff]  }
  0x25   :  { %938 = vmatprep.subr.bf16.mxu1 %v1906_v39  ;;  %v1993_v38 = vld [vmem:[%s2527_s1 + $0x44] ss:$76 sps:$4 sm:$0xff]   ;;  %v1991_v39 = vld [vmem:[%s2527_s1 + $0x40] ss:$76 sps:$4 sm:$0xff]  }
  0x27   :  { %896 = vmatpush1.bf16.msra.mxu0 %v1901_v40  ;;  %v1994_v40 = vld [vmem:[%s2527_s1 + $0x48] ss:$76 sps:$4 sm:$0xff]  }
  0x28   :  { %939 = vmatpush1.bf16.msra.mxu1 %v1904_v41  ;;  %897 = vmatprep.subr.bf16.mxu0 %v1909_v42  ;;  %v2016_v41 = vmov 0.0   ;;  %v1997_v42 = vld [vmem:[%s2527_s1 + $0xdc] ss:$76 sps:$4 sm:$0xff]  }
  0x29   :  { %940 = vmatprep.subr.bf16.mxu1 %v1912_v43  ;;  %v1995_v43 = vld [vmem:[%s2527_s1 + $0xd8] ss:$76 sps:$4 sm:$0xff]   ;;  %38 = vst.msk [vmem:[#allocation2 + $0x90] sm:$0xff] %vm37_vm2, %v2016_v41  ;;  %57 = vst.msk [vmem:[#allocation2 + $0x128] sm:$0xff] %vm37_vm2, %v2016_v41 }
  0x2b   :  { %898 = vmatpush1.bf16.msra.mxu0 %v1907_v44  ;;  %v1998_v44 = vld [vmem:[%s2527_s1 + $0xe0] ss:$76 sps:$4 sm:$0xff]  }
  0x2c   :  { %941 = vmatpush1.bf16.msra.mxu1 %v1910_v45  ;;  %899 = vmatprep.subr.bf16.mxu0 %v1915_v46  ;;  %v2001_v45 = vld [vmem:[%s2527_s1 + $0x174] ss:$76 sps:$4 sm:$0xff]   ;;  %v1999_v46 = vld [vmem:[%s2527_s1 + $0x170] ss:$76 sps:$4 sm:$0xff]  }
  0x2d   :  { %942 = vmatprep.subr.bf16.mxu1 %v1918_v47  ;;  %v2002_v47 = vld [vmem:[%s2527_s1 + $0x178] ss:$76 sps:$4 sm:$0xff]  }
  0x2f   :  { %900 = vmatpush1.bf16.msra.mxu0 %v1913_v48  ;;  %v2005_v48 = vld [vmem:[%s2527_s1 + $0x20c] ss:$76 sps:$4 sm:$0xff]  }
  0x30   :  { %943 = vmatpush1.bf16.msra.mxu1 %v1916_v49  ;;  %975 = vmatprep.subr.bf16.mxu0 %v1921_v50  ;;  %v2006_v49 = vld [vmem:[%s2527_s1 + $0x210] ss:$76 sps:$4 sm:$0xff]  }
  0x31   :  { %1018 = vmatprep.subr.bf16.mxu1 %v1924_v51  ;;  %v2009_v50 = vld [vmem:[%s2527_s1 + $0x2a4] ss:$76 sps:$4 sm:$0xff]   ;;  %v2007_v51 = vld [vmem:[%s2527_s1 + $0x2a0] ss:$76 sps:$4 sm:$0xff]  }
  0x32   :  { %1771 = vmatmul.mubr.msk.bf16.vlgmr.msra.gmra.mrb[4].mxu0 %vm799_vm0, %v2122_v27 }
  0x33   :  { %1772 = vmatmul.mubr.msk.bf16.vlgmr.msra.gmra.mrb[4].mxu1 %vm799_vm0, %v2122_v27  ;;  %976 = vmatpush1.bf16.msra.mxu0 %v1919_v52  ;;  %v2010_v52 = vld [vmem:[%s2527_s1 + $0x2a8] ss:$76 sps:$4 sm:$0xff]  }
  0x34   :  { %1019 = vmatpush1.bf16.msra.mxu1 %v1922_v53  ;;  %977 = vmatprep.subr.bf16.mxu0 %v1927_v54  ;;  %v2013_v53 = vld [vmem:[%s2527_s1 + $0x33c] ss:$76 sps:$4 sm:$0xff]   ;;  %v2011_v54 = vld [vmem:[%s2527_s1 + $0x338] ss:$76 sps:$4 sm:$0xff]  }
  0x35   :  { %1020 = vmatprep.subr.bf16.mxu1 %v1930_v55  ;;  %1007 = vmatprep.mubr.bf16.mxu0 %v2015_v1  ;;  %v2014_v55 = vld [vmem:[%s2527_s1 + $0x340] ss:$76 sps:$4 sm:$0xff]  }
  0x36   :  { %1050 = vmatprep.mubr.bf16.mxu1 %v2015_v1 }
  0x37   :  { %978 = vmatpush1.bf16.msra.mxu0 %v1925_v56 }
  0x38   :  { %1021 = vmatpush1.bf16.msra.mxu1 %v1928_v57  ;;  %979 = vmatprep.subr.bf16.mxu0 %v1933_v58 }
  0x39   :  { %1022 = vmatprep.subr.bf16.mxu1 %v1936_v59 }
  0x3b   :  { %980 = vmatpush1.bf16.msra.mxu0 %v1931_v60 }
  0x3c   :  { %1023 = vmatpush1.bf16.msra.mxu1 %v1934_v61  ;;  %981 = vmatprep.subr.bf16.mxu0 %v1939_v62 }
  0x3d   :  { %1024 = vmatprep.subr.bf16.mxu1 %v1942_v63 }
  0x3f   :  { %982 = vmatpush1.bf16.msra.mxu0 %v1937_v0 }
  0x40   :  { %1025 = vmatpush1.bf16.msra.mxu1 %v1940_v2  ;;  %983 = vmatprep.subr.bf16.mxu0 %v1945_v3 }
  0x41   :  { %1026 = vmatprep.subr.bf16.mxu1 %v1948_v4 }
  0x43   :  { %984 = vmatpush1.bf16.msra.mxu0 %v1943_v5 }
  0x44   :  { %1027 = vmatpush1.bf16.msra.mxu1 %v1946_v6  ;;  %985 = vmatprep.subr.bf16.mxu0 %v1951_v7 }
  0x45   :  { %1028 = vmatprep.subr.bf16.mxu1 %v1954_v8 }
  0x47   :  { %986 = vmatpush1.bf16.msra.mxu0 %v1949_v9 }
  0x48   :  { %1029 = vmatpush1.bf16.msra.mxu1 %v1952_v10  ;;  %1061 = vmatprep.subr.bf16.mxu0 %v1957_v11 }
  0x49   :  { %1104 = vmatprep.subr.bf16.mxu1 %v1960_v12 }
  0x4a   :  { %1773 = vmatmul.mubr.msk.bf16.vlgmr.msra.gmra.mrb[8].mxu0 %vm799_vm0, %v2122_v27 }
  0x4b   :  { %1774 = vmatmul.mubr.msk.bf16.vlgmr.msra.gmra.mrb[8].mxu1 %vm799_vm0, %v2122_v27  ;;  %1062 = vmatpush1.bf16.msra.mxu0 %v1955_v13 }
  0x4c   :  { %1105 = vmatpush1.bf16.msra.mxu1 %v1958_v14  ;;  %1063 = vmatprep.subr.bf16.mxu0 %v1963_v15 }
  0x4d   :  { %1106 = vmatprep.subr.bf16.mxu1 %v1966_v16  ;;  %1093 = vmatprep.mubr.bf16.mxu0 %v2015_v1 }
  0x4e   :  { %1136 = vmatprep.mubr.bf16.mxu1 %v2015_v1 }
  0x4f   :  { %1064 = vmatpush1.bf16.msra.mxu0 %v1961_v17 }
  0x50   :  { %1107 = vmatpush1.bf16.msra.mxu1 %v1964_v18  ;;  %1065 = vmatprep.subr.bf16.mxu0 %v1969_v19 }
  0x51   :  { %1108 = vmatprep.subr.bf16.mxu1 %v1972_v21 }
  0x53   :  { %1066 = vmatpush1.bf16.msra.mxu0 %v1967_v22 }
  0x54   :  { %1109 = vmatpush1.bf16.msra.mxu1 %v1970_v23  ;;  %1067 = vmatprep.subr.bf16.mxu0 %v1975_v25 }
  0x55   :  { %1110 = vmatprep.subr.bf16.mxu1 %v1978_v26 }
  0x57   :  { %1068 = vmatpush1.bf16.msra.mxu0 %v1973_v28 }
  0x58   :  { %1111 = vmatpush1.bf16.msra.mxu1 %v1976_v29  ;;  %1069 = vmatprep.subr.bf16.mxu0 %v1981_v30 }
  0x59   :  { %1112 = vmatprep.subr.bf16.mxu1 %v1984_v31 }
  0x5b   :  { %1070 = vmatpush1.bf16.msra.mxu0 %v1979_v32 }
  0x5c   :  { %1113 = vmatpush1.bf16.msra.mxu1 %v1982_v33  ;;  %1071 = vmatprep.subr.bf16.mxu0 %v1987_v34 }
  0x5d   :  { %1114 = vmatprep.subr.bf16.mxu1 %v1990_v35 }
  0x5f   :  { %1072 = vmatpush1.bf16.msra.mxu0 %v1985_v36 }
  0x60   :  { %1115 = vmatpush1.bf16.msra.mxu1 %v1988_v37  ;;  %1147 = vmatprep.subr.bf16.mxu0 %v1993_v38 }
  0x61   :  { %1826 = vmatprep.subr.bf16.mxu1 %v2016_v41 }
  0x62   :  { %1775 = vmatmul.mubr.msk.bf16.vlgmr.msra.gmra.mrb[12].mxu0 %vm799_vm0, %v2122_v27 }
  0x63   :  { %1776 = vmatmul.mubr.msk.bf16.vlgmr.msra.gmra.mrb[12].mxu1 %vm799_vm0, %v2122_v27  ;;  %1148 = vmatpush1.bf16.msra.mxu0 %v1991_v39 }
  0x64   :  { %1827 = vmatpush3.bf16.msra.mxu1 %v1994_v40  ;;  %1149 = vmatprep.subr.bf16.mxu0 %v1997_v42 }
  0x65   :  { %1828 = vmatprep.subr.bf16.mxu1 %v2016_v41  ;;  %1179 = vmatprep.mubr.bf16.mxu0 %v2015_v1  ;;  %v2003_v1 = vld [vmem:[%s2527_s1 + $0x208] ss:$76 sps:$4 sm:$0xff]  }
  0x66   :  { %1838 = vmatprep.mubr.msk.bf16.mxu1 %vm2017_vm1, %v2016_v41 }
  0x67   :  { %1150 = vmatpush1.bf16.msra.mxu0 %v1995_v43 }
  0x68   :  { %1829 = vmatpush3.bf16.msra.mxu1 %v1998_v44  ;;  %1151 = vmatprep.subr.bf16.mxu0 %v2001_v45 }
  0x69   :  { %1830 = vmatprep.subr.bf16.mxu1 %v2016_v41 }
  0x6b   :  { %1152 = vmatpush1.bf16.msra.mxu0 %v1999_v46 }
  0x6c   :  { %1831 = vmatpush3.bf16.msra.mxu1 %v2002_v47  ;;  %1153 = vmatprep.subr.bf16.mxu0 %v2005_v48 }
  0x6d   :  { %1832 = vmatprep.subr.bf16.mxu1 %v2016_v41 }
  0x6f   :  { %1154 = vmatpush1.bf16.msra.mxu0 %v2003_v1 }
  0x70   :  { %1833 = vmatpush3.bf16.msra.mxu1 %v2006_v49  ;;  %1155 = vmatprep.subr.bf16.mxu0 %v2009_v50 }
  0x71   :  { %1834 = vmatprep.subr.bf16.mxu1 %v2016_v41 }
  0x73   :  { %1156 = vmatpush1.bf16.msra.mxu0 %v2007_v51 }
  0x74   :  { %1835 = vmatpush3.bf16.msra.mxu1 %v2010_v52  ;;  %1157 = vmatprep.subr.bf16.mxu0 %v2013_v53 }
  0x75   :  { %1836 = vmatprep.subr.bf16.mxu1 %v2016_v41 }
  0x77   :  { %1158 = vmatpush1.bf16.msra.mxu0 %v2011_v54 }
  0x78   :  { %1837 = vmatpush3.bf16.msra.mxu1 %v2014_v55 }
  0x7a   :  { %1777 = vmatmul.mubr.msk.bf16.vlgmr.msra.gmra.mrb[16].mxu0 %vm799_vm0, %v2122_v27 }
  0x7b   :  { %1839 = vmatmul.mubr.msk.bf16.vlgmr.msra.gmra.mrb[16].mxu1 %vm799_vm0, %v2122_v27 }
  0x9d   :  { %v2423_v56 = vpop.permute.xlu0 %1353 }
  0xa1   :  { %v2429_v7 = vpop.permute.xlu0 %1358 }
  0xed   :  { %v837_v57 = vpop.f32.mrb[0].mxu0 }
  0xee   :  { %v880_v58 = vpop.f32.mrb[0].mxu1  ;;  %v839_v59 = vpop.f32.mrb[1].mxu0  ;;  %v1361_v2 = vadd.f32 %v2423_v56, %v837_v57 }
  0xef   :  { %v882_v60 = vpop.f32.mrb[1].mxu1  ;;  %v841_v61 = vpop.f32.mrb[2].mxu0  ;;  %v1363_v3 = vadd.f32 %v2423_v56, %v880_v58  ;;  %v1362_v27 = vadd.f32 %v2423_v56, %v839_v59 }
  0xf0   :  { %v884_v62 = vpop.f32.mrb[2].mxu1  ;;  %v843_v63 = vpop.f32.mrb[3].mxu0  ;;  %v1364_v4 = vadd.f32 %v2423_v56, %v882_v60  ;;  %vm1399_vm3 = vcmp.ge.f32.partialorder %v1361_v2, 0.0  ;;  %v1437_v5 = vmul.f32 0.2, %v1361_v2  ;;  %v1380_v12 = vadd.f32 %v2429_v7, %v841_v61 }
  0xf1   :  { %v886_v0 = vpop.f32.mrb[3].mxu1  ;;  %vm1401_vm4 = vcmp.ge.f32.partialorder %v1363_v3, 0.0  ;;  %v1439_v6 = vmul.f32 0.2, %v1363_v3  ;;  %vm1400_vm5 = vcmp.ge.f32.partialorder %v1362_v27, 0.0  ;;  %v1381_v13 = vadd.f32 %v2429_v7, %v843_v63 }
  0xf2   :  { %vm1402_vm6 = vcmp.ge.f32.partialorder %v1364_v4, 0.0  ;;  %v1438_v8 = vmul.f32 0.2, %v1362_v27  ;;  %v1440_v9 = vmul.f32 0.2, %v1364_v4  ;;  %v1475_v10 = vsel %vm1399_vm3, %v1361_v2, %v1437_v5 }
  0xf3   :  { %v1477_v11 = vsel %vm1401_vm4, %v1363_v3, %v1439_v6  ;;  %v1382_v16 = vadd.f32 %v2429_v7, %v884_v62  ;;  %v1383_v17 = vadd.f32 %v2429_v7, %v886_v0  ;;  %vm1418_vm7 = vcmp.ge.f32.partialorder %v1380_v12, 0.0 }
  0xf4   :  { %v1476_v14 = vsel %vm1400_vm5, %v1362_v27, %v1438_v8  ;;  %v1478_v15 = vsel %vm1402_vm6, %v1364_v4, %v1440_v9  ;;  %vm1419_vm8 = vcmp.ge.f32.partialorder %v1381_v13, 0.0  ;;  %v1456_v20 = vmul.f32 0.2, %v1380_v12 }
  0xf5   :  { %v1799_v18 = vpack.c.bf16 %v1476_v14, %v1475_v10  ;;  %v1800_v19 = vpack.c.bf16 %v1478_v15, %v1477_v11  ;;  %vm1420_vm9 = vcmp.ge.f32.partialorder %v1382_v16, 0.0  ;;  %vm1421_vm10 = vcmp.ge.f32.partialorder %v1383_v17, 0.0 }
  0xf6   :  { %v1457_v21 = vmul.f32 0.2, %v1381_v13  ;;  %v1458_v22 = vmul.f32 0.2, %v1382_v16  ;;  %v1459_v23 = vmul.f32 0.2, %v1383_v17  ;;  %v1494_v24 = vsel %vm1418_vm7, %v1380_v12, %v1456_v20 }
  0xf7   :  { %1629 = vst [vmem:[%s2530_s3] sm:$0xff] %v1799_v18  ;;  %1630 = vst [vmem:[%s2530_s3 + $0x8] sm:$0xff] %v1800_v19 }
  0xf8   :  { %v1495_v25 = vsel %vm1419_vm8, %v1381_v13, %v1457_v21  ;;  %v1496_v26 = vsel %vm1420_vm9, %v1382_v16, %v1458_v22  ;;  %v1497_v28 = vsel %vm1421_vm10, %v1383_v17, %v1459_v23 }
  0xf9   :  { %v1809_v29 = vpack.c.bf16 %v1495_v25, %v1494_v24  ;;  %v1810_v30 = vpack.c.bf16 %v1497_v28, %v1496_v26 }
  0xfb   :  { %1640 = vst [vmem:[%s2530_s3 + $0x4c] sm:$0xff] %v1809_v29  ;;  %1641 = vst [vmem:[%s2530_s3 + $0x54] sm:$0xff] %v1810_v30 }
 0x105   :  { %v923_v31 = vpop.f32.mrb[4].mxu0 }
 0x106   :  { %v966_v32 = vpop.f32.mrb[4].mxu1  ;;  %v925_v33 = vpop.f32.mrb[5].mxu0  ;;  %v1365_v37 = vadd.f32 %v2423_v56, %v923_v31 }
 0x107   :  { %v968_v34 = vpop.f32.mrb[5].mxu1  ;;  %v927_v35 = vpop.f32.mrb[6].mxu0  ;;  %v1367_v38 = vadd.f32 %v2423_v56, %v966_v32  ;;  %v1366_v41 = vadd.f32 %v2423_v56, %v925_v33 }
 0x108   :  { %v970_v36 = vpop.f32.mrb[6].mxu1  ;;  %v929_v39 = vpop.f32.mrb[7].mxu0  ;;  %v1368_v42 = vadd.f32 %v2423_v56, %v968_v34  ;;  %vm1403_vm11 = vcmp.ge.f32.partialorder %v1365_v37, 0.0  ;;  %v1441_v43 = vmul.f32 0.2, %v1365_v37  ;;  %v1384_v1 = vadd.f32 %v2429_v7, %v927_v35 }
 0x109   :  { %v972_v40 = vpop.f32.mrb[7].mxu1  ;;  %vm1405_vm12 = vcmp.ge.f32.partialorder %v1367_v38, 0.0  ;;  %v1443_v44 = vmul.f32 0.2, %v1367_v38  ;;  %vm1404_vm13 = vcmp.ge.f32.partialorder %v1366_v41, 0.0  ;;  %v1386_v49 = vadd.f32 %v2429_v7, %v970_v36 }
 0x10a   :  { %v1442_v45 = vmul.f32 0.2, %v1366_v41  ;;  %vm1406_vm14 = vcmp.ge.f32.partialorder %v1368_v42, 0.0  ;;  %v1444_v46 = vmul.f32 0.2, %v1368_v42  ;;  %v1479_v47 = vsel %vm1403_vm11, %v1365_v37, %v1441_v43 }
 0x10b   :  { %v1481_v48 = vsel %vm1405_vm12, %v1367_v38, %v1443_v44  ;;  %v1385_v52 = vadd.f32 %v2429_v7, %v929_v39  ;;  %v1387_v53 = vadd.f32 %v2429_v7, %v972_v40  ;;  %vm1422_vm15 = vcmp.ge.f32.partialorder %v1384_v1, 0.0 }
 0x10c   :  { %v1480_v50 = vsel %vm1404_vm13, %v1366_v41, %v1442_v45  ;;  %v1482_v51 = vsel %vm1406_vm14, %v1368_v42, %v1444_v46  ;;  %v1460_v57 = vmul.f32 0.2, %v1384_v1  ;;  %vm1424_vm0 = vcmp.ge.f32.partialorder %v1386_v49, 0.0 }
 0x10d   :  { %v1801_v54 = vpack.c.bf16 %v1480_v50, %v1479_v47  ;;  %v1802_v55 = vpack.c.bf16 %v1482_v51, %v1481_v48  ;;  %v1462_v58 = vmul.f32 0.2, %v1386_v49  ;;  %vm1423_vm1 = vcmp.ge.f32.partialorder %v1385_v52, 0.0 }
 0x10e   :  { %v1461_v59 = vmul.f32 0.2, %v1385_v52  ;;  %v1498_v60 = vsel %vm1422_vm15, %v1384_v1, %v1460_v57  ;;  %vm1425_vm3 = vcmp.ge.f32.partialorder %v1387_v53, 0.0  ;;  %v1463_v61 = vmul.f32 0.2, %v1387_v53 }
 0x10f   :  { %1631 = vst [vmem:[%s2530_s3 + $0x10] sm:$0xff] %v1801_v54  ;;  %1632 = vst [vmem:[%s2530_s3 + $0x18] sm:$0xff] %v1802_v55  ;;  %v1500_v62 = vsel %vm1424_vm0, %v1386_v49, %v1462_v58 }
 0x110   :  { %v1499_v63 = vsel %vm1423_vm1, %v1385_v52, %v1461_v59  ;;  %v1501_v2 = vsel %vm1425_vm3, %v1387_v53, %v1463_v61 }
 0x111   :  { %v1811_v0 = vpack.c.bf16 %v1499_v63, %v1498_v60  ;;  %v1812_v3 = vpack.c.bf16 %v1501_v2, %v1500_v62 }
 0x113   :  { %1642 = vst [vmem:[%s2530_s3 + $0x5c] sm:$0xff] %v1811_v0  ;;  %1643 = vst [vmem:[%s2530_s3 + $0x64] sm:$0xff] %v1812_v3 }
 0x11d   :  { %v1009_v27 = vpop.f32.mrb[8].mxu0 }
 0x11e   :  { %v1052_v4 = vpop.f32.mrb[8].mxu1  ;;  %v1011_v5 = vpop.f32.mrb[9].mxu0  ;;  %v1369_v10 = vadd.f32 %v2423_v56, %v1009_v27 }
 0x11f   :  { %v1054_v6 = vpop.f32.mrb[9].mxu1  ;;  %v1013_v8 = vpop.f32.mrb[10].mxu0  ;;  %v1371_v11 = vadd.f32 %v2423_v56, %v1052_v4  ;;  %v1370_v14 = vadd.f32 %v2423_v56, %v1011_v5 }
 0x120   :  { %v1056_v9 = vpop.f32.mrb[10].mxu1  ;;  %v1015_v12 = vpop.f32.mrb[11].mxu0  ;;  %v1372_v15 = vadd.f32 %v2423_v56, %v1054_v6  ;;  %vm1407_vm4 = vcmp.ge.f32.partialorder %v1369_v10, 0.0  ;;  %v1445_v16 = vmul.f32 0.2, %v1369_v10  ;;  %v1388_v22 = vadd.f32 %v2429_v7, %v1013_v8 }
 0x121   :  { %v1058_v13 = vpop.f32.mrb[11].mxu1  ;;  %vm1409_vm5 = vcmp.ge.f32.partialorder %v1371_v11, 0.0  ;;  %v1447_v17 = vmul.f32 0.2, %v1371_v11  ;;  %vm1408_vm6 = vcmp.ge.f32.partialorder %v1370_v14, 0.0  ;;  %v1390_v23 = vadd.f32 %v2429_v7, %v1056_v9 }
 0x122   :  { %v1446_v18 = vmul.f32 0.2, %v1370_v14  ;;  %vm1410_vm7 = vcmp.ge.f32.partialorder %v1372_v15, 0.0  ;;  %v1448_v19 = vmul.f32 0.2, %v1372_v15  ;;  %v1483_v20 = vsel %vm1407_vm4, %v1369_v10, %v1445_v16 }
 0x123   :  { %v1485_v21 = vsel %vm1409_vm5, %v1371_v11, %v1447_v17  ;;  %v1389_v26 = vadd.f32 %v2429_v7, %v1015_v12  ;;  %v1391_v28 = vadd.f32 %v2429_v7, %v1058_v13  ;;  %vm1426_vm8 = vcmp.ge.f32.partialorder %v1388_v22, 0.0  ;;  %v95_v17 = vld [vmem:[#allocation2 + $0x128] sm:$0xff] }
 0x124   :  { %v1484_v24 = vsel %vm1408_vm6, %v1370_v14, %v1446_v18  ;;  %v1486_v25 = vsel %vm1410_vm7, %v1372_v15, %v1448_v19  ;;  %v1464_v31 = vmul.f32 0.2, %v1388_v22  ;;  %vm1428_vm9 = vcmp.ge.f32.partialorder %v1390_v23, 0.0  ;;  %v76_v14 = vld [vmem:[#allocation2 + $0x90] sm:$0xff] }
 0x125   :  { %v1803_v29 = vpack.c.bf16 %v1484_v24, %v1483_v20  ;;  %v1804_v30 = vpack.c.bf16 %v1486_v25, %v1485_v21  ;;  %v1466_v32 = vmul.f32 0.2, %v1390_v23  ;;  %vm1427_vm10 = vcmp.ge.f32.partialorder %v1389_v26, 0.0 }
 0x126   :  { %v1465_v33 = vmul.f32 0.2, %v1389_v26  ;;  %v1502_v34 = vsel %vm1426_vm8, %v1388_v22, %v1464_v31  ;;  %vm1429_vm11 = vcmp.ge.f32.partialorder %v1391_v28, 0.0  ;;  %v1467_v35 = vmul.f32 0.2, %v1391_v28 }
 0x127   :  { %1633 = vst [vmem:[%s2530_s3 + $0x20] sm:$0xff] %v1803_v29  ;;  %1634 = vst [vmem:[%s2530_s3 + $0x28] sm:$0xff] %v1804_v30  ;;  %v1504_v36 = vsel %vm1428_vm9, %v1390_v23, %v1466_v32  ;;  %vm1638_vm9 = vcmask 60416  }
 0x128   :  { %v1503_v37 = vsel %vm1427_vm10, %v1389_v26, %v1465_v33  ;;  %v1505_v39 = vsel %vm1429_vm11, %v1391_v28, %v1467_v35 }
 0x129   :  { %v1813_v38 = vpack.c.bf16 %v1503_v37, %v1502_v34  ;;  %v1814_v40 = vpack.c.bf16 %v1505_v39, %v1504_v36 }
 0x12b   :  { %1644 = vst [vmem:[%s2530_s3 + $0x6c] sm:$0xff] %v1813_v38  ;;  %1645 = vst [vmem:[%s2530_s3 + $0x74] sm:$0xff] %v1814_v40 }
 0x135   :  { %v1095_v41 = vpop.f32.mrb[12].mxu0 }
 0x136   :  { %v1138_v42 = vpop.f32.mrb[12].mxu1  ;;  %v1097_v43 = vpop.f32.mrb[13].mxu0  ;;  %v1373_v47 = vadd.f32 %v2423_v56, %v1095_v41 }
 0x137   :  { %v1140_v44 = vpop.f32.mrb[13].mxu1  ;;  %v1099_v45 = vpop.f32.mrb[14].mxu0  ;;  %v1375_v48 = vadd.f32 %v2423_v56, %v1138_v42  ;;  %v1374_v50 = vadd.f32 %v2423_v56, %v1097_v43 }
 0x138   :  { %v1142_v46 = vpop.f32.mrb[14].mxu1  ;;  %v1101_v1 = vpop.f32.mrb[15].mxu0  ;;  %v1376_v51 = vadd.f32 %v2423_v56, %v1140_v44  ;;  %vm1411_vm12 = vcmp.ge.f32.partialorder %v1373_v47, 0.0  ;;  %v1449_v52 = vmul.f32 0.2, %v1373_v47  ;;  %v1392_v59 = vadd.f32 %v2429_v7, %v1099_v45 }
 0x139   :  { %v1144_v49 = vpop.f32.mrb[15].mxu1  ;;  %vm1413_vm13 = vcmp.ge.f32.partialorder %v1375_v48, 0.0  ;;  %v1451_v53 = vmul.f32 0.2, %v1375_v48  ;;  %vm1412_vm14 = vcmp.ge.f32.partialorder %v1374_v50, 0.0  ;;  %v1394_v60 = vadd.f32 %v2429_v7, %v1142_v46 }
 0x13a   :  { %v1450_v54 = vmul.f32 0.2, %v1374_v50  ;;  %vm1414_vm15 = vcmp.ge.f32.partialorder %v1376_v51, 0.0  ;;  %v1452_v55 = vmul.f32 0.2, %v1376_v51  ;;  %v1487_v57 = vsel %vm1411_vm12, %v1373_v47, %v1449_v52 }
 0x13b   :  { %v1489_v58 = vsel %vm1413_vm13, %v1375_v48, %v1451_v53  ;;  %v1393_v63 = vadd.f32 %v2429_v7, %v1101_v1  ;;  %v1395_v0 = vadd.f32 %v2429_v7, %v1144_v49  ;;  %vm1430_vm0 = vcmp.ge.f32.partialorder %v1392_v59, 0.0 }
 0x13c   :  { %v1488_v61 = vsel %vm1412_vm14, %v1374_v50, %v1450_v54  ;;  %v1490_v62 = vsel %vm1414_vm15, %v1376_v51, %v1452_v55  ;;  %v1468_v27 = vmul.f32 0.2, %v1392_v59  ;;  %vm1432_vm1 = vcmp.ge.f32.partialorder %v1394_v60, 0.0 }
 0x13d   :  { %v1805_v2 = vpack.c.bf16 %v1488_v61, %v1487_v57  ;;  %v1806_v3 = vpack.c.bf16 %v1490_v62, %v1489_v58  ;;  %v1470_v4 = vmul.f32 0.2, %v1394_v60  ;;  %vm1431_vm3 = vcmp.ge.f32.partialorder %v1393_v63, 0.0 }
 0x13e   :  { %v1469_v5 = vmul.f32 0.2, %v1393_v63  ;;  %v1506_v6 = vsel %vm1430_vm0, %v1392_v59, %v1468_v27  ;;  %vm1433_vm4 = vcmp.ge.f32.partialorder %v1395_v0, 0.0  ;;  %v1471_v8 = vmul.f32 0.2, %v1395_v0 }
 0x13f   :  { %1635 = vst [vmem:[%s2530_s3 + $0x30] sm:$0xff] %v1805_v2  ;;  %1636 = vst [vmem:[%s2530_s3 + $0x38] sm:$0xff] %v1806_v3  ;;  %v1508_v9 = vsel %vm1432_vm1, %v1394_v60, %v1470_v4 }
 0x140   :  { %v1507_v10 = vsel %vm1431_vm3, %v1393_v63, %v1469_v5  ;;  %v1509_v12 = vsel %vm1433_vm4, %v1395_v0, %v1471_v8 }
 0x141   :  { %v1815_v11 = vpack.c.bf16 %v1507_v10, %v1506_v6  ;;  %v1816_v13 = vpack.c.bf16 %v1509_v12, %v1508_v9 }
 0x143   :  { %1646 = vst [vmem:[%s2530_s3 + $0x7c] sm:$0xff] %v1815_v11  ;;  %1647 = vst [vmem:[%s2530_s3 + $0x84] sm:$0xff] %v1816_v13 }
 0x14d   :  { %v1181_v15 = vpop.f32.mrb[16].mxu0 }
 0x14e   :  { %v1224_v16 = vpop.f32.mrb[16].mxu1  ;;  %v1183_v19 = vpop.f32.mrb[17].mxu0  ;;  %v1377_v23 = vadd.f32 %v2423_v56, %v1181_v15 }
 0x14f   :  { %v1249_v18 = vadd.f32 %v1224_v16, %v76_v14  ;;  %v1840_v20 = vpop.f32.mrb[17].mxu1  ;;  %v1185_v21 = vpop.f32.mrb[18].mxu0  ;;  %v1378_v28 = vadd.f32 %v2423_v56, %v1183_v19 }
 0x150   :  { %v1227_v22 = vpop.f32.mrb[18].mxu1  ;;  %v1187_v25 = vpop.f32.mrb[19].mxu0  ;;  %vm1415_vm5 = vcmp.ge.f32.partialorder %v1377_v23, 0.0  ;;  %v1453_v29 = vmul.f32 0.2, %v1377_v23  ;;  %v1396_v30 = vadd.f32 %v2429_v7, %v1185_v21 }
 0x151   :  { %1288 = vst.msk [vmem:[#allocation2 + $0x90] sm:$0xff] %vm37_vm2, %v1249_v18  ;;  %v1268_v24 = vadd.f32 %v1227_v22, %v95_v17  ;;  %v1841_v26 = vpop.f32.mrb[19].mxu1  ;;  %vm1416_vm6 = vcmp.ge.f32.partialorder %v1378_v28, 0.0  ;;  %v1454_v31 = vmul.f32 0.2, %v1378_v28  ;;  %v1397_v32 = vadd.f32 %v2429_v7, %v1187_v25 }
 0x152   :  { %v1491_v33 = vsel %vm1415_vm5, %v1377_v23, %v1453_v29  ;;  %vm1434_vm7 = vcmp.ge.f32.partialorder %v1396_v30, 0.0  ;;  %v1472_v34 = vmul.f32 0.2, %v1396_v30 }
 0x153   :  { %1307 = vst.msk [vmem:[#allocation2 + $0x128] sm:$0xff] %vm37_vm2, %v1268_v24  ;;  %v1492_v35 = vsel %vm1416_vm6, %v1378_v28, %v1454_v31  ;;  %vm1435_vm8 = vcmp.ge.f32.partialorder %v1397_v32, 0.0  ;;  %v1473_v36 = vmul.f32 0.2, %v1397_v32 }
 0x154   :  { %v1807_v37 = vpack.c.bf16 %v1492_v35, %v1491_v33  ;;  %v1510_v38 = vsel %vm1434_vm7, %v1396_v30, %v1472_v34 }
 0x155   :  { %v1511_v40 = vsel %vm1435_vm8, %v1397_v32, %v1473_v36 }
 0x156   :  { %1637 = vst [vmem:[%s2530_s3 + $0x40] sm:$0xff] %v1807_v37  ;;  %v1817_v42 = vpack.c.bf16 %v1511_v40, %v1510_v38 }
 0x158   :  { %v1329_v39 = vld [vmem:[#allocation2 + $0x90] sm:$0xff]  ;;  %1648 = vst [vmem:[%s2530_s3 + $0x8c] sm:$0xff] %v1817_v42 }
 0x159   :  { %v1379_v41 = vadd.f32 %v2423_v56, %v1329_v39 }
 0x15a   :  { %v1348_v43 = vld [vmem:[#allocation2 + $0x128] sm:$0xff] }
 0x15b   :  { %vm1417_vm2 = vcmp.ge.f32.partialorder %v1379_v41, 0.0  ;;  %v1455_v44 = vmul.f32 0.2, %v1379_v41  ;;  %v1398_v45 = vadd.f32 %v2429_v7, %v1348_v43 }
 0x15d   :  { %v1493_v46 = vsel %vm1417_vm2, %v1379_v41, %v1455_v44  ;;  %vm1436_vm10 = vcmp.ge.f32.partialorder %v1398_v45, 0.0  ;;  %v1474_v47 = vmul.f32 0.2, %v1398_v45 }
 0x15e   :  { %v1808_v48 = vpack.c.bf16 %v1493_v46, %v1493_v46 }
 0x15f   :  { %v1512_v56 = vsel %vm1436_vm10, %v1398_v45, %v1474_v47 }
 0x160   :  { %1639 = vst.msk [vmem:[%s2530_s3 + $0x48] sm:$0xf] %vm1638_vm9, %v1808_v48  ;;  %v1818_v1 = vpack.c.bf16 %v1512_v56, %v1512_v56 }
 0x162   :  { %1649 = vst.msk [vmem:[%s2530_s3 + $0x94] sm:$0xf] %vm1638_vm9, %v1818_v1 }

// kernel: discriminator_forward.11
= control target key start
LH: loop header
LB: loop body
LE: loop exit
PB: predicated region body
PF: predicated region fallthrough
CT: control target
= control target key end

     0   :  { %s1090_s12 = smov 0   ;;  %s1092_s13 = smov 0   ;;  %s1310_s0 = inlined_call_operand.vmem [shape: bf16[32,256], index: 0, kind: input, shape index: {}]   ;;  %s1311_s1 = inlined_call_operand.vmem [shape: bf16[256,512], index: 1, kind: input, shape index: {}]   ;;  %s1312_s2 = inlined_call_operand.vmem [shape: f32[32,1], index: 2, kind: input, shape index: {}]   ;;  %s1313_s3 = inlined_call_operand.vmem [shape: f32[32,512], index: 3, kind: output, shape index: {}]  }
   0x1   :  { %s1094_s14 = smov 0   ;;  %s1096_s15 = smov 0  }
   0x2   :  { %s1098_s16 = smov 0  }
   0x3 LB: > { %s25_s17 = sadd.s32 1, %s1063_s15  ;;  %s846_s18 = sadd.s32 4294967295, %s1067_s16   ;;  %s1067_s16 = sphi %s1098_s16, %s13_s16   ;;  %s1063_s15 = sphi %s1096_s15, %s1318_s15   ;;  %s1059_s14 = sphi %s1094_s14, %s1317_s14   ;;  %s1055_s13 = sphi %s1092_s13, %s1316_s13   ;;  %s1051_s12 = sphi %s1090_s12, %s1315_s12  }
   0x4   : > { %p27_p0 = scmp.ge.s32.totalorder %s25_s17, 2  ;;  %p67_p1 = scmp.ne.s32.totalorder %s1055_s13, %s1051_s12 }
   0x5   : > { %p68_p2 = scmp.eq.s32.totalorder %s1067_s16, 0  ;;  %p118_p4 = scmp.eq.s32.totalorder %s846_s18, 1 }
   0x6   : > { %s1320_s17 = smov (%p27_p0, %s25_s17), 0  ;;  %s60_s20 = sadd.s32 1, %s1055_s13 }
   0x7   : > { %p69_p3 = por %p68_p2, %p67_p1  ;;  %s56_s19 = ssub.s32 %s1063_s15, %s1320_s17 }
   0x8   : > { %p58_p5 = scmp.eq.s32.totalorder %s56_s19, 0  ;;  %p1125_p6 = por %p118_p4, %p67_p1 }
   0x9   : > { %p850_p7 = scmp.ge.s32.totalorder %s1067_s16, 2 }
   0xa   : > { %s1130_s22 = scalar_select %p58_p5, %s1055_s13, %s60_s20  }
   0xb   : > { %152 = sbr.rel (%p850_p7) target bundleno = 38 (0x26), region = 24 }
  0x12   : > { %155 = sbr.rel (!%p69_p3) target bundleno = 38 (0x26), region = 28  ;;  %s157_s23 = sand.u32 (%p69_p3), 1, %s1055_s13  }
  0x13   : > { %s898_s24 = sshll.u32 (%p69_p3), %s1063_s15, 3  ;;  %s851_s25 = sshll.u32 (%p69_p3), %s157_s23, 8 }
  0x14   : > { %s1138_s28 = scalar_lea.vmem (%p69_p3), %s1311_s1, %s898_s24  ;;  %s1143_s29 = scalar_lea.vmem (%p69_p3), [#allocation3], %s851_s25 }
  0x15   : > { %v255_v0 = vld [vmem:[%s1138_s28] sm:$0xff] (%p69_p3)  ;;  %v257_v1 = vld [vmem:[%s1138_s28 + $0x10] sm:$0xff] (%p69_p3) }
  0x16   : > { %v259_v2 = vld [vmem:[%s1138_s28 + $0x20] sm:$0xff] (%p69_p3)  ;;  %256 = vst [vmem:[%s1143_s29] sm:$0xff] (%p69_p3), %v255_v0  ;;  %258 = vst [vmem:[%s1143_s29 + $0x8] sm:$0xff] (%p69_p3), %v257_v1  ;;  %v261_v3 = vld [vmem:[%s1138_s28 + $0x30] sm:$0xff] (%p69_p3) }
  0x17   : > { %260 = vst [vmem:[%s1143_s29 + $0x10] sm:$0xff] (%p69_p3), %v259_v2  ;;  %v263_v4 = vld [vmem:[%s1138_s28 + $0x40] sm:$0xff] (%p69_p3)  ;;  %v265_v5 = vld [vmem:[%s1138_s28 + $0x50] sm:$0xff] (%p69_p3)  ;;  %262 = vst [vmem:[%s1143_s29 + $0x18] sm:$0xff] (%p69_p3), %v261_v3 }
  0x18   : > { %264 = vst [vmem:[%s1143_s29 + $0x20] sm:$0xff] (%p69_p3), %v263_v4  ;;  %266 = vst [vmem:[%s1143_s29 + $0x28] sm:$0xff] (%p69_p3), %v265_v5  ;;  %v267_v6 = vld [vmem:[%s1138_s28 + $0x60] sm:$0xff] (%p69_p3)  ;;  %v269_v7 = vld [vmem:[%s1138_s28 + $0x70] sm:$0xff] (%p69_p3) }
  0x19   : > { %v271_v8 = vld [vmem:[%s1138_s28 + $0x80] sm:$0xff]  ;;  %268 = vst [vmem:[%s1143_s29 + $0x30] sm:$0xff] %v267_v6  ;;  %270 = vst [vmem:[%s1143_s29 + $0x38] sm:$0xff] %v269_v7  ;;  %v273_v9 = vld [vmem:[%s1138_s28 + $0x90] sm:$0xff] }
  0x1a   : > { %272 = vst [vmem:[%s1143_s29 + $0x40] sm:$0xff] %v271_v8  ;;  %v275_v10 = vld [vmem:[%s1138_s28 + $0xa0] sm:$0xff]  ;;  %v277_v11 = vld [vmem:[%s1138_s28 + $0xb0] sm:$0xff]  ;;  %274 = vst [vmem:[%s1143_s29 + $0x48] sm:$0xff] %v273_v9 }
  0x1b   : > { %276 = vst [vmem:[%s1143_s29 + $0x50] sm:$0xff] %v275_v10  ;;  %278 = vst [vmem:[%s1143_s29 + $0x58] sm:$0xff] %v277_v11  ;;  %v279_v12 = vld [vmem:[%s1138_s28 + $0xc0] sm:$0xff]  ;;  %v281_v13 = vld [vmem:[%s1138_s28 + $0xd0] sm:$0xff] }
  0x1c   : > { %v283_v14 = vld [vmem:[%s1138_s28 + $0xe0] sm:$0xff]  ;;  %280 = vst [vmem:[%s1143_s29 + $0x60] sm:$0xff] %v279_v12  ;;  %282 = vst [vmem:[%s1143_s29 + $0x68] sm:$0xff] %v281_v13  ;;  %v285_v15 = vld [vmem:[%s1138_s28 + $0xf0] sm:$0xff] }
  0x1d   : > { %284 = vst [vmem:[%s1143_s29 + $0x70] sm:$0xff] %v283_v14  ;;  %v287_v16 = vld [vmem:[%s1138_s28 + $0x100] sm:$0xff]  ;;  %v289_v17 = vld [vmem:[%s1138_s28 + $0x110] sm:$0xff]  ;;  %286 = vst [vmem:[%s1143_s29 + $0x78] sm:$0xff] %v285_v15 }
  0x1e   : > { %288 = vst [vmem:[%s1143_s29 + $0x80] sm:$0xff] %v287_v16  ;;  %290 = vst [vmem:[%s1143_s29 + $0x88] sm:$0xff] %v289_v17  ;;  %v291_v18 = vld [vmem:[%s1138_s28 + $0x120] sm:$0xff]  ;;  %v293_v19 = vld [vmem:[%s1138_s28 + $0x130] sm:$0xff] }
  0x1f   : > { %v295_v20 = vld [vmem:[%s1138_s28 + $0x140] sm:$0xff]  ;;  %292 = vst [vmem:[%s1143_s29 + $0x90] sm:$0xff] %v291_v18  ;;  %294 = vst [vmem:[%s1143_s29 + $0x98] sm:$0xff] %v293_v19  ;;  %v297_v21 = vld [vmem:[%s1138_s28 + $0x150] sm:$0xff] }
  0x20   : > { %296 = vst [vmem:[%s1143_s29 + $0xa0] sm:$0xff] %v295_v20  ;;  %v299_v22 = vld [vmem:[%s1138_s28 + $0x160] sm:$0xff]  ;;  %v301_v23 = vld [vmem:[%s1138_s28 + $0x170] sm:$0xff]  ;;  %298 = vst [vmem:[%s1143_s29 + $0xa8] sm:$0xff] %v297_v21 }
  0x21   : > { %300 = vst [vmem:[%s1143_s29 + $0xb0] sm:$0xff] %v299_v22  ;;  %302 = vst [vmem:[%s1143_s29 + $0xb8] sm:$0xff] %v301_v23  ;;  %v303_v24 = vld [vmem:[%s1138_s28 + $0x180] sm:$0xff]  ;;  %v305_v25 = vld [vmem:[%s1138_s28 + $0x190] sm:$0xff] }
  0x22   : > { %v307_v26 = vld [vmem:[%s1138_s28 + $0x1a0] sm:$0xff]  ;;  %304 = vst [vmem:[%s1143_s29 + $0xc0] sm:$0xff] %v303_v24  ;;  %306 = vst [vmem:[%s1143_s29 + $0xc8] sm:$0xff] %v305_v25  ;;  %v309_v27 = vld [vmem:[%s1138_s28 + $0x1b0] sm:$0xff] }
  0x23   : > { %308 = vst [vmem:[%s1143_s29 + $0xd0] sm:$0xff] %v307_v26  ;;  %v311_v28 = vld [vmem:[%s1138_s28 + $0x1c0] sm:$0xff]  ;;  %v313_v29 = vld [vmem:[%s1138_s28 + $0x1d0] sm:$0xff]  ;;  %310 = vst [vmem:[%s1143_s29 + $0xd8] sm:$0xff] %v309_v27 }
  0x24   : > { %312 = vst [vmem:[%s1143_s29 + $0xe0] sm:$0xff] %v311_v28  ;;  %314 = vst [vmem:[%s1143_s29 + $0xe8] sm:$0xff] %v313_v29  ;;  %v315_v30 = vld [vmem:[%s1138_s28 + $0x1e0] sm:$0xff]  ;;  %v317_v31 = vld [vmem:[%s1138_s28 + $0x1f0] sm:$0xff] }
  0x25   : > { %316 = vst [vmem:[%s1143_s29 + $0xf0] sm:$0xff] %v315_v30  ;;  %318 = vst [vmem:[%s1143_s29 + $0xf8] sm:$0xff] %v317_v31 }
  0x26 PF: > { %p854_p8 = scmp.ge.s32.totalorder %s1067_s16, 1  ;;  %p323_p9 = scmp.lt.s32.totalorder %s1067_s16, 3 }
  0x28   : > { %p324_p10 = pnand %p854_p8, %p323_p9 }
  0x29   : > { %s330_s30 = sand.u32 (!%p324_p10), 1, %s1051_s12   ;;  %v1025_v32 = vld [vmem:[%s1310_s0 + $0x4] ss:$8 sps:$4 sm:$0xff] (!%p324_p10)   ;;  %v1069_v33 = vmov (!%p324_p10), 0   ;;  %v1028_v34 = vld [vmem:[%s1310_s0 + $0x14] ss:$8 sps:$4 sm:$0xff] (!%p324_p10)  }
  0x2a   : > { %327 = sbr.rel (%p324_p10) target bundleno = 336 (0x150), region = 66  ;;  %s855_s4 = sshll.u32 (!%p324_p10), %s330_s30, 8  ;;  %974 = vset.pattern.permute.xlu1 (!%p324_p10), %v1069_v33  ;;  %973 = vset.pattern.permute.xlu0 (!%p324_p10), %v1069_v33  ;;  %v684_v35 = vld [vmem:[%s1312_s2 + $0x10] sm:$0xff] (!%p324_p10)  ;;  %v682_v49 = vld [vmem:[%s1312_s2] sm:$0xff] (!%p324_p10)  ;;  %v685_v50 = vld [vmem:[%s1312_s2 + $0x18] sm:$0xff] (!%p324_p10) }
  0x2b   : > { %s1220_s11 = scalar_lea.vmem (!%p324_p10), [#allocation3], %s855_s4  ;;  %634 = vmatprep.mubr.bf16.mxu0 (!%p324_p10), %v1025_v32  ;;  %698 = vperm.xlu1 (!%p324_p10), %974, %v684_v35   ;;  %v683_v52 = vld [vmem:[%s1312_s2 + $0x8] sm:$0xff] (!%p324_p10)  ;;  %v1026_v8 = vld [vmem:[%s1310_s0 + $0x10] ss:$8 sps:$4 sm:$0xff] (!%p324_p10)   ;;  %s856_s4 = sshll.u32 (!%p324_p10), %s330_s30, 6 }
  0x2c   : > { %v975_v36 = vld [vmem:[%s1220_s11 + $0x4] ss:$8 sps:$4 sm:$0xff] (!%p324_p10)   ;;  %v977_v37 = vld [vmem:[%s1220_s11] ss:$8 sps:$4 sm:$0xff] (!%p324_p10)   ;;  %644 = vmatprep.mubr.bf16.mxu1 (!%p324_p10), %v1028_v34  ;;  %v978_v38 = vld [vmem:[%s1220_s11 + $0x14] ss:$8 sps:$4 sm:$0xff] (!%p324_p10)   ;;  %688 = vperm.xlu0 (!%p324_p10), %973, %v682_v49  }
  0x2d   : > { %602 = vmatprep.subr.bf16.mxu0 (!%p324_p10), %v975_v36  ;;  %900 = vmatprep.subr.bf16.mxu1 (!%p324_p10), %v975_v36  ;;  %v980_v39 = vld [vmem:[%s1220_s11 + $0x10] ss:$8 sps:$4 sm:$0xff] (!%p324_p10)   ;;  %v981_v40 = vld [vmem:[%s1220_s11 + $0x24] ss:$8 sps:$4 sm:$0xff] (!%p324_p10)   ;;  %v983_v41 = vld [vmem:[%s1220_s11 + $0x20] ss:$8 sps:$4 sm:$0xff] (!%p324_p10)  }
  0x2e   : > { %603 = vmatpush1.bf16.msra.mxu0 (!%p324_p10), %v977_v37  ;;  %916 = vmatpush1.bf16.msra.mxu1 (!%p324_p10), %v977_v37  ;;  %v984_v42 = vld [vmem:[%s1220_s11 + $0x34] ss:$8 sps:$4 sm:$0xff] (!%p324_p10)   ;;  %v986_v43 = vld [vmem:[%s1220_s11 + $0x30] ss:$8 sps:$4 sm:$0xff] (!%p324_p10)   ;;  %v987_v44 = vld [vmem:[%s1220_s11 + $0x44] ss:$8 sps:$4 sm:$0xff] (!%p324_p10)  }
  0x2f   : > { %604 = vmatprep.subr.bf16.mxu0 (!%p324_p10), %v978_v38  ;;  %901 = vmatprep.subr.bf16.mxu1 (!%p324_p10), %v978_v38  ;;  %v989_v45 = vld [vmem:[%s1220_s11 + $0x40] ss:$8 sps:$4 sm:$0xff] (!%p324_p10)   ;;  %v990_v46 = vld [vmem:[%s1220_s11 + $0x54] ss:$8 sps:$4 sm:$0xff] (!%p324_p10)   ;;  %v992_v47 = vld [vmem:[%s1220_s11 + $0x50] ss:$8 sps:$4 sm:$0xff] (!%p324_p10)  }
  0x30   : > { %v993_v48 = vld [vmem:[%s1220_s11 + $0x64] ss:$8 sps:$4 sm:$0xff] (!%p324_p10)   ;;  %703 = vperm.xlu1 (!%p324_p10), %974, %v685_v50   ;;  %v995_v51 = vld [vmem:[%s1220_s11 + $0x60] ss:$8 sps:$4 sm:$0xff] (!%p324_p10)   ;;  %v996_v53 = vld [vmem:[%s1220_s11 + $0x74] ss:$8 sps:$4 sm:$0xff] (!%p324_p10)   ;;  %693 = vperm.xlu0 (!%p324_p10), %973, %v683_v52  }
  0x31   : > { %v998_v54 = vld [vmem:[%s1220_s11 + $0x70] ss:$8 sps:$4 sm:$0xff]   ;;  %v999_v55 = vld [vmem:[%s1220_s11 + $0x84] ss:$8 sps:$4 sm:$0xff]   ;;  %v1001_v56 = vld [vmem:[%s1220_s11 + $0x80] ss:$8 sps:$4 sm:$0xff]  }
  0x32   : > { %605 = vmatpush1.bf16.msra.mxu0 %v980_v39  ;;  %917 = vmatpush1.bf16.msra.mxu1 %v980_v39  ;;  %v1002_v57 = vld [vmem:[%s1220_s11 + $0x94] ss:$8 sps:$4 sm:$0xff]   ;;  %v1004_v58 = vld [vmem:[%s1220_s11 + $0x90] ss:$8 sps:$4 sm:$0xff]   ;;  %v1005_v59 = vld [vmem:[%s1220_s11 + $0xa4] ss:$8 sps:$4 sm:$0xff]  }
  0x33   : > { %606 = vmatprep.subr.bf16.mxu0 %v981_v40  ;;  %902 = vmatprep.subr.bf16.mxu1 %v981_v40  ;;  %v1007_v60 = vld [vmem:[%s1220_s11 + $0xa0] ss:$8 sps:$4 sm:$0xff]   ;;  %v1008_v61 = vld [vmem:[%s1220_s11 + $0xb4] ss:$8 sps:$4 sm:$0xff]   ;;  %v1010_v62 = vld [vmem:[%s1220_s11 + $0xb0] ss:$8 sps:$4 sm:$0xff]  }
  0x34   : > { %v1011_v63 = vld [vmem:[%s1220_s11 + $0xc4] ss:$8 sps:$4 sm:$0xff]   ;;  %v1013_v0 = vld [vmem:[%s1220_s11 + $0xc0] ss:$8 sps:$4 sm:$0xff]   ;;  %v1014_v1 = vld [vmem:[%s1220_s11 + $0xd4] ss:$8 sps:$4 sm:$0xff]  }
  0x35   : > { %v1016_v2 = vld [vmem:[%s1220_s11 + $0xd0] ss:$8 sps:$4 sm:$0xff]   ;;  %v1017_v3 = vld [vmem:[%s1220_s11 + $0xe4] ss:$8 sps:$4 sm:$0xff]   ;;  %v1019_v4 = vld [vmem:[%s1220_s11 + $0xe0] ss:$8 sps:$4 sm:$0xff]  }
  0x36   : > { %607 = vmatpush1.bf16.msra.mxu0 %v983_v41  ;;  %918 = vmatpush1.bf16.msra.mxu1 %v983_v41  ;;  %v1020_v5 = vld [vmem:[%s1220_s11 + $0xf4] ss:$8 sps:$4 sm:$0xff]   ;;  %v1022_v6 = vld [vmem:[%s1220_s11 + $0xf0] ss:$8 sps:$4 sm:$0xff]   ;;  %v1023_v7 = vld [vmem:[%s1310_s0] ss:$8 sps:$4 sm:$0xff]  }
  0x37   : > { %608 = vmatprep.subr.bf16.mxu0 %v984_v42  ;;  %903 = vmatprep.subr.bf16.mxu1 %v984_v42  ;;  %s1271_s5 = scalar_lea.vmem [#allocation4], %s856_s4  ;;  %s899_s12 = sshll.u32 (%p1125_p6), %s1059_s14, 4 }
  0x38   : > { %s731_s7 = scalar_lea.vmem (%p1125_p6), %s1313_s3, %s899_s12 }
  0x3a   : > { %609 = vmatpush1.bf16.msra.mxu0 %v986_v43  ;;  %919 = vmatpush1.bf16.msra.mxu1 %v986_v43 }
  0x3b   : > { %610 = vmatprep.subr.bf16.mxu0 %v987_v44  ;;  %904 = vmatprep.subr.bf16.mxu1 %v987_v44 }
  0x3e   : > { %611 = vmatpush1.bf16.msra.mxu0 %v989_v45  ;;  %920 = vmatpush1.bf16.msra.mxu1 %v989_v45 }
  0x3f   : > { %612 = vmatprep.subr.bf16.mxu0 %v990_v46  ;;  %905 = vmatprep.subr.bf16.mxu1 %v990_v46 }
  0x42   : > { %613 = vmatpush1.bf16.msra.mxu0 %v992_v47  ;;  %921 = vmatpush1.bf16.msra.mxu1 %v992_v47 }
  0x43   : > { %614 = vmatprep.subr.bf16.mxu0 %v993_v48  ;;  %906 = vmatprep.subr.bf16.mxu1 %v993_v48 }
  0x46   : > { %615 = vmatpush1.bf16.msra.mxu0 %v995_v51  ;;  %922 = vmatpush1.bf16.msra.mxu1 %v995_v51 }
  0x47   : > { %616 = vmatprep.subr.bf16.mxu0 %v996_v53  ;;  %907 = vmatprep.subr.bf16.mxu1 %v996_v53 }
  0x4a   : > { %617 = vmatpush1.bf16.msra.mxu0 %v998_v54  ;;  %923 = vmatpush1.bf16.msra.mxu1 %v998_v54 }
  0x4b   : > { %618 = vmatprep.subr.bf16.mxu0 %v999_v55  ;;  %908 = vmatprep.subr.bf16.mxu1 %v999_v55 }
  0x4e   : > { %619 = vmatpush1.bf16.msra.mxu0 %v1001_v56  ;;  %924 = vmatpush1.bf16.msra.mxu1 %v1001_v56 }
  0x4f   : > { %620 = vmatprep.subr.bf16.mxu0 %v1002_v57  ;;  %909 = vmatprep.subr.bf16.mxu1 %v1002_v57 }
  0x52   : > { %621 = vmatpush1.bf16.msra.mxu0 %v1004_v58  ;;  %925 = vmatpush1.bf16.msra.mxu1 %v1004_v58 }
  0x53   : > { %622 = vmatprep.subr.bf16.mxu0 %v1005_v59  ;;  %910 = vmatprep.subr.bf16.mxu1 %v1005_v59 }
  0x56   : > { %623 = vmatpush1.bf16.msra.mxu0 %v1007_v60  ;;  %926 = vmatpush1.bf16.msra.mxu1 %v1007_v60 }
  0x57   : > { %624 = vmatprep.subr.bf16.mxu0 %v1008_v61  ;;  %911 = vmatprep.subr.bf16.mxu1 %v1008_v61 }
  0x5a   : > { %625 = vmatpush1.bf16.msra.mxu0 %v1010_v62  ;;  %927 = vmatpush1.bf16.msra.mxu1 %v1010_v62 }
  0x5b   : > { %626 = vmatprep.subr.bf16.mxu0 %v1011_v63  ;;  %912 = vmatprep.subr.bf16.mxu1 %v1011_v63 }
  0x5e   : > { %627 = vmatpush1.bf16.msra.mxu0 %v1013_v0  ;;  %928 = vmatpush1.bf16.msra.mxu1 %v1013_v0 }
  0x5f   : > { %628 = vmatprep.subr.bf16.mxu0 %v1014_v1  ;;  %913 = vmatprep.subr.bf16.mxu1 %v1014_v1 }
  0x62   : > { %629 = vmatpush1.bf16.msra.mxu0 %v1016_v2  ;;  %929 = vmatpush1.bf16.msra.mxu1 %v1016_v2 }
  0x63   : > { %630 = vmatprep.subr.bf16.mxu0 %v1017_v3  ;;  %914 = vmatprep.subr.bf16.mxu1 %v1017_v3 }
  0x66   : > { %631 = vmatpush1.bf16.msra.mxu0 %v1019_v4  ;;  %930 = vmatpush1.bf16.msra.mxu1 %v1019_v4 }
  0x67   : > { %632 = vmatprep.subr.bf16.mxu0 %v1020_v5  ;;  %915 = vmatprep.subr.bf16.mxu1 %v1020_v5 }
  0x6a   : > { %633 = vmatpush1.bf16.msra.mxu0 %v1022_v6  ;;  %931 = vmatpush1.bf16.msra.mxu1 %v1022_v6 }
  0x6d   : > { %635 = vmatmul.mubr.bf16.vlgmr.msra.gmra.mrb[0].mxu0 %v1023_v7  ;;  %645 = vmatmul.mubr.bf16.vlgmr.msra.gmra.mrb[0].mxu1 %v1026_v8 }
  0xaa   : > { %v699_v9 = vpop.permute.xlu1 %698 }
  0xab   : > { %v689_v10 = vpop.permute.xlu0 %688 }
  0xaf   : > { %v704_v11 = vpop.permute.xlu1 %703  ;;  %v694_v12 = vpop.permute.xlu0 %693 }
 0x140   : > { %v636_v13 = vpop.f32.mrb[0].mxu0  ;;  %v646_v14 = vpop.f32.mrb[0].mxu1  ;;  %728 = sbr.rel (!%p1125_p6) target bundleno = 336 (0x150), region = 82 }
 0x141   : > { %v706_v15 = vadd.f32 %v689_v10, %v636_v13  ;;  %v710_v16 = vadd.f32 %v699_v9, %v646_v14  ;;  %v638_v17 = vpop.f32.mrb[1].mxu0  ;;  %v648_v18 = vpop.f32.mrb[1].mxu1 }
 0x142   : > { %v707_v19 = vadd.f32 %v689_v10, %v638_v17  ;;  %v711_v20 = vadd.f32 %v699_v9, %v648_v18  ;;  %v640_v21 = vpop.f32.mrb[2].mxu0  ;;  %v650_v22 = vpop.f32.mrb[2].mxu1 }
 0x143   : > { %714 = vst [vmem:[%s1271_s5] sm:$0xff] %v706_v15  ;;  %718 = vst [vmem:[%s1271_s5 + $0x20] sm:$0xff] %v710_v16  ;;  %v708_v23 = vadd.f32 %v694_v12, %v640_v21  ;;  %v712_v24 = vadd.f32 %v704_v11, %v650_v22  ;;  %v642_v25 = vpop.f32.mrb[3].mxu0  ;;  %v652_v26 = vpop.f32.mrb[3].mxu1 }
 0x144   : > { %715 = vst [vmem:[%s1271_s5 + $0x8] sm:$0xff] %v707_v19  ;;  %719 = vst [vmem:[%s1271_s5 + $0x28] sm:$0xff] %v711_v20  ;;  %v709_v27 = vadd.f32 %v694_v12, %v642_v25  ;;  %v713_v28 = vadd.f32 %v704_v11, %v652_v26 }
 0x145   : > { %716 = vst [vmem:[%s1271_s5 + $0x10] sm:$0xff] %v708_v23  ;;  %720 = vst [vmem:[%s1271_s5 + $0x30] sm:$0xff] %v712_v24 }
 0x146   : > { %717 = vst [vmem:[%s1271_s5 + $0x18] sm:$0xff] %v709_v27  ;;  %721 = vst [vmem:[%s1271_s5 + $0x38] sm:$0xff] %v713_v28 }
 0x14a   : > { %v744_v29 = vld [vmem:[%s1271_s5] sm:$0xff] }
 0x14b   : > { %v746_v30 = vld [vmem:[%s1271_s5 + $0x8] sm:$0xff]  ;;  %v752_v33 = vld [vmem:[%s1271_s5 + $0x20] sm:$0xff]  ;;  %745 = vst [vmem:[%s731_s7] sm:$0xff] %v744_v29 }
 0x14c   : > { %v748_v31 = vld [vmem:[%s1271_s5 + $0x10] sm:$0xff]  ;;  %v754_v34 = vld [vmem:[%s1271_s5 + $0x28] sm:$0xff]  ;;  %747 = vst [vmem:[%s731_s7 + $0x8] sm:$0xff] %v746_v30  ;;  %753 = vst [vmem:[%s731_s7 + $0x40] sm:$0xff] %v752_v33 }
 0x14d   : > { %v750_v32 = vld [vmem:[%s1271_s5 + $0x18] sm:$0xff]  ;;  %749 = vst [vmem:[%s731_s7 + $0x20] sm:$0xff] %v748_v31  ;;  %755 = vst [vmem:[%s731_s7 + $0x48] sm:$0xff] %v754_v34  ;;  %v756_v35 = vld [vmem:[%s1271_s5 + $0x30] sm:$0xff] }
 0x14e   : > { %751 = vst [vmem:[%s731_s7 + $0x28] sm:$0xff] %v750_v32  ;;  %v758_v36 = vld [vmem:[%s1271_s5 + $0x38] sm:$0xff]  ;;  %757 = vst [vmem:[%s731_s7 + $0x60] sm:$0xff] %v756_v35 }
 0x14f   : > { %759 = vst [vmem:[%s731_s7 + $0x68] sm:$0xff] %v758_v36 }
 0x150 PF: > { %s13_s16 = sadd.s32 1, %s1067_s16   ;;  %s1315_s12 = smov %s1055_s13 }
 0x151   : > { %p10_p11 = scmp.ge.s32.totalorder %s13_s16, 4   ;;  %s1316_s13 = smov %s1130_s22 }
 0x152   : > { %s1317_s14 = smov %s1063_s15  ;;  %s1318_s15 = smov %s1320_s17 }
 0x153   :  { %12 = sbr.rel (!%p10_p11) target bundleno = 3 (0x3), region = 139 }

// kernel: discriminator_forward.12
= control target key start
LH: loop header
LB: loop body
LE: loop exit
PB: predicated region body
PF: predicated region fallthrough
CT: control target
= control target key end

     0   :  { %s498_s15 = smov 0   ;;  %s500_s16 = smov 0   ;;  %s613_s0 = inlined_call_operand.vmem [shape: f32[32,512], index: 0, kind: input, shape index: {}]   ;;  %s614_s1 = inlined_call_operand.vmem [shape: f32[32,1], index: 1, kind: input, shape index: {}]   ;;  %s615_s2 = inlined_call_operand.vmem [shape: f32[32,1], index: 2, kind: input, shape index: {}]   ;;  %s616_s3 = inlined_call_operand.vmem [shape: f32[32,1], index: 3, kind: output, shape index: {0}]   ;;  %s617_s4 = inlined_call_operand.vmem [shape: f32[32,1], index: 4, kind: output, shape index: {1}]  }
   0x1   :  { %s502_s17 = smov 0  }
   0x2 LB: > { %s402_s18 = sadd.s32 4294967295, %s470_s17   ;;  %s515_s19 = sadd.s32 1, %s470_s17   ;;  %s470_s17 = sphi %s502_s17, %s620_s17   ;;  %s466_s16 = sphi %s500_s16, %s619_s16   ;;  %s462_s15 = sphi %s498_s15, %s618_s15  }
   0x3   : > { %s19_s20 = ssub.s32 %s470_s17, %s515_s19  ;;  %s22_s21 = sadd.s32 1, %s466_s16 }
   0x4   : > { %p20_p0 = scmp.eq.s32.totalorder %s19_s20, 0  ;;  %p29_p1 = scmp.ne.s32.totalorder %s466_s16, %s462_s15 }
   0x5   : > { %p30_p2 = scmp.eq.s32.totalorder %s470_s17, 0  ;;  %p404_p4 = scmp.ge.s32.totalorder %s470_s17, 2 }
   0x6   : > { %s524_s22 = scalar_select %p20_p0, %s466_s16, %s22_s21  }
   0x7   : > { %p31_p3 = por %p30_p2, %p29_p1  ;;  %145 = sbr.rel (%p404_p4) target bundleno = 22 (0x16), region = 24 }
   0xe   : > { %148 = sbr.rel (!%p31_p3) target bundleno = 22 (0x16), region = 28  ;;  %s150_s23 = sand.u32 (%p31_p3), 1, %s466_s16  }
   0xf   : > { %s414_s24 = sshll.u32 (%p31_p3), %s470_s17, 4  ;;  %s405_s25 = sshll.u32 (%p31_p3), %s150_s23, 6 }
  0x10   : > { %s155_s28 = scalar_lea.vmem (%p31_p3), %s613_s0, %s414_s24  ;;  %s152_s29 = scalar_lea.vmem (%p31_p3), [#allocation4], %s405_s25 }
  0x11   : > { %v168_v0 = vld [vmem:[%s155_s28] sm:$0xff] (%p31_p3)  ;;  %v170_v1 = vld [vmem:[%s155_s28 + $0x8] sm:$0xff] (%p31_p3) }
  0x12   : > { %v172_v2 = vld [vmem:[%s155_s28 + $0x20] sm:$0xff] (%p31_p3)  ;;  %169 = vst [vmem:[%s152_s29] sm:$0xff] (%p31_p3), %v168_v0  ;;  %171 = vst [vmem:[%s152_s29 + $0x8] sm:$0xff] (%p31_p3), %v170_v1  ;;  %v174_v3 = vld [vmem:[%s155_s28 + $0x28] sm:$0xff] (%p31_p3) }
  0x13   : > { %173 = vst [vmem:[%s152_s29 + $0x10] sm:$0xff] (%p31_p3), %v172_v2  ;;  %v176_v4 = vld [vmem:[%s155_s28 + $0x40] sm:$0xff] (%p31_p3)  ;;  %v178_v5 = vld [vmem:[%s155_s28 + $0x48] sm:$0xff] (%p31_p3)  ;;  %175 = vst [vmem:[%s152_s29 + $0x18] sm:$0xff] (%p31_p3), %v174_v3 }
  0x14   : > { %177 = vst [vmem:[%s152_s29 + $0x20] sm:$0xff] (%p31_p3), %v176_v4  ;;  %179 = vst [vmem:[%s152_s29 + $0x28] sm:$0xff] (%p31_p3), %v178_v5  ;;  %v180_v6 = vld [vmem:[%s155_s28 + $0x60] sm:$0xff] (%p31_p3)  ;;  %v182_v7 = vld [vmem:[%s155_s28 + $0x68] sm:$0xff] (%p31_p3) }
  0x15   : > { %181 = vst [vmem:[%s152_s29 + $0x30] sm:$0xff] %v180_v6  ;;  %183 = vst [vmem:[%s152_s29 + $0x38] sm:$0xff] %v182_v7 }
  0x16 PF: > { %p408_p5 = scmp.ge.s32.totalorder %s470_s17, 1  ;;  %p188_p6 = scmp.lt.s32.totalorder %s470_s17, 3 }
  0x18   : > { %p189_p7 = pnand %p408_p5, %p188_p6 }
  0x19   : > { %s195_s30 = sand.u32 (!%p189_p7), 1, %s462_s15   ;;  %p410_p8 = scmp.ne.s32.totalorder (!%p189_p7), %s402_s18, 0 }
  0x1a   : > { %192 = sbr.rel (%p189_p7) target bundleno = 235 (0xeb), region = 51  ;;  %s409_s5 = sshll.u32 (!%p189_p7), %s195_s30, 6 }
  0x1b   : > { %s197_s6 = scalar_lea.vmem (!%p189_p7), [#allocation4], %s409_s5 }
  0x21   : > { %219 = sbr.rel (%p410_p8) target bundleno = 40 (0x28), region = 59  ;;  %vm220_vm0 = vcmask (!%p410_p8), 7168   ;;  %v472_v8 = vmov (!%p410_p8), 0.0  }
  0x22   : > { %221 = vst.msk [vmem:[#allocation2] sm:$0xff] (!%p410_p8), %vm220_vm0, %v472_v8  ;;  %222 = vst.msk [vmem:[#allocation2 + $0x8] sm:$0xff] (!%p410_p8), %vm220_vm0, %v472_v8 }
  0x23   : > { %223 = vst.msk [vmem:[#allocation2 + $0x10] sm:$0xff] (!%p410_p8), %vm220_vm0, %v472_v8  ;;  %224 = vst.msk [vmem:[#allocation2 + $0x18] sm:$0xff] (!%p410_p8), %vm220_vm0, %v472_v8 }
  0x24   : > { %225 = vst.msk [vmem:[#allocation3] sm:$0xff] (!%p410_p8), %vm220_vm0, %v472_v8  ;;  %226 = vst.msk [vmem:[#allocation3 + $0x8] sm:$0xff] (!%p410_p8), %vm220_vm0, %v472_v8 }
  0x25   : > { %227 = vst.msk [vmem:[#allocation3 + $0x10] sm:$0xff] (!%p410_p8), %vm220_vm0, %v472_v8  ;;  %228 = vst.msk [vmem:[#allocation3 + $0x18] sm:$0xff] (!%p410_p8), %vm220_vm0, %v472_v8 }
  0x28 PF: > { %v233_v9 = vld [vmem:[%s197_s6 + $0x20] sm:$0xff]  ;;  %v234_v10 = vld [vmem:[%s197_s6 + $0x28] sm:$0xff]  ;;  %v235_v14 = vld [vmem:[%s197_s6 + $0x30] sm:$0xff]  ;;  %vm257_vm1 = vcmask 7168   ;;  %p411_p9 = scmp.ne.s32.totalorder %s402_s18, 1 }
  0x29   : > { %v229_v11 = vld [vmem:[%s197_s6] sm:$0xff]  ;;  %v247_v12 = vadd.f32 %v234_v10, %v233_v9  ;;  %v230_v13 = vld [vmem:[%s197_s6 + $0x8] sm:$0xff]  ;;  %v236_v15 = vld [vmem:[%s197_s6 + $0x38] sm:$0xff]  ;;  %v272_v26 = vmul.f32 %v235_v14, %v235_v14  ;;  %v270_v28 = vmul.f32 %v233_v9, %v233_v9  ;;  %v271_v29 = vmul.f32 %v234_v10, %v234_v10 }
  0x2a   : > { %v241_v16 = vadd.f32 %v230_v13, %v229_v11  ;;  %v231_v17 = vld [vmem:[%s197_s6 + $0x10] sm:$0xff]  ;;  %v232_v18 = vld [vmem:[%s197_s6 + $0x18] sm:$0xff]  ;;  %v250_v19 = vadd.f32 %v236_v15, %v235_v14  ;;  %v266_v22 = vmul.f32 %v229_v11, %v229_v11  ;;  %v267_v23 = vmul.f32 %v230_v13, %v230_v13  ;;  %v237_v34 = vld [vmem:[#allocation2] sm:$0xff] }
  0x2b   : > { %248 = vadd.xlane.f32.xlu1 %v247_v12  ;;  %v268_v20 = vmul.f32 %v231_v17, %v231_v17  ;;  %v269_v21 = vmul.f32 %v232_v18, %v232_v18  ;;  %v244_v24 = vadd.f32 %v232_v18, %v231_v17  ;;  %v273_v27 = vmul.f32 %v236_v15, %v236_v15  ;;  %v239_v33 = vld [vmem:[#allocation2 + $0x10] sm:$0xff]  ;;  %v240_v39 = vld [vmem:[#allocation2 + $0x18] sm:$0xff]  ;;  %v238_v40 = vld [vmem:[#allocation2 + $0x8] sm:$0xff] }
  0x2c   : > { %242 = vadd.xlane.f32.xlu0 %v241_v16  ;;  %v274_v30 = vadd.f32 %v267_v23, %v266_v22  ;;  %v280_v32 = vadd.f32 %v271_v29, %v270_v28  ;;  %v263_v45 = vld [vmem:[#allocation3 + $0x8] sm:$0xff]  ;;  %v262_v46 = vld [vmem:[#allocation3] sm:$0xff]  ;;  %v265_v51 = vld [vmem:[#allocation3 + $0x18] sm:$0xff] }
  0x2d   : > { %v277_v25 = vadd.f32 %v269_v21, %v268_v20  ;;  %v283_v31 = vadd.f32 %v273_v27, %v272_v26  ;;  %v264_v52 = vld [vmem:[#allocation3 + $0x10] sm:$0xff]  ;;  %v335_v26 = vld [vmem:[%s614_s1 + $0x8] sm:$0xff] (!%p411_p9) }
  0x2e   : > { %v336_v28 = vld [vmem:[%s614_s1 + $0x10] sm:$0xff] (!%p411_p9) }
  0x2f   : > { %251 = vadd.xlane.f32.xlu1 %v250_v19 }
  0x30   : > { %245 = vadd.xlane.f32.xlu0 %v244_v24 }
  0x33   : > { %278 = vadd.xlane.f32.xlu1 %v277_v25  ;;  %v334_v25 = vld [vmem:[%s614_s1] sm:$0xff] (!%p411_p9) }
  0x34   : > { %275 = vadd.xlane.f32.xlu0 %v274_v30 }
  0x37   : > { %284 = vadd.xlane.f32.xlu1 %v283_v31  ;;  %v337_v31 = vld [vmem:[%s614_s1 + $0x18] sm:$0xff] (!%p411_p9) }
  0x38   : > { %281 = vadd.xlane.f32.xlu0 %v280_v32 }
  0xb8   : > { %v249_v35 = vpop.xlane.xlu1 %248 }
  0xb9   : > { %v255_v36 = vadd.f32 %v249_v35, %v239_v33  ;;  %v243_v37 = vpop.xlane.xlu0 %242 }
  0xba   : > { %v253_v38 = vadd.f32 %v243_v37, %v237_v34  ;;  %v346_v34 = vld [vmem:[%s615_s2] sm:$0xff] (!%p411_p9) }
  0xbb   : > { %260 = vst.msk [vmem:[#allocation2 + $0x10] sm:$0xff] %vm257_vm1, %v255_v36 }
  0xbc   : > { %258 = vst.msk [vmem:[#allocation2] sm:$0xff] %vm257_vm1, %v253_v38  ;;  %v252_v41 = vpop.xlane.xlu1 %251  ;;  %v347_v38 = vld [vmem:[%s615_s2 + $0x8] sm:$0xff] (!%p411_p9) }
  0xbd   : > { %v256_v42 = vadd.f32 %v252_v41, %v240_v39  ;;  %v246_v43 = vpop.xlane.xlu0 %245  ;;  %v348_v41 = vld [vmem:[%s615_s2 + $0x10] sm:$0xff] (!%p411_p9) }
  0xbe   : > { %v254_v44 = vadd.f32 %v246_v43, %v238_v40 }
  0xbf   : > { %261 = vst.msk [vmem:[#allocation2 + $0x18] sm:$0xff] %vm257_vm1, %v256_v42 }
  0xc0   : > { %259 = vst.msk [vmem:[#allocation2 + $0x8] sm:$0xff] %vm257_vm1, %v254_v44  ;;  %v279_v47 = vpop.xlane.xlu1 %278  ;;  %v349_v44 = vld [vmem:[%s615_s2 + $0x18] sm:$0xff] (!%p411_p9) }
  0xc1   : > { %v287_v48 = vadd.f32 %v279_v47, %v263_v45  ;;  %v276_v49 = vpop.xlane.xlu0 %275 }
  0xc2   : > { %v286_v50 = vadd.f32 %v276_v49, %v262_v46  ;;  %297 = sbr.rel (%p411_p9) target bundleno = 235 (0xeb), region = 63  ;;  %v300_v1 = vld [vmem:[#allocation2 + $0x10] sm:$0xff] (!%p411_p9) }
  0xc3   : > { %291 = vst.msk [vmem:[#allocation3 + $0x8] sm:$0xff] %vm257_vm1, %v287_v48  ;;  %v298_v57 = vld [vmem:[#allocation2] sm:$0xff] (!%p411_p9)  ;;  %v304_v4 = vmul.f32 (!%p411_p9), 0.001953125, %v300_v1 }
  0xc4   : > { %290 = vst.msk [vmem:[#allocation3] sm:$0xff] %vm257_vm1, %v286_v50  ;;  %v285_v53 = vpop.xlane.xlu1 %284  ;;  %v302_v59 = vmul.f32 (!%p411_p9), 0.001953125, %v298_v57 }
  0xc5   : > { %v289_v54 = vadd.f32 %v285_v53, %v265_v51  ;;  %v282_v55 = vpop.xlane.xlu0 %281  ;;  %v316_v12 = vmul.f32 (!%p411_p9), %v304_v4, %v304_v4 }
  0xc6   : > { %v288_v56 = vadd.f32 %v282_v55, %v264_v52  ;;  %v314_v3 = vmul.f32 (!%p411_p9), %v302_v59, %v302_v59  ;;  %v301_v6 = vld [vmem:[#allocation2 + $0x18] sm:$0xff] (!%p411_p9) }
  0xc7   : > { %293 = vst.msk [vmem:[#allocation3 + $0x18] sm:$0xff] %vm257_vm1, %v289_v54  ;;  %v299_v61 = vld [vmem:[#allocation2 + $0x8] sm:$0xff] (!%p411_p9)  ;;  %v305_v9 = vmul.f32 (!%p411_p9), 0.001953125, %v301_v6 }
  0xc8   : > { %292 = vst.msk [vmem:[#allocation3 + $0x10] sm:$0xff] %vm257_vm1, %v288_v56  ;;  %v303_v63 = vmul.f32 (!%p411_p9), 0.001953125, %v299_v61 }
  0xc9   : > { %v317_v14 = vmul.f32 %v305_v9, %v305_v9 }
  0xca   : > { %v307_v62 = vld [vmem:[#allocation3 + $0x8] sm:$0xff]  ;;  %v315_v8 = vmul.f32 %v303_v63, %v303_v63 }
  0xcb   : > { %v306_v58 = vld [vmem:[#allocation3] sm:$0xff]  ;;  %v311_v0 = vmul.f32 0.001953125, %v307_v62 }
  0xcc   : > { %v310_v60 = vmul.f32 0.001953125, %v306_v58 }
  0xcd   : > { %v319_v13 = vsub.f32 %v311_v0, %v315_v8 }
  0xce   : > { %v309_v7 = vld [vmem:[#allocation3 + $0x18] sm:$0xff]  ;;  %v318_v11 = vsub.f32 %v310_v60, %v314_v3 }
  0xcf   : > { %v308_v2 = vld [vmem:[#allocation3 + $0x10] sm:$0xff]  ;;  %v313_v10 = vmul.f32 0.001953125, %v309_v7  ;;  %v323_v17 = vmax.f32 %v319_v13, 0.0 }
  0xd0   : > { %v312_v5 = vmul.f32 0.001953125, %v308_v2  ;;  %v322_v15 = vmax.f32 %v318_v11, 0.0 }
  0xd1   : > { %v321_v18 = vsub.f32 %v313_v10, %v317_v14  ;;  %v327_v21 = vadd.f32 1e-05, %v323_v17 }
  0xd2   : > { %v320_v16 = vsub.f32 %v312_v5, %v316_v12  ;;  %v326_v19 = vadd.f32 1e-05, %v322_v15 }
  0xd3   : > { %v325_v22 = vmax.f32 %v321_v18, 0.0 }
  0xd4   : > { %v324_v20 = vmax.f32 %v320_v16, 0.0  ;;  %440 = vrsqrt.f32 %v326_v19 }
  0xd5   : > { %442 = vrsqrt.f32 %v327_v21  ;;  %v329_v24 = vadd.f32 1e-05, %v325_v22 }
  0xd6   : > { %v328_v23 = vadd.f32 1e-05, %v324_v20 }
  0xd8   : > { %444 = vrsqrt.f32 %v328_v23 }
  0xd9   : > { %446 = vrsqrt.f32 %v329_v24 }
  0xde   : > { %v441_v27 = vpop.eup %440 }
  0xdf   : > { %v443_v29 = vpop.eup %442  ;;  %v338_v30 = vmul.f32 %v441_v27, %v334_v25 }
  0xe0   : > { %v339_v33 = vmul.f32 %v443_v29, %v335_v26 }
  0xe1   : > { %342 = vst.msk [vmem:[%s616_s3] sm:$0xff] %vm257_vm1, %v338_v30  ;;  %v350_v37 = vmul.f32 %v338_v30, %v302_v59 }
  0xe2   : > { %v445_v32 = vpop.eup %444  ;;  %343 = vst.msk [vmem:[%s616_s3 + $0x8] sm:$0xff] %vm257_vm1, %v339_v33  ;;  %v351_v40 = vmul.f32 %v339_v33, %v303_v63 }
  0xe3   : > { %v447_v35 = vpop.eup %446  ;;  %v340_v36 = vmul.f32 %v445_v32, %v336_v28  ;;  %v354_v42 = vsub.f32 %v346_v34, %v350_v37 }
  0xe4   : > { %v341_v39 = vmul.f32 %v447_v35, %v337_v31  ;;  %v355_v45 = vsub.f32 %v347_v38, %v351_v40 }
  0xe5   : > { %344 = vst.msk [vmem:[%s616_s3 + $0x10] sm:$0xff] %vm257_vm1, %v340_v36  ;;  %v352_v43 = vmul.f32 %v340_v36, %v304_v4  ;;  %358 = vst.msk [vmem:[%s617_s4] sm:$0xff] %vm257_vm1, %v354_v42 }
  0xe6   : > { %345 = vst.msk [vmem:[%s616_s3 + $0x18] sm:$0xff] %vm257_vm1, %v341_v39  ;;  %v353_v46 = vmul.f32 %v341_v39, %v305_v9  ;;  %359 = vst.msk [vmem:[%s617_s4 + $0x8] sm:$0xff] %vm257_vm1, %v355_v45 }
  0xe7   : > { %v356_v47 = vsub.f32 %v348_v41, %v352_v43 }
  0xe8   : > { %v357_v48 = vsub.f32 %v349_v44, %v353_v46 }
  0xe9   : > { %360 = vst.msk [vmem:[%s617_s4 + $0x10] sm:$0xff] %vm257_vm1, %v356_v47 }
  0xea   : > { %361 = vst.msk [vmem:[%s617_s4 + $0x18] sm:$0xff] %vm257_vm1, %v357_v48 }
  0xeb PF: > { %p12_p10 = scmp.ge.s32.totalorder %s515_s19, 4   ;;  %s618_s15 = smov %s466_s16 }
  0xec   : > { %s619_s16 = smov %s524_s22  ;;  %s620_s17 = smov %s515_s19 }
  0xed   :  { %14 = sbr.rel (!%p12_p10) target bundleno = 2 (0x2), region = 102 }

// kernel: discriminator_forward.13
= control target key start
LH: loop header
LB: loop body
LE: loop exit
PB: predicated region body
PF: predicated region fallthrough
CT: control target
= control target key end

     0   :  { %s532_s12 = smov 0   ;;  %s534_s13 = smov 0   ;;  %s616_s0 = inlined_call_operand.vmem [shape: f32[32,512], index: 0, kind: input, shape index: {}]   ;;  %s617_s1 = inlined_call_operand.vmem [shape: f32[32,1], index: 1, kind: input, shape index: {}]   ;;  %s618_s2 = inlined_call_operand.vmem [shape: f32[32,1], index: 2, kind: input, shape index: {}]   ;;  %s619_s3 = inlined_call_operand.vmem [shape: bf16[32,512], index: 3, kind: output, shape index: {}]  }
   0x1   :  { %s536_s14 = smov 0  }
   0x2 LB: > { %s435_s15 = sadd.s32 4294967295, %s509_s14   ;;  %s549_s16 = sadd.s32 1, %s509_s14   ;;  %s509_s14 = sphi %s536_s14, %s623_s14   ;;  %s505_s13 = sphi %s534_s13, %s622_s13   ;;  %s501_s12 = sphi %s532_s12, %s621_s12  }
   0x3   : > { %s17_s17 = ssub.s32 %s509_s14, %s549_s16  ;;  %s20_s18 = sadd.s32 1, %s505_s13 }
   0x4   : > { %p18_p0 = scmp.eq.s32.totalorder %s17_s17, 0  ;;  %p27_p1 = scmp.ne.s32.totalorder %s505_s13, %s501_s12 }
   0x5   : > { %p28_p2 = scmp.eq.s32.totalorder %s509_s14, 0  ;;  %p99_p3 = scmp.eq.s32.totalorder %s435_s15, 1 }
   0x6   : > { %s560_s19 = scalar_select %p18_p0, %s505_s13, %s20_s18  }
   0x7   : > { %p29_p4 = por %p28_p2, %p27_p1  ;;  %p562_p5 = por %p99_p3, %p27_p1 }
   0x8   : > { %p438_p6 = scmp.ge.s32.totalorder %s509_s14, 2 }
   0xa   : > { %127 = sbr.rel (%p438_p6) target bundleno = 25 (0x19), region = 24 }
  0x11   : > { %130 = sbr.rel (!%p29_p4) target bundleno = 25 (0x19), region = 28  ;;  %s132_s21 = sand.u32 (%p29_p4), 1, %s505_s13  }
  0x12   : > { %s454_s22 = sshll.u32 (%p29_p4), %s509_s14, 4  ;;  %s439_s23 = sshll.u32 (%p29_p4), %s132_s21, 6 }
  0x13   : > { %s137_s26 = scalar_lea.vmem (%p29_p4), %s616_s0, %s454_s22  ;;  %s134_s27 = scalar_lea.vmem (%p29_p4), [#allocation2], %s439_s23 }
  0x14   : > { %v150_v0 = vld [vmem:[%s137_s26] sm:$0xff] (%p29_p4)  ;;  %v152_v1 = vld [vmem:[%s137_s26 + $0x8] sm:$0xff] (%p29_p4) }
  0x15   : > { %v154_v2 = vld [vmem:[%s137_s26 + $0x20] sm:$0xff] (%p29_p4)  ;;  %151 = vst [vmem:[%s134_s27] sm:$0xff] (%p29_p4), %v150_v0  ;;  %153 = vst [vmem:[%s134_s27 + $0x8] sm:$0xff] (%p29_p4), %v152_v1  ;;  %v156_v3 = vld [vmem:[%s137_s26 + $0x28] sm:$0xff] (%p29_p4) }
  0x16   : > { %155 = vst [vmem:[%s134_s27 + $0x10] sm:$0xff] (%p29_p4), %v154_v2  ;;  %v158_v4 = vld [vmem:[%s137_s26 + $0x40] sm:$0xff] (%p29_p4)  ;;  %v160_v5 = vld [vmem:[%s137_s26 + $0x48] sm:$0xff] (%p29_p4)  ;;  %157 = vst [vmem:[%s134_s27 + $0x18] sm:$0xff] (%p29_p4), %v156_v3 }
  0x17   : > { %159 = vst [vmem:[%s134_s27 + $0x20] sm:$0xff] (%p29_p4), %v158_v4  ;;  %161 = vst [vmem:[%s134_s27 + $0x28] sm:$0xff] (%p29_p4), %v160_v5  ;;  %v162_v6 = vld [vmem:[%s137_s26 + $0x60] sm:$0xff] (%p29_p4)  ;;  %v164_v7 = vld [vmem:[%s137_s26 + $0x68] sm:$0xff] (%p29_p4) }
  0x18   : > { %163 = vst [vmem:[%s134_s27 + $0x30] sm:$0xff] %v162_v6  ;;  %165 = vst [vmem:[%s134_s27 + $0x38] sm:$0xff] %v164_v7 }
  0x19 PF: > { %p442_p7 = scmp.ge.s32.totalorder %s509_s14, 1  ;;  %p170_p8 = scmp.lt.s32.totalorder %s509_s14, 3 }
  0x1b   : > { %p171_p9 = pnand %p442_p7, %p170_p8 }
  0x1c   : > { %v211_v8 = vld [vmem:[%s617_s1 + $0x10] sm:$0xff] (!%p171_p9)  ;;  %v209_v9 = vld [vmem:[%s617_s1] sm:$0xff] (!%p171_p9)  ;;  %v511_v10 = vmov (!%p171_p9), 0   ;;  %v212_v11 = vld [vmem:[%s617_s1 + $0x18] sm:$0xff] (!%p171_p9)  ;;  %s177_s24 = sand.u32 (!%p171_p9), 1, %s501_s12  }
  0x1d   : > { %174 = sbr.rel (%p171_p9) target bundleno = 189 (0xbd), region = 51  ;;  %486 = vset.pattern.permute.xlu1 (!%p171_p9), %v511_v10  ;;  %485 = vset.pattern.permute.xlu0 (!%p171_p9), %v511_v10  ;;  %v210_v12 = vld [vmem:[%s617_s1 + $0x8] sm:$0xff] (!%p171_p9)  ;;  %v241_v14 = vld [vmem:[%s618_s2] sm:$0xff] (!%p171_p9)  ;;  %v244_v15 = vld [vmem:[%s618_s2 + $0x18] sm:$0xff] (!%p171_p9)  ;;  %s443_s25 = sshll.u32 (!%p171_p9), %s177_s24, 6 }
  0x1e   : > { %225 = vperm.xlu1 (!%p171_p9), %486, %v211_v8   ;;  %215 = vperm.xlu0 (!%p171_p9), %485, %v209_v9   ;;  %v242_v13 = vld [vmem:[%s618_s2 + $0x8] sm:$0xff] (!%p171_p9)  ;;  %v243_v16 = vld [vmem:[%s618_s2 + $0x10] sm:$0xff] (!%p171_p9)  ;;  %s179_s26 = scalar_lea.vmem (!%p171_p9), [#allocation2], %s443_s25  ;;  %s444_s12 = sshll.u32 (!%p171_p9), %s177_s24, 5 }
  0x1f   : > { %v201_v19 = vld [vmem:[%s179_s26] sm:$0xff] (!%p171_p9)  ;;  %v202_v20 = vld [vmem:[%s179_s26 + $0x8] sm:$0xff] (!%p171_p9)  ;;  %v203_v23 = vld [vmem:[%s179_s26 + $0x10] sm:$0xff] (!%p171_p9)  ;;  %s198_s27 = scalar_lea.vmem (!%p171_p9), [#allocation3], %s444_s12 }
  0x20   : > { %v204_v24 = vld [vmem:[%s179_s26 + $0x18] sm:$0xff] (!%p171_p9)  ;;  %v205_v25 = vld [vmem:[%s179_s26 + $0x20] sm:$0xff] (!%p171_p9)  ;;  %v206_v26 = vld [vmem:[%s179_s26 + $0x28] sm:$0xff] (!%p171_p9) }
  0x21   : > { %v207_v29 = vld [vmem:[%s179_s26 + $0x30] sm:$0xff] (!%p171_p9)  ;;  %v208_v30 = vld [vmem:[%s179_s26 + $0x38] sm:$0xff] (!%p171_p9) }
  0x22   : > { %230 = vperm.xlu1 (!%p171_p9), %486, %v212_v11   ;;  %220 = vperm.xlu0 (!%p171_p9), %485, %v210_v12  }
  0x24   : > { %s459_s28 = sshll.u32 (%p562_p5), %s435_s15, 3 }
  0x25   : > { %s334_s4 = scalar_lea.vmem (%p562_p5), %s619_s3, %s459_s28 }
  0x26   : > { %252 = vperm.xlu1 %486, %v242_v13   ;;  %247 = vperm.xlu0 %485, %v241_v14  }
  0x2a   : > { %262 = vperm.xlu1 %486, %v244_v15   ;;  %257 = vperm.xlu0 %485, %v243_v16  }
  0x9d   : > { %v226_v17 = vpop.permute.xlu1 %225  ;;  %v216_v18 = vpop.permute.xlu0 %215 }
  0x9e   : > { %v233_v27 = vmul.f32 %v216_v18, %v201_v19  ;;  %v234_v28 = vmul.f32 %v216_v18, %v202_v20  ;;  %v237_v39 = vmul.f32 %v226_v17, %v205_v25  ;;  %v238_v40 = vmul.f32 %v226_v17, %v206_v26 }
  0xa1   : > { %v231_v21 = vpop.permute.xlu1 %230  ;;  %v221_v22 = vpop.permute.xlu0 %220 }
  0xa2   : > { %v235_v31 = vmul.f32 %v221_v22, %v203_v23  ;;  %v236_v32 = vmul.f32 %v221_v22, %v204_v24  ;;  %v239_v41 = vmul.f32 %v231_v21, %v207_v29  ;;  %v240_v42 = vmul.f32 %v231_v21, %v208_v30 }
  0xa5   : > { %v253_v33 = vpop.permute.xlu1 %252  ;;  %v248_v34 = vpop.permute.xlu0 %247 }
  0xa6   : > { %v267_v35 = vadd.f32 %v253_v33, %v235_v31  ;;  %v268_v36 = vadd.f32 %v253_v33, %v236_v32  ;;  %v265_v37 = vadd.f32 %v248_v34, %v233_v27  ;;  %v266_v38 = vadd.f32 %v248_v34, %v234_v28 }
  0xa8   : > { %vm275_vm0 = vcmp.ge.f32.partialorder %v267_v35, 0.0  ;;  %vm276_vm1 = vcmp.ge.f32.partialorder %v268_v36, 0.0  ;;  %v283_v43 = vmul.f32 0.2, %v267_v35  ;;  %v284_v44 = vmul.f32 0.2, %v268_v36 }
  0xa9   : > { %vm273_vm2 = vcmp.ge.f32.partialorder %v265_v37, 0.0  ;;  %vm274_vm3 = vcmp.ge.f32.partialorder %v266_v38, 0.0  ;;  %v281_v45 = vmul.f32 0.2, %v265_v37  ;;  %v282_v46 = vmul.f32 0.2, %v266_v38  ;;  %v263_v47 = vpop.permute.xlu1 %262  ;;  %v258_v48 = vpop.permute.xlu0 %257 }
  0xaa   : > { %v291_v49 = vsel %vm275_vm0, %v267_v35, %v283_v43  ;;  %v292_v50 = vsel %vm276_vm1, %v268_v36, %v284_v44  ;;  %v271_v51 = vadd.f32 %v263_v47, %v239_v41  ;;  %v272_v52 = vadd.f32 %v263_v47, %v240_v42 }
  0xab   : > { %v456_v53 = vpack.c.bf16 %v292_v50, %v291_v49  ;;  %v289_v54 = vsel %vm273_vm2, %v265_v37, %v281_v45  ;;  %v290_v55 = vsel %vm274_vm3, %v266_v38, %v282_v46  ;;  %v269_v56 = vadd.f32 %v258_v48, %v237_v39 }
  0xac   : > { %v455_v57 = vpack.c.bf16 %v290_v55, %v289_v54  ;;  %vm279_vm4 = vcmp.ge.f32.partialorder %v271_v51, 0.0  ;;  %vm280_vm5 = vcmp.ge.f32.partialorder %v272_v52, 0.0  ;;  %v287_v58 = vmul.f32 0.2, %v271_v51 }
  0xad   : > { %322 = vst [vmem:[%s198_s27 + $0x8] sm:$0xff] %v456_v53  ;;  %v288_v59 = vmul.f32 0.2, %v272_v52  ;;  %v270_v60 = vadd.f32 %v258_v48, %v238_v40  ;;  %vm277_vm6 = vcmp.ge.f32.partialorder %v269_v56, 0.0  ;;  %v285_v61 = vmul.f32 0.2, %v269_v56 }
  0xae   : > { %321 = vst [vmem:[%s198_s27] sm:$0xff] %v455_v57  ;;  %v295_v62 = vsel %vm279_vm4, %v271_v51, %v287_v58  ;;  %331 = sbr.rel (!%p562_p5) target bundleno = 189 (0xbd), region = 59 }
  0xaf   : > { %v296_v63 = vsel %vm280_vm5, %v272_v52, %v288_v59  ;;  %vm278_vm7 = vcmp.ge.f32.partialorder %v270_v60, 0.0  ;;  %v286_v0 = vmul.f32 0.2, %v270_v60  ;;  %v293_v1 = vsel %vm277_vm6, %v269_v56, %v285_v61 }
  0xb0   : > { %v458_v2 = vpack.c.bf16 %v296_v63, %v295_v62 }
  0xb1   : > { %v294_v3 = vsel %vm278_vm7, %v270_v60, %v286_v0 }
  0xb2   : > { %324 = vst [vmem:[%s198_s27 + $0x18] sm:$0xff] %v458_v2  ;;  %v457_v4 = vpack.c.bf16 %v294_v3, %v293_v1 }
  0xb4   : > { %323 = vst [vmem:[%s198_s27 + $0x10] sm:$0xff] %v457_v4  ;;  %v370_v6 = vld [vmem:[%s198_s27 + $0x8] sm:$0xff] (%p562_p5) }
  0xb5   : > { %v368_v5 = vld [vmem:[%s198_s27] sm:$0xff]  ;;  %371 = vst [vmem:[%s334_s4 + $0x10] sm:$0xff] %v370_v6 }
  0xb6   : > { %369 = vst [vmem:[%s334_s4] sm:$0xff] %v368_v5 }
  0xb9   : > { %v374_v8 = vld [vmem:[%s198_s27 + $0x18] sm:$0xff] }
  0xba   : > { %375 = vst [vmem:[%s334_s4 + $0x30] sm:$0xff] %v374_v8 }
  0xbb   : > { %v372_v7 = vld [vmem:[%s198_s27 + $0x10] sm:$0xff] }
  0xbc   : > { %373 = vst [vmem:[%s334_s4 + $0x20] sm:$0xff] %v372_v7 }
  0xbd PF: > { %p10_p10 = scmp.ge.s32.totalorder %s549_s16, 4   ;;  %s621_s12 = smov %s505_s13 }
  0xbe   : > { %s622_s13 = smov %s560_s19  ;;  %s623_s14 = smov %s549_s16 }
  0xbf   :  { %12 = sbr.rel (!%p10_p10) target bundleno = 2 (0x2), region = 128 }

// kernel: discriminator_forward.14
= control target key start
LH: loop header
LB: loop body
LE: loop exit
PB: predicated region body
PF: predicated region fallthrough
CT: control target
= control target key end

     0   :  { %v802_v1 = vmov 0   ;;  %vm19_vm0 = vcmask 801792   ;;  %v803_v57 = vmov 0.0   ;;  %s1040_s1 = inlined_call_operand.vmem [shape: bf16[512,98], index: 1, kind: input, shape index: {}]   ;;  %s1041_s0 = inlined_call_operand.vmem [shape: bf16[64,512], index: 0, kind: input, shape index: {}]   ;;  %s1042_s2 = inlined_call_operand.vmem [shape: f32[64,1], index: 2, kind: input, shape index: {}]   ;;  %s1043_s3 = inlined_call_operand.vmem [shape: f32[64,98], index: 3, kind: output, shape index: {}]  }
   0x1   :  { %v746_v0 = vld [vmem:[%s1040_s1 + $0x40] sm:$0xff]   ;;  %744 = vset.pattern.permute.xlu0 %v802_v1  ;;  %745 = vset.pattern.permute.xlu1 %v802_v1  ;;  %v750_v5 = vld [vmem:[%s1040_s1 + $0x48] sm:$0xff]   ;;  %v754_v9 = vld [vmem:[%s1040_s1 + $0x50] sm:$0xff]   ;;  %20 = vst.msk [vmem:[#allocation2] sm:$0xff] %vm19_vm0, %v803_v57 }
   0x2   :  { %v747_v2 = vld [vmem:[%s1040_s1 + $0xc0] sm:$0xff]   ;;  %662 = vmatprep.subr.bf16.mxu0 %v746_v0  ;;  %v751_v6 = vld [vmem:[%s1040_s1 + $0xc8] sm:$0xff]   ;;  %v755_v10 = vld [vmem:[%s1040_s1 + $0xd0] sm:$0xff]   ;;  %21 = vst.msk [vmem:[#allocation2 + $0x8] sm:$0xff] %vm19_vm0, %v803_v57 }
   0x3   :  { %v748_v3 = vld [vmem:[%s1040_s1] sm:$0xff]   ;;  %702 = vmatprep.subr.bf16.mxu1 %v747_v2  ;;  %v752_v7 = vld [vmem:[%s1040_s1 + $0x8] sm:$0xff]   ;;  %v756_v11 = vld [vmem:[%s1040_s1 + $0x10] sm:$0xff]   ;;  %22 = vst.msk [vmem:[#allocation2 + $0x10] sm:$0xff] %vm19_vm0, %v803_v57 }
   0x4   :  { %v749_v4 = vld [vmem:[%s1040_s1 + $0x80] sm:$0xff]   ;;  %663 = vmatpush3.bf16.msra.mxu0 %v748_v3  ;;  %v753_v8 = vld [vmem:[%s1040_s1 + $0x88] sm:$0xff]   ;;  %v757_v12 = vld [vmem:[%s1040_s1 + $0x90] sm:$0xff]   ;;  %23 = vst.msk [vmem:[#allocation2 + $0x18] sm:$0xff] %vm19_vm0, %v803_v57 }
   0x5   :  { %703 = vmatpush3.bf16.msra.mxu1 %v749_v4  ;;  %664 = vmatprep.subr.bf16.mxu0 %v750_v5  ;;  %v758_v13 = vld [vmem:[%s1040_s1 + $0x58] sm:$0xff]   ;;  %v762_v17 = vld [vmem:[%s1040_s1 + $0x60] sm:$0xff]   ;;  %v766_v21 = vld [vmem:[%s1040_s1 + $0x68] sm:$0xff]   ;;  %24 = vst.msk [vmem:[#allocation2 + $0x20] sm:$0xff] %vm19_vm0, %v803_v57 }
   0x6   :  { %704 = vmatprep.subr.bf16.mxu1 %v751_v6  ;;  %v759_v14 = vld [vmem:[%s1040_s1 + $0xd8] sm:$0xff]   ;;  %v763_v18 = vld [vmem:[%s1040_s1 + $0xe0] sm:$0xff]   ;;  %v767_v22 = vld [vmem:[%s1040_s1 + $0xe8] sm:$0xff]   ;;  %25 = vst.msk [vmem:[#allocation2 + $0x28] sm:$0xff] %vm19_vm0, %v803_v57 }
   0x7   :  { %v760_v15 = vld [vmem:[%s1040_s1 + $0x18] sm:$0xff]   ;;  %v764_v19 = vld [vmem:[%s1040_s1 + $0x20] sm:$0xff]   ;;  %v768_v23 = vld [vmem:[%s1040_s1 + $0x28] sm:$0xff]   ;;  %26 = vst.msk [vmem:[#allocation2 + $0x30] sm:$0xff] %vm19_vm0, %v803_v57 }
   0x8   :  { %665 = vmatpush3.bf16.msra.mxu0 %v752_v7  ;;  %v761_v16 = vld [vmem:[%s1040_s1 + $0x98] sm:$0xff]   ;;  %v765_v20 = vld [vmem:[%s1040_s1 + $0xa0] sm:$0xff]   ;;  %v769_v24 = vld [vmem:[%s1040_s1 + $0xa8] sm:$0xff]   ;;  %27 = vst.msk [vmem:[#allocation2 + $0x38] sm:$0xff] %vm19_vm0, %v803_v57 }
   0x9   :  { %705 = vmatpush3.bf16.msra.mxu1 %v753_v8  ;;  %666 = vmatprep.subr.bf16.mxu0 %v754_v9  ;;  %v770_v25 = vld [vmem:[%s1040_s1 + $0x70] sm:$0xff]   ;;  %v774_v29 = vld [vmem:[%s1040_s1 + $0x78] sm:$0xff]   ;;  %v546_v43 = vld [vmem:[%s1042_s2] sm:$0xff] }
   0xa   :  { %706 = vmatprep.subr.bf16.mxu1 %v755_v10  ;;  %v771_v26 = vld [vmem:[%s1040_s1 + $0xf0] sm:$0xff]   ;;  %v775_v30 = vld [vmem:[%s1040_s1 + $0xf8] sm:$0xff]   ;;  %556 = vperm.xlu0 %744, %v546_v43   ;;  %v547_v45 = vld [vmem:[%s1042_s2 + $0x8] sm:$0xff] }
   0xb   :  { %v772_v27 = vld [vmem:[%s1040_s1 + $0x30] sm:$0xff]   ;;  %v776_v31 = vld [vmem:[%s1040_s1 + $0x38] sm:$0xff]   ;;  %v550_v48 = vld [vmem:[%s1042_s2 + $0x20] sm:$0xff] }
   0xc   :  { %667 = vmatpush3.bf16.msra.mxu0 %v756_v11  ;;  %v773_v28 = vld [vmem:[%s1040_s1 + $0xb0] sm:$0xff]   ;;  %v777_v32 = vld [vmem:[%s1040_s1 + $0xb8] sm:$0xff]   ;;  %v551_v51 = vld [vmem:[%s1042_s2 + $0x28] sm:$0xff] }
   0xd   :  { %707 = vmatpush3.bf16.msra.mxu1 %v757_v12  ;;  %668 = vmatprep.subr.bf16.mxu0 %v758_v13  ;;  %v778_v33 = vld [vmem:[%s1041_s0] ss:$16 sps:$4 sm:$0xff]   ;;  %v780_v34 = vld [vmem:[%s1041_s0 + $0x4] ss:$16 sps:$4 sm:$0xff]   ;;  %v781_v35 = vld [vmem:[%s1041_s0 + $0x8] ss:$16 sps:$4 sm:$0xff]  }
   0xe   :  { %708 = vmatprep.subr.bf16.mxu1 %v759_v14  ;;  %v783_v36 = vld [vmem:[%s1041_s0 + $0xc] ss:$16 sps:$4 sm:$0xff]   ;;  %420 = vmatprep.mubr.bf16.mxu0 %v780_v34  ;;  %v784_v37 = vld [vmem:[%s1041_s0 + $0x24] ss:$16 sps:$4 sm:$0xff]   ;;  %v788_v39 = vld [vmem:[%s1041_s0 + $0x20] ss:$16 sps:$4 sm:$0xff]  }
   0xf   :  { %485 = vmatprep.mubr.bf16.mxu1 %v783_v36  ;;  %v786_v38 = vld [vmem:[%s1041_s0 + $0x2c] ss:$16 sps:$4 sm:$0xff]   ;;  %v789_v40 = vld [vmem:[%s1041_s0 + $0x28] ss:$16 sps:$4 sm:$0xff]   ;;  %v790_v41 = vld [vmem:[%s1041_s0 + $0x44] ss:$16 sps:$4 sm:$0xff]   ;;  %561 = vperm.xlu0 %744, %v547_v45  }
  0x10   :  { %669 = vmatpush3.bf16.msra.mxu0 %v760_v15  ;;  %v792_v42 = vld [vmem:[%s1041_s0 + $0x4c] ss:$16 sps:$4 sm:$0xff]   ;;  %v548_v44 = vld [vmem:[%s1042_s2 + $0x10] sm:$0xff]  ;;  %v795_v49 = vld [vmem:[%s1041_s0 + $0x48] ss:$16 sps:$4 sm:$0xff]  }
  0x11   :  { %709 = vmatpush3.bf16.msra.mxu1 %v761_v16  ;;  %670 = vmatprep.subr.bf16.mxu0 %v762_v17  ;;  %v549_v46 = vld [vmem:[%s1042_s2 + $0x18] sm:$0xff]  ;;  %v794_v47 = vld [vmem:[%s1041_s0 + $0x40] ss:$16 sps:$4 sm:$0xff]   ;;  %v796_v50 = vld [vmem:[%s1041_s0 + $0x64] ss:$16 sps:$4 sm:$0xff]  }
  0x12   :  { %710 = vmatprep.subr.bf16.mxu1 %v763_v18  ;;  %566 = vperm.xlu1 %745, %v548_v44   ;;  %v798_v52 = vld [vmem:[%s1041_s0 + $0x6c] ss:$16 sps:$4 sm:$0xff]   ;;  %v552_v53 = vld [vmem:[%s1042_s2 + $0x30] sm:$0xff]  ;;  %v801_v56 = vld [vmem:[%s1041_s0 + $0x68] ss:$16 sps:$4 sm:$0xff]  }
  0x13   :  { %576 = vperm.xlu0 %744, %v550_v48   ;;  %v553_v54 = vld [vmem:[%s1042_s2 + $0x38] sm:$0xff]  ;;  %v800_v55 = vld [vmem:[%s1041_s0 + $0x60] ss:$16 sps:$4 sm:$0xff]   ;;  %v29_v8 = vld [vmem:[#allocation2 + $0x8] sm:$0xff] }
  0x14   :  { %671 = vmatpush3.bf16.msra.mxu0 %v764_v19  ;;  %v28_v3 = vld [vmem:[#allocation2] sm:$0xff] }
  0x15   :  { %711 = vmatpush3.bf16.msra.mxu1 %v765_v20  ;;  %672 = vmatprep.subr.bf16.mxu0 %v766_v21 }
  0x16   :  { %712 = vmatprep.subr.bf16.mxu1 %v767_v22  ;;  %571 = vperm.xlu1 %745, %v549_v46   ;;  %v30_v22 = vld [vmem:[#allocation2 + $0x10] sm:$0xff]  ;;  %v32_v46 = vld [vmem:[#allocation2 + $0x20] sm:$0xff] }
  0x17   :  { %586 = vperm.xlu0 %744, %v552_v53  }
  0x18   :  { %673 = vmatpush3.bf16.msra.mxu0 %v768_v23 }
  0x19   :  { %713 = vmatpush3.bf16.msra.mxu1 %v769_v24  ;;  %674 = vmatprep.subr.bf16.mxu0 %v770_v25 }
  0x1a   :  { %714 = vmatprep.subr.bf16.mxu1 %v771_v26  ;;  %581 = vperm.xlu1 %745, %v551_v51   ;;  %v33_v51 = vld [vmem:[#allocation2 + $0x28] sm:$0xff] }
  0x1c   :  { %675 = vmatpush3.bf16.msra.mxu0 %v772_v27  ;;  %v31_v27 = vld [vmem:[#allocation2 + $0x18] sm:$0xff] }
  0x1d   :  { %715 = vmatpush3.bf16.msra.mxu1 %v773_v28  ;;  %676 = vmatprep.subr.bf16.mxu0 %v774_v29 }
  0x1e   :  { %716 = vmatprep.subr.bf16.mxu1 %v775_v30  ;;  %591 = vperm.xlu1 %745, %v553_v54  }
  0x20   :  { %677 = vmatpush3.bf16.msra.mxu0 %v776_v31 }
  0x21   :  { %717 = vmatpush3.bf16.msra.mxu1 %v777_v32 }
  0x23   :  { %421 = vmatmul.mubr.bf16.vlgmr.msra.gmra.mrb[0].mxu0 %v778_v33 }
  0x24   :  { %486 = vmatmul.mubr.bf16.vlgmr.msra.gmra.mrb[0].mxu1 %v781_v35  ;;  %428 = vmatprep.mubr.bf16.mxu0 %v784_v37 }
  0x25   :  { %493 = vmatprep.mubr.bf16.mxu1 %v786_v38 }
  0x2b   :  { %429 = vmatmul.mubr.bf16.gmra.mrb[4].mxu0 %v788_v39 }
  0x2c   :  { %494 = vmatmul.mubr.bf16.gmra.mrb[4].mxu1 %v789_v40  ;;  %436 = vmatprep.mubr.bf16.mxu0 %v790_v41 }
  0x2d   :  { %501 = vmatprep.mubr.bf16.mxu1 %v792_v42 }
  0x33   :  { %437 = vmatmul.mubr.bf16.gmra.mrb[8].mxu0 %v794_v47 }
  0x34   :  { %502 = vmatmul.mubr.bf16.gmra.mrb[8].mxu1 %v795_v49  ;;  %444 = vmatprep.mubr.bf16.mxu0 %v796_v50 }
  0x35   :  { %509 = vmatprep.mubr.bf16.mxu1 %v798_v52 }
  0x3b   :  { %445 = vmatmul.mubr.bf16.gmra.mrb[12].mxu0 %v800_v55 }
  0x3c   :  { %510 = vmatmul.mubr.bf16.gmra.mrb[12].mxu1 %v801_v56 }
  0x89   :  { %v557_v12 = vpop.permute.xlu0 %556 }
  0x8e   :  { %v562_v33 = vpop.permute.xlu0 %561 }
  0x91   :  { %v567_v30 = vpop.permute.xlu1 %566 }
  0x95   :  { %v572_v55 = vpop.permute.xlu1 %571 }
  0xf6   :  { %v678_v58 = vpop.f32.mrb[0].mxu0 }
  0xf7   :  { %v718_v59 = vpop.f32.mrb[0].mxu1  ;;  %v679_v60 = vpop.f32.mrb[1].mxu0 }
  0xf8   :  { %v680_v61 = vadd.f32 %v679_v60, %v678_v58  ;;  %v719_v62 = vpop.f32.mrb[1].mxu1  ;;  %v681_v63 = vpop.f32.mrb[2].mxu0 }
  0xf9   :  { %v720_v0 = vadd.f32 %v719_v62, %v718_v59  ;;  %v721_v1 = vpop.f32.mrb[2].mxu1  ;;  %v682_v2 = vpop.f32.mrb[3].mxu0 }
  0xfa   :  { %v683_v4 = vadd.f32 %v682_v2, %v681_v63  ;;  %v722_v5 = vpop.f32.mrb[3].mxu1 }
  0xfb   :  { %v488_v6 = vadd.f32 %v720_v0, %v680_v61  ;;  %v723_v7 = vadd.f32 %v722_v5, %v721_v1  ;;  %v34_v5 = vld [vmem:[#allocation2 + $0x30] sm:$0xff] }
  0xfd   :  { %v518_v9 = vadd.f32 %v488_v6, %v28_v3  ;;  %v491_v10 = vadd.f32 %v723_v7, %v683_v4 }
  0xfe   :  { %v684_v11 = vpop.f32.mrb[4].mxu0 }
  0xff   :  { %527 = vst.msk [vmem:[#allocation2] sm:$0xff] %vm19_vm0, %v518_v9  ;;  %v519_v13 = vadd.f32 %v491_v10, %v29_v8  ;;  %v724_v14 = vpop.f32.mrb[4].mxu1  ;;  %v685_v15 = vpop.f32.mrb[5].mxu0  ;;  %v35_v10 = vld [vmem:[#allocation2 + $0x38] sm:$0xff] }
 0x100   :  { %v686_v16 = vadd.f32 %v685_v15, %v684_v11  ;;  %v725_v17 = vpop.f32.mrb[5].mxu1  ;;  %v687_v18 = vpop.f32.mrb[6].mxu0 }
 0x101   :  { %528 = vst.msk [vmem:[#allocation2 + $0x8] sm:$0xff] %vm19_vm0, %v519_v13  ;;  %v726_v19 = vadd.f32 %v725_v17, %v724_v14  ;;  %v727_v20 = vpop.f32.mrb[6].mxu1  ;;  %v688_v21 = vpop.f32.mrb[7].mxu0 }
 0x102   :  { %v689_v23 = vadd.f32 %v688_v21, %v687_v18  ;;  %v728_v24 = vpop.f32.mrb[7].mxu1  ;;  %v577_v13 = vpop.permute.xlu0 %576 }
 0x103   :  { %v496_v25 = vadd.f32 %v726_v19, %v686_v16  ;;  %v729_v26 = vadd.f32 %v728_v24, %v727_v20  ;;  %v582_v17 = vpop.permute.xlu1 %581 }
 0x105   :  { %v520_v28 = vadd.f32 %v496_v25, %v30_v22  ;;  %v499_v29 = vadd.f32 %v729_v26, %v689_v23 }
 0x106   :  { %v538_v31 = vld [vmem:[#allocation2] sm:$0xff]  ;;  %v690_v32 = vpop.f32.mrb[8].mxu0  ;;  %v587_v20 = vpop.permute.xlu0 %586 }
 0x107   :  { %529 = vst.msk [vmem:[#allocation2 + $0x10] sm:$0xff] %vm19_vm0, %v520_v28  ;;  %v521_v34 = vadd.f32 %v499_v29, %v31_v27  ;;  %v594_v35 = vadd.f32 %v557_v12, %v538_v31  ;;  %v730_v36 = vpop.f32.mrb[8].mxu1  ;;  %v691_v37 = vpop.f32.mrb[9].mxu0 }
 0x108   :  { %v539_v38 = vld [vmem:[#allocation2 + $0x8] sm:$0xff]  ;;  %v692_v39 = vadd.f32 %v691_v37, %v690_v32  ;;  %v731_v40 = vpop.f32.mrb[9].mxu1  ;;  %v693_v41 = vpop.f32.mrb[10].mxu0 }
 0x109   :  { %530 = vst.msk [vmem:[#allocation2 + $0x18] sm:$0xff] %vm19_vm0, %v521_v34  ;;  %602 = vst.msk [vmem:[%s1043_s3] sm:$0xff] %vm19_vm0, %v594_v35  ;;  %v595_v42 = vadd.f32 %v562_v33, %v539_v38  ;;  %v732_v43 = vadd.f32 %v731_v40, %v730_v36  ;;  %v733_v44 = vpop.f32.mrb[10].mxu1  ;;  %v694_v45 = vpop.f32.mrb[11].mxu0 }
 0x10a   :  { %v695_v47 = vadd.f32 %v694_v45, %v693_v41  ;;  %v734_v48 = vpop.f32.mrb[11].mxu1  ;;  %v592_v23 = vpop.permute.xlu1 %591 }
 0x10b   :  { %603 = vst.msk [vmem:[%s1043_s3 + $0x8] sm:$0xff] %vm19_vm0, %v595_v42  ;;  %v504_v49 = vadd.f32 %v732_v43, %v692_v39  ;;  %v735_v50 = vadd.f32 %v734_v48, %v733_v44 }
 0x10d   :  { %v522_v52 = vadd.f32 %v504_v49, %v32_v46  ;;  %v507_v53 = vadd.f32 %v735_v50, %v695_v47 }
 0x10e   :  { %v540_v54 = vld [vmem:[#allocation2 + $0x10] sm:$0xff]  ;;  %v696_v56 = vpop.f32.mrb[12].mxu0 }
 0x10f   :  { %v596_v57 = vadd.f32 %v567_v30, %v540_v54  ;;  %531 = vst.msk [vmem:[#allocation2 + $0x20] sm:$0xff] %vm19_vm0, %v522_v52  ;;  %v523_v58 = vadd.f32 %v507_v53, %v33_v51  ;;  %v736_v59 = vpop.f32.mrb[12].mxu1  ;;  %v697_v60 = vpop.f32.mrb[13].mxu0 }
 0x110   :  { %v541_v61 = vld [vmem:[#allocation2 + $0x18] sm:$0xff]  ;;  %v698_v62 = vadd.f32 %v697_v60, %v696_v56  ;;  %v737_v63 = vpop.f32.mrb[13].mxu1  ;;  %v699_v0 = vpop.f32.mrb[14].mxu0 }
 0x111   :  { %604 = vst.msk [vmem:[%s1043_s3 + $0x10] sm:$0xff] %vm19_vm0, %v596_v57  ;;  %532 = vst.msk [vmem:[#allocation2 + $0x28] sm:$0xff] %vm19_vm0, %v523_v58  ;;  %v597_v1 = vadd.f32 %v572_v55, %v541_v61  ;;  %v738_v2 = vadd.f32 %v737_v63, %v736_v59  ;;  %v739_v3 = vpop.f32.mrb[14].mxu1  ;;  %v700_v4 = vpop.f32.mrb[15].mxu0 }
 0x112   :  { %v701_v6 = vadd.f32 %v700_v4, %v699_v0  ;;  %v740_v7 = vpop.f32.mrb[15].mxu1 }
 0x113   :  { %605 = vst.msk [vmem:[%s1043_s3 + $0x18] sm:$0xff] %vm19_vm0, %v597_v1  ;;  %v512_v8 = vadd.f32 %v738_v2, %v698_v62  ;;  %v741_v9 = vadd.f32 %v740_v7, %v739_v3 }
 0x115   :  { %v524_v11 = vadd.f32 %v512_v8, %v34_v5  ;;  %v515_v12 = vadd.f32 %v741_v9, %v701_v6 }
 0x116   :  { %v542_v14 = vld [vmem:[#allocation2 + $0x20] sm:$0xff] }
 0x117   :  { %v598_v15 = vadd.f32 %v577_v13, %v542_v14  ;;  %533 = vst.msk [vmem:[#allocation2 + $0x30] sm:$0xff] %vm19_vm0, %v524_v11  ;;  %v525_v16 = vadd.f32 %v515_v12, %v35_v10 }
 0x118   :  { %v543_v18 = vld [vmem:[#allocation2 + $0x28] sm:$0xff] }
 0x119   :  { %v599_v19 = vadd.f32 %v582_v17, %v543_v18  ;;  %606 = vst.msk [vmem:[%s1043_s3 + $0x20] sm:$0xff] %vm19_vm0, %v598_v15  ;;  %534 = vst.msk [vmem:[#allocation2 + $0x38] sm:$0xff] %vm19_vm0, %v525_v16 }
 0x11b   :  { %607 = vst.msk [vmem:[%s1043_s3 + $0x28] sm:$0xff] %vm19_vm0, %v599_v19 }
 0x11e   :  { %v544_v21 = vld [vmem:[#allocation2 + $0x30] sm:$0xff] }
 0x11f   :  { %v600_v22 = vadd.f32 %v587_v20, %v544_v21 }
 0x120   :  { %v545_v24 = vld [vmem:[#allocation2 + $0x38] sm:$0xff] }
 0x121   :  { %v601_v25 = vadd.f32 %v592_v23, %v545_v24  ;;  %608 = vst.msk [vmem:[%s1043_s3 + $0x30] sm:$0xff] %vm19_vm0, %v600_v22 }
 0x123   :  { %609 = vst.msk [vmem:[%s1043_s3 + $0x38] sm:$0xff] %vm19_vm0, %v601_v25 }

// kernel: discriminator_forward.15
= control target key start
LH: loop header
LB: loop body
LE: loop exit
PB: predicated region body
PF: predicated region fallthrough
CT: control target
= control target key end

     0   :  { %vm53_vm0 = vcmask 801792   ;;  %vm20_vm1 = vcmask 7168   ;;  %v307_v3 = vmov 0.0   ;;  %s557_s0 = inlined_call_operand.vmem [shape: f32[64,98], index: 0, kind: input, shape index: {}]   ;;  %s558_s1 = inlined_call_operand.vmem [shape: f32[64,1], index: 1, kind: input, shape index: {}]   ;;  %s559_s2 = inlined_call_operand.vmem [shape: f32[64,1], index: 2, kind: input, shape index: {}]   ;;  %s560_s3 = inlined_call_operand.vmem [shape: f32[64,1], index: 3, kind: output, shape index: {0}]   ;;  %s561_s4 = inlined_call_operand.vmem [shape: f32[64,1], index: 4, kind: output, shape index: {1}]  }
   0x1   :  { %v39_v0 = vld [vmem:[%s557_s0 + $0x10] sm:$0xff]  ;;  %v37_v1 = vld [vmem:[%s557_s0] sm:$0xff]  ;;  %v40_v2 = vld [vmem:[%s557_s0 + $0x18] sm:$0xff]  ;;  %23 = vst.msk [vmem:[#allocation2 + $0x10] sm:$0xff] %vm20_vm1, %v307_v3 }
   0x2   :  { %21 = vst.msk [vmem:[#allocation2] sm:$0xff] %vm20_vm1, %v307_v3  ;;  %22 = vst.msk [vmem:[#allocation2 + $0x8] sm:$0xff] %vm20_vm1, %v307_v3  ;;  %v60_v4 = vsel %vm53_vm0, %v39_v0, 0.0  ;;  %v54_v5 = vsel %vm53_vm0, %v37_v1, 0.0  ;;  %v38_v6 = vld [vmem:[%s557_s0 + $0x8] sm:$0xff]  ;;  %v63_v7 = vsel %vm53_vm0, %v40_v2, 0.0  ;;  %v103_v15 = vmul.f32 %v37_v1, %v37_v1 }
   0x3   :  { %24 = vst.msk [vmem:[#allocation2 + $0x18] sm:$0xff] %vm20_vm1, %v307_v3  ;;  %25 = vst.msk [vmem:[#allocation2 + $0x20] sm:$0xff] %vm20_vm1, %v307_v3  ;;  %61 = vadd.xlane.f32.xlu1 %v60_v4  ;;  %55 = vadd.xlane.f32.xlu0 %v54_v5  ;;  %v57_v8 = vsel %vm53_vm0, %v38_v6, 0.0  ;;  %v42_v9 = vld [vmem:[%s557_s0 + $0x28] sm:$0xff]  ;;  %v41_v10 = vld [vmem:[%s557_s0 + $0x20] sm:$0xff]  ;;  %v104_v18 = vmul.f32 %v38_v6, %v38_v6  ;;  %v105_v19 = vmul.f32 %v39_v0, %v39_v0 }
   0x4   :  { %26 = vst.msk [vmem:[#allocation2 + $0x28] sm:$0xff] %vm20_vm1, %v307_v3  ;;  %27 = vst.msk [vmem:[#allocation2 + $0x30] sm:$0xff] %vm20_vm1, %v307_v3  ;;  %v69_v11 = vsel %vm53_vm0, %v42_v9, 0.0  ;;  %v66_v12 = vsel %vm53_vm0, %v41_v10, 0.0  ;;  %v44_v13 = vld [vmem:[%s557_s0 + $0x38] sm:$0xff]  ;;  %v43_v14 = vld [vmem:[%s557_s0 + $0x30] sm:$0xff]  ;;  %v106_v22 = vmul.f32 %v40_v2, %v40_v2  ;;  %v108_v25 = vmul.f32 %v42_v9, %v42_v9 }
   0x5   :  { %28 = vst.msk [vmem:[#allocation2 + $0x38] sm:$0xff] %vm20_vm1, %v307_v3  ;;  %29 = vst.msk [vmem:[#allocation3] sm:$0xff] %vm20_vm1, %v307_v3  ;;  %v75_v16 = vsel %vm53_vm0, %v44_v13, 0.0  ;;  %v72_v17 = vsel %vm53_vm0, %v43_v14, 0.0  ;;  %v114_v20 = vsel %vm53_vm0, %v104_v18, 0.0  ;;  %v111_v21 = vsel %vm53_vm0, %v103_v15, 0.0 }
   0x6   :  { %30 = vst.msk [vmem:[#allocation3 + $0x8] sm:$0xff] %vm20_vm1, %v307_v3  ;;  %31 = vst.msk [vmem:[#allocation3 + $0x10] sm:$0xff] %vm20_vm1, %v307_v3  ;;  %v120_v23 = vsel %vm53_vm0, %v106_v22, 0.0  ;;  %v117_v24 = vsel %vm53_vm0, %v105_v19, 0.0  ;;  %v107_v26 = vmul.f32 %v41_v10, %v41_v10  ;;  %v126_v27 = vsel %vm53_vm0, %v108_v25, 0.0 }
   0x7   :  { %32 = vst.msk [vmem:[#allocation3 + $0x18] sm:$0xff] %vm20_vm1, %v307_v3  ;;  %33 = vst.msk [vmem:[#allocation3 + $0x20] sm:$0xff] %vm20_vm1, %v307_v3  ;;  %64 = vadd.xlane.f32.xlu1 %v63_v7  ;;  %58 = vadd.xlane.f32.xlu0 %v57_v8  ;;  %v110_v29 = vmul.f32 %v44_v13, %v44_v13  ;;  %v109_v30 = vmul.f32 %v43_v14, %v43_v14 }
   0x8   :  { %34 = vst.msk [vmem:[#allocation3 + $0x28] sm:$0xff] %vm20_vm1, %v307_v3  ;;  %35 = vst.msk [vmem:[#allocation3 + $0x30] sm:$0xff] %vm20_vm1, %v307_v3  ;;  %v123_v28 = vsel %vm53_vm0, %v107_v26, 0.0  ;;  %v47_v33 = vld [vmem:[#allocation2 + $0x10] sm:$0xff] }
   0x9   :  { %36 = vst.msk [vmem:[#allocation3 + $0x38] sm:$0xff] %vm20_vm1, %v307_v3  ;;  %v132_v31 = vsel %vm53_vm0, %v110_v29, 0.0  ;;  %v129_v32 = vsel %vm53_vm0, %v109_v30, 0.0  ;;  %v45_v34 = vld [vmem:[#allocation2] sm:$0xff]  ;;  %v46_v40 = vld [vmem:[#allocation2 + $0x8] sm:$0xff] }
   0xa   :  { %v48_v39 = vld [vmem:[#allocation2 + $0x18] sm:$0xff]  ;;  %v49_v46 = vld [vmem:[#allocation2 + $0x20] sm:$0xff] }
   0xb   :  { %70 = vadd.xlane.f32.xlu1 %v69_v11  ;;  %67 = vadd.xlane.f32.xlu0 %v66_v12  ;;  %v50_v45 = vld [vmem:[#allocation2 + $0x28] sm:$0xff]  ;;  %v51_v52 = vld [vmem:[#allocation2 + $0x30] sm:$0xff] }
   0xc   :  { %v52_v51 = vld [vmem:[#allocation2 + $0x38] sm:$0xff]  ;;  %v95_v58 = vld [vmem:[#allocation3] sm:$0xff] }
   0xd   :  { %v96_v57 = vld [vmem:[#allocation3 + $0x8] sm:$0xff]  ;;  %v97_v0 = vld [vmem:[#allocation3 + $0x10] sm:$0xff] }
   0xe   :  { %v98_v63 = vld [vmem:[#allocation3 + $0x18] sm:$0xff]  ;;  %v99_v8 = vld [vmem:[#allocation3 + $0x20] sm:$0xff] }
   0xf   :  { %76 = vadd.xlane.f32.xlu1 %v75_v16  ;;  %73 = vadd.xlane.f32.xlu0 %v72_v17  ;;  %v100_v7 = vld [vmem:[#allocation3 + $0x28] sm:$0xff]  ;;  %v101_v18 = vld [vmem:[#allocation3 + $0x30] sm:$0xff] }
  0x10   :  { %v102_v17 = vld [vmem:[#allocation3 + $0x38] sm:$0xff] }
  0x13   :  { %115 = vadd.xlane.f32.xlu1 %v114_v20  ;;  %112 = vadd.xlane.f32.xlu0 %v111_v21 }
  0x17   :  { %121 = vadd.xlane.f32.xlu1 %v120_v23  ;;  %118 = vadd.xlane.f32.xlu0 %v117_v24 }
  0x1b   :  { %127 = vadd.xlane.f32.xlu1 %v126_v27  ;;  %124 = vadd.xlane.f32.xlu0 %v123_v28 }
  0x1f   :  { %133 = vadd.xlane.f32.xlu1 %v132_v31  ;;  %130 = vadd.xlane.f32.xlu0 %v129_v32 }
  0x90   :  { %v62_v35 = vpop.xlane.xlu1 %61  ;;  %v56_v36 = vpop.xlane.xlu0 %55 }
  0x91   :  { %v80_v37 = vadd.f32 %v62_v35, %v47_v33  ;;  %v78_v38 = vadd.f32 %v56_v36, %v45_v34 }
  0x93   :  { %89 = vst.msk [vmem:[#allocation2 + $0x10] sm:$0xff] %vm20_vm1, %v80_v37  ;;  %87 = vst.msk [vmem:[#allocation2] sm:$0xff] %vm20_vm1, %v78_v38 }
  0x94   :  { %v65_v41 = vpop.xlane.xlu1 %64  ;;  %v59_v42 = vpop.xlane.xlu0 %58 }
  0x95   :  { %v81_v43 = vadd.f32 %v65_v41, %v48_v39  ;;  %v79_v44 = vadd.f32 %v59_v42, %v46_v40 }
  0x97   :  { %90 = vst.msk [vmem:[#allocation2 + $0x18] sm:$0xff] %vm20_vm1, %v81_v43  ;;  %88 = vst.msk [vmem:[#allocation2 + $0x8] sm:$0xff] %vm20_vm1, %v79_v44 }
  0x98   :  { %v71_v47 = vpop.xlane.xlu1 %70  ;;  %v68_v48 = vpop.xlane.xlu0 %67 }
  0x99   :  { %v83_v49 = vadd.f32 %v71_v47, %v50_v45  ;;  %v82_v50 = vadd.f32 %v68_v48, %v49_v46 }
  0x9a   :  { %v154_v1 = vld [vmem:[#allocation2] sm:$0xff]  ;;  %v156_v9 = vld [vmem:[#allocation2 + $0x10] sm:$0xff] }
  0x9b   :  { %92 = vst.msk [vmem:[#allocation2 + $0x28] sm:$0xff] %vm20_vm1, %v83_v49  ;;  %91 = vst.msk [vmem:[#allocation2 + $0x20] sm:$0xff] %vm20_vm1, %v82_v50  ;;  %v399_v10 = vmul.f32 0.010204081, %v154_v1  ;;  %v405_v19 = vmul.f32 0.010204081, %v156_v9 }
  0x9c   :  { %v77_v53 = vpop.xlane.xlu1 %76  ;;  %v74_v54 = vpop.xlane.xlu0 %73 }
  0x9d   :  { %v85_v55 = vadd.f32 %v77_v53, %v52_v51  ;;  %v84_v56 = vadd.f32 %v74_v54, %v51_v52  ;;  %v186_v23 = vmul.f32 %v399_v10, %v399_v10  ;;  %v188_v36 = vmul.f32 %v405_v19, %v405_v19 }
  0x9e   :  { %v155_v2 = vld [vmem:[#allocation2 + $0x8] sm:$0xff]  ;;  %v157_v11 = vld [vmem:[#allocation2 + $0x18] sm:$0xff] }
  0x9f   :  { %94 = vst.msk [vmem:[#allocation2 + $0x38] sm:$0xff] %vm20_vm1, %v85_v55  ;;  %93 = vst.msk [vmem:[#allocation2 + $0x30] sm:$0xff] %vm20_vm1, %v84_v56  ;;  %v401_v12 = vmul.f32 0.010204081, %v155_v2  ;;  %v407_v20 = vmul.f32 0.010204081, %v157_v11 }
  0xa0   :  { %v116_v59 = vpop.xlane.xlu1 %115  ;;  %v113_v60 = vpop.xlane.xlu0 %112 }
  0xa1   :  { %v136_v61 = vadd.f32 %v116_v59, %v96_v57  ;;  %v135_v62 = vadd.f32 %v113_v60, %v95_v58  ;;  %v187_v24 = vmul.f32 %v401_v12, %v401_v12  ;;  %v189_v37 = vmul.f32 %v407_v20, %v407_v20 }
  0xa2   :  { %v159_v25 = vld [vmem:[#allocation2 + $0x28] sm:$0xff]  ;;  %v158_v30 = vld [vmem:[#allocation2 + $0x20] sm:$0xff] }
  0xa3   :  { %144 = vst.msk [vmem:[#allocation3 + $0x8] sm:$0xff] %vm20_vm1, %v136_v61  ;;  %143 = vst.msk [vmem:[#allocation3] sm:$0xff] %vm20_vm1, %v135_v62  ;;  %v419_v38 = vmul.f32 0.010204081, %v159_v25  ;;  %v423_v46 = vmul.f32 0.010204081, %v158_v30 }
  0xa4   :  { %v122_v3 = vpop.xlane.xlu1 %121  ;;  %v119_v4 = vpop.xlane.xlu0 %118  ;;  %v250_v30 = vld [vmem:[%s559_s2] sm:$0xff] }
  0xa5   :  { %v138_v5 = vadd.f32 %v122_v3, %v98_v63  ;;  %v137_v6 = vadd.f32 %v119_v4, %v97_v0  ;;  %v191_v51 = vmul.f32 %v419_v38, %v419_v38  ;;  %v190_v59 = vmul.f32 %v423_v46, %v423_v46 }
  0xa6   :  { %v161_v31 = vld [vmem:[#allocation2 + $0x38] sm:$0xff]  ;;  %v160_v39 = vld [vmem:[#allocation2 + $0x30] sm:$0xff] }
  0xa7   :  { %146 = vst.msk [vmem:[#allocation3 + $0x18] sm:$0xff] %vm20_vm1, %v138_v5  ;;  %145 = vst.msk [vmem:[#allocation3 + $0x10] sm:$0xff] %vm20_vm1, %v137_v6  ;;  %v427_v52 = vmul.f32 0.010204081, %v161_v31  ;;  %v429_v53 = vmul.f32 0.010204081, %v160_v39 }
  0xa8   :  { %v128_v13 = vpop.xlane.xlu1 %127  ;;  %v125_v14 = vpop.xlane.xlu0 %124  ;;  %v228_v31 = vld [vmem:[%s558_s1 + $0x10] sm:$0xff] }
  0xa9   :  { %v140_v15 = vadd.f32 %v128_v13, %v100_v7  ;;  %v139_v16 = vadd.f32 %v125_v14, %v99_v8  ;;  %v193_v0 = vmul.f32 %v427_v52, %v427_v52  ;;  %v192_v1 = vmul.f32 %v429_v53, %v429_v53 }
  0xaa   :  { %v171_v21 = vld [vmem:[#allocation3 + $0x8] sm:$0xff]  ;;  %v170_v22 = vld [vmem:[#allocation3] sm:$0xff] }
  0xab   :  { %v179_v26 = vmul.f32 0.010204081, %v171_v21  ;;  %v178_v27 = vmul.f32 0.010204081, %v170_v22  ;;  %148 = vst.msk [vmem:[#allocation3 + $0x28] sm:$0xff] %vm20_vm1, %v140_v15  ;;  %147 = vst.msk [vmem:[#allocation3 + $0x20] sm:$0xff] %vm20_vm1, %v139_v16 }
  0xac   :  { %v134_v28 = vpop.xlane.xlu1 %133  ;;  %v131_v29 = vpop.xlane.xlu0 %130  ;;  %v227_v15 = vld [vmem:[%s558_s1 + $0x8] sm:$0xff] }
  0xad   :  { %v195_v32 = vsub.f32 %v179_v26, %v187_v24  ;;  %v194_v33 = vsub.f32 %v178_v27, %v186_v23  ;;  %v142_v34 = vadd.f32 %v134_v28, %v102_v17  ;;  %v141_v35 = vadd.f32 %v131_v29, %v101_v18  ;;  %v226_v18 = vld [vmem:[%s558_s1] sm:$0xff]  ;;  %v251_v26 = vld [vmem:[%s559_s2 + $0x8] sm:$0xff]  ;;  %v229_v28 = vld [vmem:[%s558_s1 + $0x18] sm:$0xff] }
  0xae   :  { %v173_v40 = vld [vmem:[#allocation3 + $0x18] sm:$0xff]  ;;  %v172_v41 = vld [vmem:[#allocation3 + $0x10] sm:$0xff] }
  0xaf   :  { %v203_v42 = vmax.f32 %v195_v32, 0.0  ;;  %v202_v43 = vmax.f32 %v194_v33, 0.0  ;;  %v181_v44 = vmul.f32 0.010204081, %v173_v40  ;;  %v180_v45 = vmul.f32 0.010204081, %v172_v41 }
  0xb0   :  { %150 = vst.msk [vmem:[#allocation3 + $0x38] sm:$0xff] %vm20_vm1, %v142_v34  ;;  %149 = vst.msk [vmem:[#allocation3 + $0x30] sm:$0xff] %vm20_vm1, %v141_v35  ;;  %v231_v40 = vld [vmem:[%s558_s1 + $0x28] sm:$0xff]  ;;  %v252_v41 = vld [vmem:[%s559_s2 + $0x10] sm:$0xff] }
  0xb1   :  { %v211_v47 = vadd.f32 1e-05, %v203_v42  ;;  %v210_v48 = vadd.f32 1e-05, %v202_v43  ;;  %v197_v49 = vsub.f32 %v181_v44, %v189_v37  ;;  %v196_v50 = vsub.f32 %v180_v45, %v188_v36  ;;  %v253_v37 = vld [vmem:[%s559_s2 + $0x18] sm:$0xff]  ;;  %v230_v42 = vld [vmem:[%s558_s1 + $0x20] sm:$0xff] }
  0xb2   :  { %v175_v54 = vld [vmem:[#allocation3 + $0x28] sm:$0xff]  ;;  %v174_v55 = vld [vmem:[#allocation3 + $0x20] sm:$0xff] }
  0xb3   :  { %291 = vrsqrt.f32 %v211_v47  ;;  %v205_v56 = vmax.f32 %v197_v49, 0.0  ;;  %v204_v57 = vmax.f32 %v196_v50, 0.0  ;;  %v183_v58 = vmul.f32 0.010204081, %v175_v54  ;;  %v255_v49 = vld [vmem:[%s559_s2 + $0x28] sm:$0xff]  ;;  %v254_v54 = vld [vmem:[%s559_s2 + $0x20] sm:$0xff] }
  0xb4   :  { %293 = vrsqrt.f32 %v210_v48  ;;  %v182_v60 = vmul.f32 0.010204081, %v174_v55  ;;  %v232_v55 = vld [vmem:[%s558_s1 + $0x30] sm:$0xff] }
  0xb5   :  { %v213_v61 = vadd.f32 1e-05, %v205_v56  ;;  %v212_v62 = vadd.f32 1e-05, %v204_v57  ;;  %v199_v63 = vsub.f32 %v183_v58, %v191_v51  ;;  %v233_v51 = vld [vmem:[%s558_s1 + $0x38] sm:$0xff] }
  0xb6   :  { %v198_v2 = vsub.f32 %v182_v60, %v190_v59 }
  0xb7   :  { %v177_v3 = vld [vmem:[#allocation3 + $0x38] sm:$0xff]  ;;  %v176_v4 = vld [vmem:[#allocation3 + $0x30] sm:$0xff]  ;;  %295 = vrsqrt.f32 %v213_v61  ;;  %v207_v5 = vmax.f32 %v199_v63, 0.0 }
  0xb8   :  { %v185_v6 = vmul.f32 0.010204081, %v177_v3  ;;  %v184_v7 = vmul.f32 0.010204081, %v176_v4  ;;  %297 = vrsqrt.f32 %v212_v62  ;;  %v206_v8 = vmax.f32 %v198_v2, 0.0  ;;  %v257_v61 = vld [vmem:[%s559_s2 + $0x38] sm:$0xff] }
  0xb9   :  { %v215_v9 = vadd.f32 1e-05, %v207_v5  ;;  %v256_v63 = vld [vmem:[%s559_s2 + $0x30] sm:$0xff] }
  0xba   :  { %v201_v11 = vsub.f32 %v185_v6, %v193_v0  ;;  %v200_v13 = vsub.f32 %v184_v7, %v192_v1  ;;  %v214_v14 = vadd.f32 1e-05, %v206_v8 }
  0xbb   :  { %299 = vrsqrt.f32 %v215_v9 }
  0xbc   :  { %v209_v16 = vmax.f32 %v201_v11, 0.0  ;;  %v208_v17 = vmax.f32 %v200_v13, 0.0  ;;  %301 = vrsqrt.f32 %v214_v14 }
  0xbd   :  { %v292_v21 = vpop.eup %291 }
  0xbe   :  { %v217_v22 = vadd.f32 1e-05, %v209_v16  ;;  %v216_v23 = vadd.f32 1e-05, %v208_v17  ;;  %v294_v24 = vpop.eup %293  ;;  %v235_v25 = vmul.f32 %v292_v21, %v227_v15 }
  0xbf   :  { %v234_v27 = vmul.f32 %v294_v24, %v226_v18 }
  0xc0   :  { %303 = vrsqrt.f32 %v217_v22  ;;  %243 = vst.msk [vmem:[%s560_s3 + $0x8] sm:$0xff] %vm20_vm1, %v235_v25  ;;  %v259_v29 = vmul.f32 %v235_v25, %v401_v12 }
  0xc1   :  { %305 = vrsqrt.f32 %v216_v23  ;;  %v296_v32 = vpop.eup %295  ;;  %242 = vst.msk [vmem:[%s560_s3] sm:$0xff] %vm20_vm1, %v234_v27  ;;  %v258_v33 = vmul.f32 %v234_v27, %v399_v10 }
  0xc2   :  { %v298_v34 = vpop.eup %297  ;;  %v267_v35 = vsub.f32 %v251_v26, %v259_v29  ;;  %v237_v12 = vmul.f32 %v296_v32, %v229_v28 }
  0xc3   :  { %v266_v36 = vsub.f32 %v250_v30, %v258_v33  ;;  %v236_v39 = vmul.f32 %v298_v34, %v228_v31 }
  0xc4   :  { %275 = vst.msk [vmem:[%s561_s4 + $0x8] sm:$0xff] %vm20_vm1, %v267_v35  ;;  %245 = vst.msk [vmem:[%s560_s3 + $0x18] sm:$0xff] %vm20_vm1, %v237_v12  ;;  %v261_v10 = vmul.f32 %v237_v12, %v407_v20 }
  0xc5   :  { %v300_v43 = vpop.eup %299  ;;  %274 = vst.msk [vmem:[%s561_s4] sm:$0xff] %vm20_vm1, %v266_v36  ;;  %244 = vst.msk [vmem:[%s560_s3 + $0x10] sm:$0xff] %vm20_vm1, %v236_v39  ;;  %v260_v20 = vmul.f32 %v236_v39, %v405_v19 }
  0xc6   :  { %v302_v44 = vpop.eup %301  ;;  %v269_v45 = vsub.f32 %v253_v37, %v261_v10  ;;  %v239_v47 = vmul.f32 %v300_v43, %v231_v40 }
  0xc7   :  { %v268_v48 = vsub.f32 %v252_v41, %v260_v20  ;;  %v238_v50 = vmul.f32 %v302_v44, %v230_v42 }
  0xc8   :  { %277 = vst.msk [vmem:[%s561_s4 + $0x18] sm:$0xff] %vm20_vm1, %v269_v45  ;;  %247 = vst.msk [vmem:[%s560_s3 + $0x28] sm:$0xff] %vm20_vm1, %v239_v47  ;;  %v263_v19 = vmul.f32 %v239_v47, %v419_v38 }
  0xc9   :  { %276 = vst.msk [vmem:[%s561_s4 + $0x10] sm:$0xff] %vm20_vm1, %v268_v48  ;;  %246 = vst.msk [vmem:[%s560_s3 + $0x20] sm:$0xff] %vm20_vm1, %v238_v50  ;;  %v262_v38 = vmul.f32 %v238_v50, %v423_v46 }
  0xca   :  { %v304_v56 = vpop.eup %303  ;;  %v271_v58 = vsub.f32 %v255_v49, %v263_v19 }
  0xcb   :  { %v306_v57 = vpop.eup %305  ;;  %v241_v59 = vmul.f32 %v304_v56, %v233_v51  ;;  %v270_v60 = vsub.f32 %v254_v54, %v262_v38 }
  0xcc   :  { %v240_v62 = vmul.f32 %v306_v57, %v232_v55  ;;  %279 = vst.msk [vmem:[%s561_s4 + $0x28] sm:$0xff] %vm20_vm1, %v271_v58 }
  0xcd   :  { %249 = vst.msk [vmem:[%s560_s3 + $0x38] sm:$0xff] %vm20_vm1, %v241_v59  ;;  %v265_v46 = vmul.f32 %v241_v59, %v427_v52  ;;  %278 = vst.msk [vmem:[%s561_s4 + $0x20] sm:$0xff] %vm20_vm1, %v270_v60 }
  0xce   :  { %248 = vst.msk [vmem:[%s560_s3 + $0x30] sm:$0xff] %vm20_vm1, %v240_v62  ;;  %v264_v0 = vmul.f32 %v240_v62, %v429_v53 }
  0xcf   :  { %v273_v1 = vsub.f32 %v257_v61, %v265_v46 }
  0xd0   :  { %v272_v2 = vsub.f32 %v256_v63, %v264_v0 }
  0xd1   :  { %281 = vst.msk [vmem:[%s561_s4 + $0x38] sm:$0xff] %vm20_vm1, %v273_v1 }
  0xd2   :  { %280 = vst.msk [vmem:[%s561_s4 + $0x30] sm:$0xff] %vm20_vm1, %v272_v2 }

// kernel: discriminator_forward.16
= control target key start
LH: loop header
LB: loop body
LE: loop exit
PB: predicated region body
PF: predicated region fallthrough
CT: control target
= control target key end

     0   :  { %v222_v0 = vmov 0   ;;  %vm190_vm2 = vcmask 797696   ;;  %s347_s1 = inlined_call_operand.vmem [shape: f32[64,1], index: 1, kind: input, shape index: {}]   ;;  %s348_s2 = inlined_call_operand.vmem [shape: f32[64,1], index: 2, kind: input, shape index: {}]   ;;  %s349_s0 = inlined_call_operand.vmem [shape: f32[64,98], index: 0, kind: input, shape index: {}]   ;;  %s350_s3 = inlined_call_operand.vmem [shape: bf16[64,98], index: 3, kind: output, shape index: {}]  }
   0x1   :  { %221 = vset.pattern.permute.xlu1 %v222_v0  ;;  %220 = vset.pattern.permute.xlu0 %v222_v0  ;;  %v24_v1 = vld [vmem:[%s347_s1 + $0x10] sm:$0xff]  ;;  %v22_v2 = vld [vmem:[%s347_s1] sm:$0xff]  ;;  %v25_v3 = vld [vmem:[%s347_s1 + $0x18] sm:$0xff] }
   0x2   :  { %42 = vperm.xlu1 %221, %v24_v1   ;;  %32 = vperm.xlu0 %220, %v22_v2   ;;  %v23_v4 = vld [vmem:[%s347_s1 + $0x8] sm:$0xff]  ;;  %v26_v6 = vld [vmem:[%s347_s1 + $0x20] sm:$0xff]  ;;  %v29_v7 = vld [vmem:[%s347_s1 + $0x38] sm:$0xff] }
   0x3   :  { %v27_v5 = vld [vmem:[%s347_s1 + $0x28] sm:$0xff]  ;;  %v28_v8 = vld [vmem:[%s347_s1 + $0x30] sm:$0xff]  ;;  %v78_v10 = vld [vmem:[%s348_s2] sm:$0xff] }
   0x4   :  { %v79_v9 = vld [vmem:[%s348_s2 + $0x8] sm:$0xff]  ;;  %v81_v11 = vld [vmem:[%s348_s2 + $0x18] sm:$0xff]  ;;  %v80_v12 = vld [vmem:[%s348_s2 + $0x10] sm:$0xff] }
   0x5   :  { %v83_v13 = vld [vmem:[%s348_s2 + $0x28] sm:$0xff]  ;;  %v82_v14 = vld [vmem:[%s348_s2 + $0x20] sm:$0xff]  ;;  %v85_v15 = vld [vmem:[%s348_s2 + $0x38] sm:$0xff] }
   0x6   :  { %47 = vperm.xlu1 %221, %v25_v3   ;;  %37 = vperm.xlu0 %220, %v23_v4   ;;  %v84_v16 = vld [vmem:[%s348_s2 + $0x30] sm:$0xff]  ;;  %v14_v23 = vld [vmem:[%s349_s0] sm:$0xff]  ;;  %v15_v24 = vld [vmem:[%s349_s0 + $0x8] sm:$0xff] }
   0x7   :  { %v16_v27 = vld [vmem:[%s349_s0 + $0x10] sm:$0xff]  ;;  %v17_v29 = vld [vmem:[%s349_s0 + $0x18] sm:$0xff]  ;;  %v19_v37 = vld [vmem:[%s349_s0 + $0x28] sm:$0xff] }
   0x8   :  { %v18_v38 = vld [vmem:[%s349_s0 + $0x20] sm:$0xff]  ;;  %v21_v49 = vld [vmem:[%s349_s0 + $0x38] sm:$0xff]  ;;  %v20_v50 = vld [vmem:[%s349_s0 + $0x30] sm:$0xff] }
   0xa   :  { %57 = vperm.xlu1 %221, %v27_v5   ;;  %52 = vperm.xlu0 %220, %v26_v6  }
   0xe   :  { %67 = vperm.xlu1 %221, %v29_v7   ;;  %62 = vperm.xlu0 %220, %v28_v8  }
  0x12   :  { %93 = vperm.xlu1 %221, %v79_v9   ;;  %88 = vperm.xlu0 %220, %v78_v10  }
  0x16   :  { %103 = vperm.xlu1 %221, %v81_v11   ;;  %98 = vperm.xlu0 %220, %v80_v12  }
  0x1a   :  { %113 = vperm.xlu1 %221, %v83_v13   ;;  %108 = vperm.xlu0 %220, %v82_v14  }
  0x1e   :  { %123 = vperm.xlu1 %221, %v85_v15   ;;  %118 = vperm.xlu0 %220, %v84_v16  }
  0x81   :  { %v43_v17 = vpop.permute.xlu1 %42  ;;  %v33_v18 = vpop.permute.xlu0 %32 }
  0x82   :  { %v70_v28 = vmul.f32 %v33_v18, %v14_v23  ;;  %v72_v35 = vmul.f32 %v43_v17, %v16_v27 }
  0x85   :  { %v48_v19 = vpop.permute.xlu1 %47  ;;  %v38_v20 = vpop.permute.xlu0 %37 }
  0x86   :  { %v71_v30 = vmul.f32 %v38_v20, %v15_v24  ;;  %v73_v36 = vmul.f32 %v48_v19, %v17_v29 }
  0x89   :  { %v58_v21 = vpop.permute.xlu1 %57  ;;  %v53_v22 = vpop.permute.xlu0 %52 }
  0x8a   :  { %v75_v47 = vmul.f32 %v58_v21, %v19_v37  ;;  %v74_v48 = vmul.f32 %v53_v22, %v18_v38 }
  0x8d   :  { %v68_v25 = vpop.permute.xlu1 %67  ;;  %v63_v26 = vpop.permute.xlu0 %62 }
  0x8e   :  { %v77_v61 = vmul.f32 %v68_v25, %v21_v49  ;;  %v76_v62 = vmul.f32 %v63_v26, %v20_v50 }
  0x91   :  { %v94_v31 = vpop.permute.xlu1 %93  ;;  %v89_v32 = vpop.permute.xlu0 %88 }
  0x92   :  { %v127_v33 = vadd.f32 %v94_v31, %v71_v30  ;;  %v126_v34 = vadd.f32 %v89_v32, %v70_v28 }
  0x94   :  { %vm135_vm0 = vcmp.ge.f32.partialorder %v127_v33, 0.0  ;;  %v143_v39 = vmul.f32 0.2, %v127_v33  ;;  %vm134_vm1 = vcmp.ge.f32.partialorder %v126_v34, 0.0  ;;  %v142_v40 = vmul.f32 0.2, %v126_v34 }
  0x95   :  { %v104_v41 = vpop.permute.xlu1 %103  ;;  %v99_v42 = vpop.permute.xlu0 %98 }
  0x96   :  { %v151_v43 = vsel %vm135_vm0, %v127_v33, %v143_v39  ;;  %v150_v44 = vsel %vm134_vm1, %v126_v34, %v142_v40  ;;  %v129_v45 = vadd.f32 %v104_v41, %v73_v36  ;;  %v128_v46 = vadd.f32 %v99_v42, %v72_v35 }
  0x97   :  { %v212_v51 = vpack.c.bf16 %v151_v43, %v151_v43  ;;  %v211_v52 = vpack.c.bf16 %v150_v44, %v150_v44 }
  0x98   :  { %vm137_vm3 = vcmp.ge.f32.partialorder %v129_v45, 0.0  ;;  %v145_v53 = vmul.f32 0.2, %v129_v45  ;;  %vm136_vm4 = vcmp.ge.f32.partialorder %v128_v46, 0.0  ;;  %v144_v54 = vmul.f32 0.2, %v128_v46 }
  0x99   :  { %192 = vst.msk [vmem:[%s350_s3 + $0x4] sm:$0xf] %vm190_vm2, %v212_v51  ;;  %191 = vst.msk [vmem:[%s350_s3] sm:$0xf] %vm190_vm2, %v211_v52  ;;  %v114_v55 = vpop.permute.xlu1 %113  ;;  %v109_v56 = vpop.permute.xlu0 %108 }
  0x9a   :  { %v153_v57 = vsel %vm137_vm3, %v129_v45, %v145_v53  ;;  %v152_v58 = vsel %vm136_vm4, %v128_v46, %v144_v54  ;;  %v131_v59 = vadd.f32 %v114_v55, %v75_v47  ;;  %v130_v60 = vadd.f32 %v109_v56, %v74_v48 }
  0x9b   :  { %v214_v63 = vpack.c.bf16 %v153_v57, %v153_v57  ;;  %v213_v0 = vpack.c.bf16 %v152_v58, %v152_v58 }
  0x9c   :  { %vm139_vm5 = vcmp.ge.f32.partialorder %v131_v59, 0.0  ;;  %v147_v1 = vmul.f32 0.2, %v131_v59  ;;  %vm138_vm6 = vcmp.ge.f32.partialorder %v130_v60, 0.0  ;;  %v146_v2 = vmul.f32 0.2, %v130_v60 }
  0x9d   :  { %194 = vst.msk [vmem:[%s350_s3 + $0xc] sm:$0xf] %vm190_vm2, %v214_v63  ;;  %193 = vst.msk [vmem:[%s350_s3 + $0x8] sm:$0xf] %vm190_vm2, %v213_v0  ;;  %v124_v3 = vpop.permute.xlu1 %123  ;;  %v119_v4 = vpop.permute.xlu0 %118 }
  0x9e   :  { %v155_v5 = vsel %vm139_vm5, %v131_v59, %v147_v1  ;;  %v154_v6 = vsel %vm138_vm6, %v130_v60, %v146_v2  ;;  %v133_v7 = vadd.f32 %v124_v3, %v77_v61  ;;  %v132_v8 = vadd.f32 %v119_v4, %v76_v62 }
  0x9f   :  { %v216_v9 = vpack.c.bf16 %v155_v5, %v155_v5  ;;  %v215_v10 = vpack.c.bf16 %v154_v6, %v154_v6 }
  0xa0   :  { %vm141_vm7 = vcmp.ge.f32.partialorder %v133_v7, 0.0  ;;  %v149_v11 = vmul.f32 0.2, %v133_v7  ;;  %vm140_vm8 = vcmp.ge.f32.partialorder %v132_v8, 0.0  ;;  %v148_v12 = vmul.f32 0.2, %v132_v8 }
  0xa1   :  { %196 = vst.msk [vmem:[%s350_s3 + $0x14] sm:$0xf] %vm190_vm2, %v216_v9  ;;  %195 = vst.msk [vmem:[%s350_s3 + $0x10] sm:$0xf] %vm190_vm2, %v215_v10 }
  0xa2   :  { %v157_v13 = vsel %vm141_vm7, %v133_v7, %v149_v11  ;;  %v156_v14 = vsel %vm140_vm8, %v132_v8, %v148_v12 }
  0xa3   :  { %v218_v15 = vpack.c.bf16 %v157_v13, %v157_v13  ;;  %v217_v16 = vpack.c.bf16 %v156_v14, %v156_v14 }
  0xa5   :  { %198 = vst.msk [vmem:[%s350_s3 + $0x1c] sm:$0xf] %vm190_vm2, %v218_v15  ;;  %197 = vst.msk [vmem:[%s350_s3 + $0x18] sm:$0xf] %vm190_vm2, %v217_v16 }

// kernel: discriminator_forward.17
= control target key start
LH: loop header
LB: loop body
LE: loop exit
PB: predicated region body
PF: predicated region fallthrough
CT: control target
= control target key end

     0   :  { %v1972_v31 = vmov 0   ;;  %vm19_vm0 = vcmask 261120   ;;  %s2570_s1 = inlined_call_operand.vmem [shape: bf16[1024,32], index: 1, kind: input, shape index: {}]   ;;  %s2571_s0 = inlined_call_operand.vmem [shape: bf16[128,1024], index: 0, kind: input, shape index: {}]   ;;  %s2572_s2 = inlined_call_operand.vmem [shape: f32[128,1], index: 2, kind: input, shape index: {}]   ;;  %s2573_s3 = inlined_call_operand.vmem [shape: f32[128,32], index: 3, kind: output, shape index: {}]  }
   0x1   :  { %v1908_v0 = vld [vmem:[%s2570_s1 + $0x40] sm:$0xff]   ;;  %v1912_v4 = vld [vmem:[%s2570_s1 + $0x48] sm:$0xff]   ;;  %v1916_v8 = vld [vmem:[%s2570_s1 + $0x50] sm:$0xff]   ;;  %1906 = vset.pattern.permute.xlu0 %v1972_v31  ;;  %1907 = vset.pattern.permute.xlu1 %v1972_v31 }
   0x2   :  { %v1909_v1 = vld [vmem:[%s2570_s1 + $0xc0] sm:$0xff]   ;;  %1648 = vmatprep.subr.bf16.mxu0 %v1908_v0  ;;  %v1913_v5 = vld [vmem:[%s2570_s1 + $0xc8] sm:$0xff]   ;;  %v1917_v9 = vld [vmem:[%s2570_s1 + $0xd0] sm:$0xff]  }
   0x3   :  { %v1910_v2 = vld [vmem:[%s2570_s1] sm:$0xff]   ;;  %1712 = vmatprep.subr.bf16.mxu1 %v1909_v1  ;;  %v1914_v6 = vld [vmem:[%s2570_s1 + $0x8] sm:$0xff]   ;;  %v1918_v10 = vld [vmem:[%s2570_s1 + $0x10] sm:$0xff]  }
   0x4   :  { %v1911_v3 = vld [vmem:[%s2570_s1 + $0x80] sm:$0xff]   ;;  %1649 = vmatpush3.bf16.msra.mxu0 %v1910_v2  ;;  %v1915_v7 = vld [vmem:[%s2570_s1 + $0x88] sm:$0xff]   ;;  %v1919_v11 = vld [vmem:[%s2570_s1 + $0x90] sm:$0xff]  }
   0x5   :  { %1713 = vmatpush3.bf16.msra.mxu1 %v1911_v3  ;;  %1650 = vmatprep.subr.bf16.mxu0 %v1912_v4  ;;  %v1920_v12 = vld [vmem:[%s2570_s1 + $0x58] sm:$0xff]   ;;  %v1924_v16 = vld [vmem:[%s2570_s1 + $0x60] sm:$0xff]   ;;  %v1928_v20 = vld [vmem:[%s2570_s1 + $0x68] sm:$0xff]  }
   0x6   :  { %1714 = vmatprep.subr.bf16.mxu1 %v1913_v5  ;;  %v1921_v13 = vld [vmem:[%s2570_s1 + $0xd8] sm:$0xff]   ;;  %v1925_v17 = vld [vmem:[%s2570_s1 + $0xe0] sm:$0xff]   ;;  %v1929_v21 = vld [vmem:[%s2570_s1 + $0xe8] sm:$0xff]  }
   0x7   :  { %v1922_v14 = vld [vmem:[%s2570_s1 + $0x18] sm:$0xff]   ;;  %v1926_v18 = vld [vmem:[%s2570_s1 + $0x20] sm:$0xff]   ;;  %v1930_v22 = vld [vmem:[%s2570_s1 + $0x28] sm:$0xff]  }
   0x8   :  { %1651 = vmatpush3.bf16.msra.mxu0 %v1914_v6  ;;  %v1923_v15 = vld [vmem:[%s2570_s1 + $0x98] sm:$0xff]   ;;  %v1927_v19 = vld [vmem:[%s2570_s1 + $0xa0] sm:$0xff]   ;;  %v1931_v23 = vld [vmem:[%s2570_s1 + $0xa8] sm:$0xff]  }
   0x9   :  { %1715 = vmatpush3.bf16.msra.mxu1 %v1915_v7  ;;  %1652 = vmatprep.subr.bf16.mxu0 %v1916_v8  ;;  %v1932_v24 = vld [vmem:[%s2570_s1 + $0x70] sm:$0xff]   ;;  %v1936_v28 = vld [vmem:[%s2570_s1 + $0x78] sm:$0xff]   ;;  %v52_v33 = vld [vmem:[%s2571_s0] sm:$0xff] }
   0xa   :  { %1716 = vmatprep.subr.bf16.mxu1 %v1917_v9  ;;  %v1933_v25 = vld [vmem:[%s2570_s1 + $0xf0] sm:$0xff]   ;;  %v1937_v29 = vld [vmem:[%s2570_s1 + $0xf8] sm:$0xff]   ;;  %v56_v34 = vld [vmem:[%s2571_s0 + $0x20] sm:$0xff] }
   0xb   :  { %v1934_v26 = vld [vmem:[%s2570_s1 + $0x30] sm:$0xff]   ;;  %v1938_v30 = vld [vmem:[%s2570_s1 + $0x38] sm:$0xff]   ;;  %v53_v35 = vld [vmem:[%s2571_s0 + $0x8] sm:$0xff]  ;;  %v1520_v36 = vcombine.low %v52_v33, %v56_v34  ;;  %v1521_v37 = vcombine.high %v52_v33, %v56_v34 }
   0xc   :  { %1653 = vmatpush3.bf16.msra.mxu0 %v1918_v10  ;;  %v1935_v27 = vld [vmem:[%s2570_s1 + $0xb0] sm:$0xff]   ;;  %v1939_v32 = vld [vmem:[%s2570_s1 + $0xb8] sm:$0xff]   ;;  %v57_v38 = vld [vmem:[%s2571_s0 + $0x28] sm:$0xff] }
   0xd   :  { %1717 = vmatpush3.bf16.msra.mxu1 %v1919_v11  ;;  %1654 = vmatprep.subr.bf16.mxu0 %v1920_v12  ;;  %v1522_v39 = vcombine.low %v53_v35, %v57_v38  ;;  %v1523_v40 = vcombine.high %v53_v35, %v57_v38  ;;  %v1940_v41 = vld [vmem:[%s2570_s1 + $0x140] sm:$0xff]   ;;  %v61_v48 = vld [vmem:[%s2571_s0 + $0x48] sm:$0xff]  ;;  %v1948_v63 = vld [vmem:[%s2570_s1 + $0x150] sm:$0xff]  }
   0xe   :  { %1718 = vmatprep.subr.bf16.mxu1 %v1921_v13  ;;  %980 = vmatprep.mubr.bf16.mxu0 %v1521_v37  ;;  %v1941_v42 = vld [vmem:[%s2570_s1 + $0x100] sm:$0xff]   ;;  %v65_v49 = vld [vmem:[%s2571_s0 + $0x68] sm:$0xff]  ;;  %v1949_v0 = vld [vmem:[%s2570_s1 + $0x110] sm:$0xff]  }
   0xf   :  { %1077 = vmatprep.mubr.bf16.mxu1 %v1523_v40  ;;  %v1942_v43 = vld [vmem:[%s2570_s1 + $0x1c0] sm:$0xff]   ;;  %v1531_v50 = vcombine.high %v61_v48, %v65_v49  ;;  %v1944_v51 = vld [vmem:[%s2570_s1 + $0x148] sm:$0xff]   ;;  %v1530_v54 = vcombine.low %v61_v48, %v65_v49  ;;  %v1950_v1 = vld [vmem:[%s2570_s1 + $0x1d0] sm:$0xff]  }
  0x10   :  { %1655 = vmatpush3.bf16.msra.mxu0 %v1922_v14  ;;  %v1943_v44 = vld [vmem:[%s2570_s1 + $0x180] sm:$0xff]   ;;  %v1945_v53 = vld [vmem:[%s2570_s1 + $0x108] sm:$0xff]   ;;  %v1951_v2 = vld [vmem:[%s2570_s1 + $0x190] sm:$0xff]  }
  0x11   :  { %1719 = vmatpush3.bf16.msra.mxu1 %v1923_v15  ;;  %1656 = vmatprep.subr.bf16.mxu0 %v1924_v16  ;;  %v60_v45 = vld [vmem:[%s2571_s0 + $0x40] sm:$0xff]  ;;  %v1946_v55 = vld [vmem:[%s2570_s1 + $0x1c8] sm:$0xff]   ;;  %v1952_v11 = vld [vmem:[%s2570_s1 + $0x158] sm:$0xff]  }
  0x12   :  { %1720 = vmatprep.subr.bf16.mxu1 %v1925_v17  ;;  %v64_v46 = vld [vmem:[%s2571_s0 + $0x60] sm:$0xff]  ;;  %v1947_v56 = vld [vmem:[%s2570_s1 + $0x188] sm:$0xff]   ;;  %v1953_v12 = vld [vmem:[%s2570_s1 + $0x118] sm:$0xff]  }
  0x13   :  { %v1529_v47 = vcombine.high %v60_v45, %v64_v46  ;;  %v1528_v52 = vcombine.low %v60_v45, %v64_v46  ;;  %v68_v57 = vld [vmem:[%s2571_s0 + $0x80] sm:$0xff]  ;;  %v69_v59 = vld [vmem:[%s2571_s0 + $0x88] sm:$0xff]  ;;  %v1954_v13 = vld [vmem:[%s2570_s1 + $0x1d8] sm:$0xff]  }
  0x14   :  { %1657 = vmatpush3.bf16.msra.mxu0 %v1926_v18  ;;  %v72_v58 = vld [vmem:[%s2571_s0 + $0xa0] sm:$0xff]  ;;  %v73_v60 = vld [vmem:[%s2571_s0 + $0xa8] sm:$0xff]  ;;  %v1955_v14 = vld [vmem:[%s2570_s1 + $0x198] sm:$0xff]  }
  0x15   :  { %1721 = vmatpush3.bf16.msra.mxu1 %v1927_v19  ;;  %1658 = vmatprep.subr.bf16.mxu0 %v1928_v20  ;;  %v1537_v61 = vcombine.high %v68_v57, %v72_v58  ;;  %v1539_v62 = vcombine.high %v69_v59, %v73_v60  ;;  %v1536_v3 = vcombine.low %v68_v57, %v72_v58  ;;  %v76_v4 = vld [vmem:[%s2571_s0 + $0xc0] sm:$0xff]  ;;  %v77_v6 = vld [vmem:[%s2571_s0 + $0xc8] sm:$0xff]  ;;  %v1965_v40 = vld [vmem:[%s2570_s1 + $0x130] sm:$0xff]  }
  0x16   :  { %1722 = vmatprep.subr.bf16.mxu1 %v1929_v21  ;;  %v80_v5 = vld [vmem:[%s2571_s0 + $0xe0] sm:$0xff]  ;;  %v1538_v7 = vcombine.low %v69_v59, %v73_v60  ;;  %v81_v9 = vld [vmem:[%s2571_s0 + $0xe8] sm:$0xff]  ;;  %v1969_v49 = vld [vmem:[%s2570_s1 + $0x138] sm:$0xff]  }
  0x17   :  { %v1545_v8 = vcombine.high %v76_v4, %v80_v5  ;;  %v1547_v10 = vcombine.high %v77_v6, %v81_v9  ;;  %v84_v15 = vld [vmem:[%s2571_s0 + $0x100] sm:$0xff]  ;;  %v85_v17 = vld [vmem:[%s2571_s0 + $0x108] sm:$0xff]  ;;  %v1544_v20 = vcombine.low %v76_v4, %v80_v5  ;;  %v59_v4 = vld [vmem:[%s2571_s0 + $0x38] sm:$0xff] }
  0x18   :  { %1659 = vmatpush3.bf16.msra.mxu0 %v1930_v22  ;;  %v88_v16 = vld [vmem:[%s2571_s0 + $0x120] sm:$0xff]  ;;  %v89_v18 = vld [vmem:[%s2571_s0 + $0x128] sm:$0xff]  ;;  %v1546_v22 = vcombine.low %v77_v6, %v81_v9 }
  0x19   :  { %1723 = vmatpush3.bf16.msra.mxu1 %v1931_v23  ;;  %1660 = vmatprep.subr.bf16.mxu0 %v1932_v24  ;;  %v1956_v19 = vld [vmem:[%s2570_s1 + $0x160] sm:$0xff]   ;;  %v1553_v23 = vcombine.high %v84_v15, %v88_v16  ;;  %v97_v31 = vld [vmem:[%s2571_s0 + $0x168] sm:$0xff]  ;;  %v1552_v35 = vcombine.low %v84_v15, %v88_v16  ;;  %v63_v15 = vld [vmem:[%s2571_s0 + $0x58] sm:$0xff] }
  0x1a   :  { %1724 = vmatprep.subr.bf16.mxu1 %v1933_v25  ;;  %v1957_v21 = vld [vmem:[%s2570_s1 + $0x120] sm:$0xff]   ;;  %v1555_v25 = vcombine.high %v85_v17, %v89_v18  ;;  %v1962_v33 = vld [vmem:[%s2570_s1 + $0x1e8] sm:$0xff]   ;;  %v67_v16 = vld [vmem:[%s2571_s0 + $0x78] sm:$0xff] }
  0x1b   :  { %v1958_v24 = vld [vmem:[%s2570_s1 + $0x1e0] sm:$0xff]   ;;  %v1963_v34 = vld [vmem:[%s2570_s1 + $0x1a8] sm:$0xff]  }
  0x1c   :  { %1661 = vmatpush3.bf16.msra.mxu0 %v1934_v26  ;;  %v1959_v26 = vld [vmem:[%s2570_s1 + $0x1a0] sm:$0xff]   ;;  %v101_v45 = vld [vmem:[%s2571_s0 + $0x188] sm:$0xff] }
  0x1d   :  { %1725 = vmatpush3.bf16.msra.mxu1 %v1935_v27  ;;  %1662 = vmatprep.subr.bf16.mxu0 %v1936_v28  ;;  %v92_v27 = vld [vmem:[%s2571_s0 + $0x140] sm:$0xff]  ;;  %v105_v46 = vld [vmem:[%s2571_s0 + $0x1a8] sm:$0xff] }
  0x1e   :  { %1726 = vmatprep.subr.bf16.mxu1 %v1937_v29  ;;  %v96_v28 = vld [vmem:[%s2571_s0 + $0x160] sm:$0xff]  ;;  %v1960_v29 = vld [vmem:[%s2570_s1 + $0x168] sm:$0xff]   ;;  %v1570_v60 = vcombine.low %v101_v45, %v105_v46 }
  0x1f   :  { %v1561_v37 = vcombine.high %v92_v27, %v96_v28  ;;  %v1560_v48 = vcombine.low %v92_v27, %v96_v28  ;;  %v109_v57 = vld [vmem:[%s2571_s0 + $0x1c8] sm:$0xff]  ;;  %v71_v27 = vld [vmem:[%s2571_s0 + $0x98] sm:$0xff] }
  0x20   :  { %1663 = vmatpush3.bf16.msra.mxu0 %v1938_v30  ;;  %v93_v30 = vld [vmem:[%s2571_s0 + $0x148] sm:$0xff]  ;;  %v75_v28 = vld [vmem:[%s2571_s0 + $0xb8] sm:$0xff] }
  0x21   :  { %1727 = vmatpush3.bf16.msra.mxu1 %v1939_v32  ;;  %1776 = vmatprep.subr.bf16.mxu0 %v1940_v41  ;;  %v1961_v32 = vld [vmem:[%s2570_s1 + $0x128] sm:$0xff]   ;;  %v1563_v38 = vcombine.high %v93_v30, %v97_v31  ;;  %v1966_v41 = vld [vmem:[%s2570_s1 + $0x1f0] sm:$0xff]  }
  0x22   :  { %1840 = vmatprep.subr.bf16.mxu1 %v1942_v43  ;;  %v104_v43 = vld [vmem:[%s2571_s0 + $0x1a0] sm:$0xff]  ;;  %v113_v58 = vld [vmem:[%s2571_s0 + $0x1e8] sm:$0xff] }
  0x23   :  { %981 = vmatmul.mubr.bf16.vlgmr.msra.gmra.mrb[0].mxu0 %v1520_v36  ;;  %v1554_v36 = vcombine.low %v85_v17, %v89_v18  ;;  %v1389_v5 = vld [vmem:[%s2572_s2 + $0x8] sm:$0xff]  ;;  %v1394_v17 = vld [vmem:[%s2572_s2 + $0x30] sm:$0xff] }
  0x24   :  { %1078 = vmatmul.mubr.bf16.vlgmr.msra.gmra.mrb[0].mxu1 %v1522_v39  ;;  %1777 = vmatpush3.bf16.msra.mxu0 %v1941_v42  ;;  %v1964_v39 = vld [vmem:[%s2570_s1 + $0x170] sm:$0xff]   ;;  %v100_v42 = vld [vmem:[%s2571_s0 + $0x180] sm:$0xff] }
  0x25   :  { %1841 = vmatpush3.bf16.msra.mxu1 %v1943_v44  ;;  %988 = vmatprep.mubr.bf16.mxu0 %v1529_v47  ;;  %v1967_v44 = vld [vmem:[%s2570_s1 + $0x1b0] sm:$0xff]   ;;  %v1968_v47 = vld [vmem:[%s2570_s1 + $0x178] sm:$0xff]   ;;  %v1568_v59 = vcombine.low %v100_v42, %v104_v43 }
  0x26   :  { %1085 = vmatprep.mubr.bf16.mxu1 %v1531_v50  ;;  %1778 = vmatprep.subr.bf16.mxu0 %v1944_v51  ;;  %v1562_v50 = vcombine.low %v93_v30, %v97_v31  ;;  %v1569_v51 = vcombine.high %v100_v42, %v104_v43  ;;  %v1399_v31 = vld [vmem:[%s2572_s2 + $0x58] sm:$0xff] }
  0x27   :  { %1842 = vmatprep.subr.bf16.mxu1 %v1946_v55  ;;  %v108_v55 = vld [vmem:[%s2571_s0 + $0x1c0] sm:$0xff]  ;;  %v1403_v43 = vld [vmem:[%s2572_s2 + $0x78] sm:$0xff] }
  0x28   :  { %1779 = vmatpush3.bf16.msra.mxu0 %v1945_v53  ;;  %v1571_v53 = vcombine.high %v101_v45, %v105_v46 }
  0x29   :  { %1843 = vmatpush3.bf16.msra.mxu1 %v1947_v56  ;;  %1780 = vmatprep.subr.bf16.mxu0 %v1948_v63  ;;  %v112_v56 = vld [vmem:[%s2571_s0 + $0x1e0] sm:$0xff] }
  0x2a   :  { %1844 = vmatprep.subr.bf16.mxu1 %v1950_v1  ;;  %v1388_v63 = vld [vmem:[%s2572_s2] sm:$0xff]  ;;  %v58_v1 = vld [vmem:[%s2571_s0 + $0x30] sm:$0xff]  ;;  %v1576_v6 = vcombine.low %v108_v55, %v112_v56 }
  0x2b   :  { %989 = vmatmul.mubr.bf16.gmra.mrb[4].mxu0 %v1528_v52  ;;  %v1970_v52 = vld [vmem:[%s2570_s1 + $0x1f8] sm:$0xff]   ;;  %1406 = vperm.xlu0 %1906, %v1388_v63   ;;  %v102_v63 = vld [vmem:[%s2571_s0 + $0x190] sm:$0xff] }
  0x2c   :  { %1086 = vmatmul.mubr.bf16.gmra.mrb[4].mxu1 %v1530_v54  ;;  %996 = vmatprep.mubr.bf16.mxu0 %v1537_v61  ;;  %v1971_v54 = vld [vmem:[%s2570_s1 + $0x1b8] sm:$0xff]   ;;  %v1577_v61 = vcombine.high %v108_v55, %v112_v56  ;;  %v94_v55 = vld [vmem:[%s2571_s0 + $0x150] sm:$0xff] }
  0x2d   :  { %1093 = vmatprep.mubr.bf16.mxu1 %v1539_v62  ;;  %1781 = vmatpush3.bf16.msra.mxu0 %v1949_v0  ;;  %v1579_v62 = vcombine.high %v109_v57, %v113_v58  ;;  %v54_v0 = vld [vmem:[%s2571_s0 + $0x10] sm:$0xff] }
  0x2e   :  { %1845 = vmatpush3.bf16.msra.mxu1 %v1951_v2  ;;  %1782 = vmatprep.subr.bf16.mxu0 %v1952_v11  ;;  %v1390_v2 = vld [vmem:[%s2572_s2 + $0x10] sm:$0xff]  ;;  %v1525_v9 = vcombine.high %v54_v0, %v58_v1  ;;  %v1392_v11 = vld [vmem:[%s2572_s2 + $0x20] sm:$0xff]  ;;  %v1524_v18 = vcombine.low %v54_v0, %v58_v1  ;;  %v103_v1 = vld [vmem:[%s2571_s0 + $0x198] sm:$0xff] }
  0x2f   :  { %1846 = vmatprep.subr.bf16.mxu1 %v1954_v13  ;;  %1416 = vperm.xlu1 %1907, %v1390_v2   ;;  %v62_v13 = vld [vmem:[%s2571_s0 + $0x50] sm:$0xff]  ;;  %v107_v2 = vld [vmem:[%s2571_s0 + $0x1b8] sm:$0xff] }
  0x30   :  { %1411 = vperm.xlu0 %1906, %v1389_v5   ;;  %v98_v56 = vld [vmem:[%s2571_s0 + $0x170] sm:$0xff] }
  0x31   :  { %1783 = vmatpush3.bf16.msra.mxu0 %v1953_v12  ;;  %v1393_v12 = vld [vmem:[%s2572_s2 + $0x28] sm:$0xff]  ;;  %v106_v0 = vld [vmem:[%s2571_s0 + $0x1b0] sm:$0xff] }
  0x32   :  { %1847 = vmatpush3.bf16.msra.mxu1 %v1955_v14  ;;  %1784 = vmatprep.subr.bf16.mxu0 %v1956_v19  ;;  %v66_v14 = vld [vmem:[%s2571_s0 + $0x70] sm:$0xff]  ;;  %v1395_v19 = vld [vmem:[%s2572_s2 + $0x38] sm:$0xff]  ;;  %v1573_v5 = vcombine.high %v102_v63, %v106_v0 }
  0x33   :  { %997 = vmatmul.mubr.bf16.gmra.mrb[8].mxu0 %v1536_v3  ;;  %1848 = vmatprep.subr.bf16.mxu1 %v1958_v24  ;;  %v55_v3 = vld [vmem:[%s2571_s0 + $0x18] sm:$0xff]  ;;  %v1397_v24 = vld [vmem:[%s2572_s2 + $0x48] sm:$0xff]  ;;  %v1532_v30 = vcombine.low %v62_v13, %v66_v14 }
  0x34   :  { %1094 = vmatmul.mubr.bf16.gmra.mrb[8].mxu1 %v1538_v7  ;;  %1004 = vmatprep.mubr.bf16.mxu0 %v1545_v8  ;;  %v1391_v7 = vld [vmem:[%s2572_s2 + $0x18] sm:$0xff]  ;;  %v1578_v8 = vcombine.low %v109_v57, %v113_v58 }
  0x35   :  { %1101 = vmatprep.mubr.bf16.mxu1 %v1547_v10  ;;  %1785 = vmatpush3.bf16.msra.mxu0 %v1957_v21  ;;  %v1527_v10 = vcombine.high %v55_v3, %v59_v4  ;;  %v1533_v21 = vcombine.high %v62_v13, %v66_v14  ;;  %v95_v57 = vld [vmem:[%s2571_s0 + $0x158] sm:$0xff] }
  0x36   :  { %1849 = vmatpush3.bf16.msra.mxu1 %v1959_v26  ;;  %1786 = vmatprep.subr.bf16.mxu0 %v1960_v29  ;;  %v74_v26 = vld [vmem:[%s2571_s0 + $0xb0] sm:$0xff]  ;;  %v99_v58 = vld [vmem:[%s2571_s0 + $0x178] sm:$0xff] }
  0x37   :  { %1850 = vmatprep.subr.bf16.mxu1 %v1962_v33  ;;  %1421 = vperm.xlu1 %1907, %v1391_v7   ;;  %v1398_v29 = vld [vmem:[%s2572_s2 + $0x50] sm:$0xff] }
  0x38   :  { %1426 = vperm.xlu0 %1906, %v1392_v11   ;;  %v110_v7 = vld [vmem:[%s2571_s0 + $0x1d0] sm:$0xff]  ;;  %v1572_v11 = vcombine.low %v102_v63, %v106_v0 }
  0x39   :  { %1787 = vmatpush3.bf16.msra.mxu0 %v1961_v32  ;;  %v1534_v32 = vcombine.low %v63_v15, %v67_v16 }
  0x3a   :  { %1851 = vmatpush3.bf16.msra.mxu1 %v1963_v34  ;;  %1788 = vmatprep.subr.bf16.mxu0 %v1964_v39  ;;  %v1543_v34 = vcombine.high %v71_v27, %v75_v28  ;;  %v79_v39 = vld [vmem:[%s2571_s0 + $0xd8] sm:$0xff] }
  0x3b   :  { %1005 = vmatmul.mubr.bf16.gmra.mrb[12].mxu0 %v1544_v20  ;;  %1852 = vmatprep.subr.bf16.mxu1 %v1966_v41  ;;  %v1526_v20 = vcombine.low %v55_v3, %v59_v4  ;;  %v1402_v41 = vld [vmem:[%s2572_s2 + $0x70] sm:$0xff]  ;;  %v1564_v3 = vcombine.low %v94_v55, %v98_v56  ;;  %v1566_v4 = vcombine.low %v95_v57, %v99_v58 }
  0x3c   :  { %1102 = vmatmul.mubr.bf16.gmra.mrb[12].mxu1 %v1546_v22  ;;  %1012 = vmatprep.mubr.bf16.mxu0 %v1553_v23  ;;  %v1535_v22 = vcombine.high %v63_v15, %v67_v16  ;;  %v1396_v23 = vld [vmem:[%s2572_s2 + $0x40] sm:$0xff] }
  0x3d   :  { %1109 = vmatprep.mubr.bf16.mxu1 %v1555_v25  ;;  %1789 = vmatpush3.bf16.msra.mxu0 %v1965_v40  ;;  %v70_v25 = vld [vmem:[%s2571_s0 + $0x90] sm:$0xff]  ;;  %v83_v40 = vld [vmem:[%s2571_s0 + $0xf8] sm:$0xff] }
  0x3e   :  { %1853 = vmatpush3.bf16.msra.mxu1 %v1967_v44  ;;  %1790 = vmatprep.subr.bf16.mxu0 %v1968_v47  ;;  %v1541_v33 = vcombine.high %v70_v25, %v74_v26  ;;  %v1540_v42 = vcombine.low %v70_v25, %v74_v26  ;;  %v1542_v44 = vcombine.low %v71_v27, %v75_v28  ;;  %v86_v47 = vld [vmem:[%s2571_s0 + $0x110] sm:$0xff] }
  0x3f   :  { %1854 = vmatprep.subr.bf16.mxu1 %v1970_v52  ;;  %1431 = vperm.xlu1 %1907, %v1393_v12   ;;  %v1551_v46 = vcombine.high %v79_v39, %v83_v40  ;;  %v1550_v52 = vcombine.low %v79_v39, %v83_v40  ;;  %v1574_v12 = vcombine.low %v103_v1, %v107_v2 }
  0x40   :  { %1436 = vperm.xlu0 %1906, %v1394_v17   ;;  %v1973_v17 = vmov 0.0  }
  0x41   :  { %1791 = vmatpush3.bf16.msra.mxu0 %v1969_v49  ;;  %v87_v49 = vld [vmem:[%s2571_s0 + $0x118] sm:$0xff]  ;;  %20 = vst.msk [vmem:[#allocation2] sm:$0xff] %vm19_vm0, %v1973_v17  ;;  %21 = vst.msk [vmem:[#allocation2 + $0x8] sm:$0xff] %vm19_vm0, %v1973_v17 }
  0x42   :  { %1855 = vmatpush3.bf16.msra.mxu1 %v1971_v54  ;;  %22 = vst.msk [vmem:[#allocation2 + $0x10] sm:$0xff] %vm19_vm0, %v1973_v17  ;;  %23 = vst.msk [vmem:[#allocation2 + $0x18] sm:$0xff] %vm19_vm0, %v1973_v17 }
  0x43   :  { %1013 = vmatmul.mubr.bf16.gmra.mrb[16].mxu0 %v1552_v35  ;;  %1441 = vperm.xlu1 %1907, %v1395_v19   ;;  %v1400_v35 = vld [vmem:[%s2572_s2 + $0x60] sm:$0xff]  ;;  %24 = vst.msk [vmem:[#allocation2 + $0x20] sm:$0xff] %vm19_vm0, %v1973_v17  ;;  %25 = vst.msk [vmem:[#allocation2 + $0x28] sm:$0xff] %vm19_vm0, %v1973_v17 }
  0x44   :  { %1110 = vmatmul.mubr.bf16.gmra.mrb[16].mxu1 %v1554_v36  ;;  %1020 = vmatprep.mubr.bf16.mxu0 %v1561_v37  ;;  %v1401_v36 = vld [vmem:[%s2572_s2 + $0x68] sm:$0xff]  ;;  %v78_v37 = vld [vmem:[%s2571_s0 + $0xd0] sm:$0xff]  ;;  %26 = vst.msk [vmem:[#allocation2 + $0x30] sm:$0xff] %vm19_vm0, %v1973_v17  ;;  %27 = vst.msk [vmem:[#allocation2 + $0x38] sm:$0xff] %vm19_vm0, %v1973_v17 }
  0x45   :  { %1117 = vmatprep.mubr.bf16.mxu1 %v1563_v38  ;;  %1446 = vperm.xlu0 %1906, %v1396_v23   ;;  %v82_v38 = vld [vmem:[%s2571_s0 + $0xf0] sm:$0xff]  ;;  %28 = vst.msk [vmem:[#allocation2 + $0x40] sm:$0xff] %vm19_vm0, %v1973_v17  ;;  %29 = vst.msk [vmem:[#allocation2 + $0x48] sm:$0xff] %vm19_vm0, %v1973_v17 }
  0x46   :  { %v1549_v45 = vcombine.high %v78_v37, %v82_v38  ;;  %30 = vst.msk [vmem:[#allocation2 + $0x50] sm:$0xff] %vm19_vm0, %v1973_v17  ;;  %31 = vst.msk [vmem:[#allocation2 + $0x58] sm:$0xff] %vm19_vm0, %v1973_v17 }
  0x47   :  { %1451 = vperm.xlu1 %1907, %v1397_v24   ;;  %32 = vst.msk [vmem:[#allocation2 + $0x60] sm:$0xff] %vm19_vm0, %v1973_v17  ;;  %33 = vst.msk [vmem:[#allocation2 + $0x68] sm:$0xff] %vm19_vm0, %v1973_v17 }
  0x48   :  { %34 = vst.msk [vmem:[#allocation2 + $0x70] sm:$0xff] %vm19_vm0, %v1973_v17  ;;  %35 = vst.msk [vmem:[#allocation2 + $0x78] sm:$0xff] %vm19_vm0, %v1973_v17 }
  0x49   :  { %1456 = vperm.xlu0 %1906, %v1398_v29  }
  0x4b   :  { %1021 = vmatmul.mubr.bf16.gmra.mrb[20].mxu0 %v1560_v48  ;;  %1461 = vperm.xlu1 %1907, %v1399_v31   ;;  %v90_v48 = vld [vmem:[%s2571_s0 + $0x130] sm:$0xff] }
  0x4c   :  { %1118 = vmatmul.mubr.bf16.gmra.mrb[20].mxu1 %v1562_v50  ;;  %1028 = vmatprep.mubr.bf16.mxu0 %v1569_v51  ;;  %v91_v50 = vld [vmem:[%s2571_s0 + $0x138] sm:$0xff]  ;;  %v1548_v51 = vcombine.low %v78_v37, %v82_v38 }
  0x4d   :  { %1125 = vmatprep.mubr.bf16.mxu1 %v1571_v53  ;;  %1466 = vperm.xlu0 %1906, %v1400_v35   ;;  %v1557_v53 = vcombine.high %v86_v47, %v90_v48  ;;  %v1559_v54 = vcombine.high %v87_v49, %v91_v50 }
  0x4f   :  { %1471 = vperm.xlu1 %1907, %v1401_v36  }
  0x51   :  { %1476 = vperm.xlu0 %1906, %v1402_v41  }
  0x53   :  { %1029 = vmatmul.mubr.bf16.gmra.mrb[24].mxu0 %v1568_v59  ;;  %1481 = vperm.xlu1 %1907, %v1403_v43   ;;  %v1556_v59 = vcombine.low %v86_v47, %v90_v48 }
  0x54   :  { %1126 = vmatmul.mubr.bf16.gmra.mrb[24].mxu1 %v1570_v60  ;;  %1036 = vmatprep.mubr.bf16.mxu0 %v1577_v61  ;;  %v1558_v60 = vcombine.low %v87_v49, %v91_v50  ;;  %v1565_v61 = vcombine.high %v94_v55, %v98_v56 }
  0x55   :  { %1133 = vmatprep.mubr.bf16.mxu1 %v1579_v62  ;;  %v1567_v62 = vcombine.high %v95_v57, %v99_v58 }
  0x5b   :  { %1037 = vmatmul.mubr.bf16.gmra.mrb[28].mxu0 %v1576_v6  ;;  %v1575_v6 = vcombine.high %v103_v1, %v107_v2 }
  0x5c   :  { %1134 = vmatmul.mubr.bf16.gmra.mrb[28].mxu1 %v1578_v8  ;;  %1174 = vmatprep.mubr.bf16.mxu0 %v1525_v9  ;;  %v114_v8 = vld [vmem:[%s2571_s0 + $0x1f0] sm:$0xff]  ;;  %v111_v9 = vld [vmem:[%s2571_s0 + $0x1d8] sm:$0xff] }
  0x5d   :  { %1271 = vmatprep.mubr.bf16.mxu1 %v1527_v10  ;;  %v115_v10 = vld [vmem:[%s2571_s0 + $0x1f8] sm:$0xff]  ;;  %v1581_v13 = vcombine.high %v110_v7, %v114_v8  ;;  %v1580_v15 = vcombine.low %v110_v7, %v114_v8 }
  0x5e   :  { %v1583_v14 = vcombine.high %v111_v9, %v115_v10  ;;  %v1582_v16 = vcombine.low %v111_v9, %v115_v10 }
  0x63   :  { %1175 = vmatmul.mubr.bf16.vlgmr.msra.gmra.mrb[32].mxu0 %v1524_v18 }
  0x64   :  { %1272 = vmatmul.mubr.bf16.vlgmr.msra.gmra.mrb[32].mxu1 %v1526_v20  ;;  %1182 = vmatprep.mubr.bf16.mxu0 %v1533_v21 }
  0x65   :  { %1279 = vmatprep.mubr.bf16.mxu1 %v1535_v22 }
  0x6b   :  { %1183 = vmatmul.mubr.bf16.gmra.mrb[36].mxu0 %v1532_v30 }
  0x6c   :  { %1280 = vmatmul.mubr.bf16.gmra.mrb[36].mxu1 %v1534_v32  ;;  %1190 = vmatprep.mubr.bf16.mxu0 %v1541_v33 }
  0x6d   :  { %1287 = vmatprep.mubr.bf16.mxu1 %v1543_v34 }
  0x73   :  { %1191 = vmatmul.mubr.bf16.gmra.mrb[40].mxu0 %v1540_v42 }
  0x74   :  { %1288 = vmatmul.mubr.bf16.gmra.mrb[40].mxu1 %v1542_v44  ;;  %1198 = vmatprep.mubr.bf16.mxu0 %v1549_v45 }
  0x75   :  { %1295 = vmatprep.mubr.bf16.mxu1 %v1551_v46 }
  0x7b   :  { %1199 = vmatmul.mubr.bf16.gmra.mrb[44].mxu0 %v1548_v51 }
  0x7c   :  { %1296 = vmatmul.mubr.bf16.gmra.mrb[44].mxu1 %v1550_v52  ;;  %1206 = vmatprep.mubr.bf16.mxu0 %v1557_v53 }
  0x7d   :  { %1303 = vmatprep.mubr.bf16.mxu1 %v1559_v54 }
  0x83   :  { %1207 = vmatmul.mubr.bf16.gmra.mrb[48].mxu0 %v1556_v59 }
  0x84   :  { %1304 = vmatmul.mubr.bf16.gmra.mrb[48].mxu1 %v1558_v60  ;;  %1214 = vmatprep.mubr.bf16.mxu0 %v1565_v61 }
  0x85   :  { %1311 = vmatprep.mubr.bf16.mxu1 %v1567_v62 }
  0x8b   :  { %1215 = vmatmul.mubr.bf16.gmra.mrb[52].mxu0 %v1564_v3 }
  0x8c   :  { %1312 = vmatmul.mubr.bf16.gmra.mrb[52].mxu1 %v1566_v4  ;;  %1222 = vmatprep.mubr.bf16.mxu0 %v1573_v5 }
  0x8d   :  { %1319 = vmatprep.mubr.bf16.mxu1 %v1575_v6 }
  0x93   :  { %1223 = vmatmul.mubr.bf16.gmra.mrb[56].mxu0 %v1572_v11 }
  0x94   :  { %1320 = vmatmul.mubr.bf16.gmra.mrb[56].mxu1 %v1574_v12  ;;  %1230 = vmatprep.mubr.bf16.mxu0 %v1581_v13 }
  0x95   :  { %1327 = vmatprep.mubr.bf16.mxu1 %v1583_v14 }
  0x9b   :  { %1231 = vmatmul.mubr.bf16.gmra.mrb[60].mxu0 %v1580_v15 }
  0x9c   :  { %1328 = vmatmul.mubr.bf16.gmra.mrb[60].mxu1 %v1582_v16 }
  0xf6   :  { %v1664_v18 = vpop.f32.mrb[0].mxu0 }
  0xf7   :  { %v1728_v19 = vpop.f32.mrb[0].mxu1  ;;  %v1665_v20 = vpop.f32.mrb[1].mxu0 }
  0xf8   :  { %v1666_v21 = vadd.f32 %v1665_v20, %v1664_v18  ;;  %v1729_v22 = vpop.f32.mrb[1].mxu1  ;;  %v1667_v23 = vpop.f32.mrb[2].mxu0 }
  0xf9   :  { %v1730_v24 = vadd.f32 %v1729_v22, %v1728_v19  ;;  %v1731_v25 = vpop.f32.mrb[2].mxu1  ;;  %v1668_v26 = vpop.f32.mrb[3].mxu0 }
  0xfa   :  { %v1669_v27 = vadd.f32 %v1668_v26, %v1667_v23  ;;  %v1732_v28 = vpop.f32.mrb[3].mxu1 }
  0xfb   :  { %v2442_v29 = vadd.f32 %v1730_v24, %v1666_v21  ;;  %v1733_v30 = vadd.f32 %v1732_v28, %v1731_v25 }
  0xfd   :  { %v2444_v31 = vadd.f32 %v1733_v30, %v1669_v27 }
  0xfe   :  { %v1670_v32 = vpop.f32.mrb[4].mxu0 }
  0xff   :  { %v1734_v33 = vpop.f32.mrb[4].mxu1  ;;  %v1671_v34 = vpop.f32.mrb[5].mxu0 }
 0x100   :  { %v1672_v35 = vadd.f32 %v1671_v34, %v1670_v32  ;;  %v1735_v36 = vpop.f32.mrb[5].mxu1  ;;  %v1673_v37 = vpop.f32.mrb[6].mxu0 }
 0x101   :  { %v1736_v38 = vadd.f32 %v1735_v36, %v1734_v33  ;;  %v1737_v39 = vpop.f32.mrb[6].mxu1  ;;  %v1674_v40 = vpop.f32.mrb[7].mxu0 }
 0x102   :  { %v1675_v41 = vadd.f32 %v1674_v40, %v1673_v37  ;;  %v1738_v42 = vpop.f32.mrb[7].mxu1 }
 0x103   :  { %v2446_v43 = vadd.f32 %v1736_v38, %v1672_v35  ;;  %v1739_v44 = vadd.f32 %v1738_v42, %v1737_v39 }
 0x105   :  { %v2448_v45 = vadd.f32 %v1739_v44, %v1675_v41 }
 0x106   :  { %v1676_v46 = vpop.f32.mrb[8].mxu0 }
 0x107   :  { %v1740_v47 = vpop.f32.mrb[8].mxu1  ;;  %v1677_v48 = vpop.f32.mrb[9].mxu0 }
 0x108   :  { %v1678_v49 = vadd.f32 %v1677_v48, %v1676_v46  ;;  %v1741_v50 = vpop.f32.mrb[9].mxu1  ;;  %v1679_v51 = vpop.f32.mrb[10].mxu0 }
 0x109   :  { %v1742_v52 = vadd.f32 %v1741_v50, %v1740_v47  ;;  %v1743_v53 = vpop.f32.mrb[10].mxu1  ;;  %v1680_v54 = vpop.f32.mrb[11].mxu0 }
 0x10a   :  { %v1681_v55 = vadd.f32 %v1680_v54, %v1679_v51  ;;  %v1744_v56 = vpop.f32.mrb[11].mxu1 }
 0x10b   :  { %v2450_v57 = vadd.f32 %v1742_v52, %v1678_v49  ;;  %v1745_v58 = vadd.f32 %v1744_v56, %v1743_v53 }
 0x10d   :  { %v2452_v59 = vadd.f32 %v1745_v58, %v1681_v55 }
 0x10e   :  { %v1682_v60 = vpop.f32.mrb[12].mxu0 }
 0x10f   :  { %v1746_v61 = vpop.f32.mrb[12].mxu1  ;;  %v1683_v62 = vpop.f32.mrb[13].mxu0 }
 0x110   :  { %v1684_v63 = vadd.f32 %v1683_v62, %v1682_v60  ;;  %v1747_v0 = vpop.f32.mrb[13].mxu1  ;;  %v1685_v1 = vpop.f32.mrb[14].mxu0 }
 0x111   :  { %v1748_v2 = vadd.f32 %v1747_v0, %v1746_v61  ;;  %v1749_v3 = vpop.f32.mrb[14].mxu1  ;;  %v1686_v4 = vpop.f32.mrb[15].mxu0 }
 0x112   :  { %v1687_v5 = vadd.f32 %v1686_v4, %v1685_v1  ;;  %v1750_v6 = vpop.f32.mrb[15].mxu1 }
 0x113   :  { %v2454_v7 = vadd.f32 %v1748_v2, %v1684_v63  ;;  %v1751_v8 = vadd.f32 %v1750_v6, %v1749_v3 }
 0x115   :  { %v2456_v9 = vadd.f32 %v1751_v8, %v1687_v5 }
 0x116   :  { %v1688_v10 = vpop.f32.mrb[16].mxu0 }
 0x117   :  { %v1752_v11 = vpop.f32.mrb[16].mxu1  ;;  %v1689_v12 = vpop.f32.mrb[17].mxu0 }
 0x118   :  { %v1690_v13 = vadd.f32 %v1689_v12, %v1688_v10  ;;  %v1753_v14 = vpop.f32.mrb[17].mxu1  ;;  %v1691_v15 = vpop.f32.mrb[18].mxu0 }
 0x119   :  { %v1754_v16 = vadd.f32 %v1753_v14, %v1752_v11  ;;  %v1755_v17 = vpop.f32.mrb[18].mxu1  ;;  %v1692_v18 = vpop.f32.mrb[19].mxu0 }
 0x11a   :  { %v1693_v19 = vadd.f32 %v1692_v18, %v1691_v15  ;;  %v1756_v20 = vpop.f32.mrb[19].mxu1 }
 0x11b   :  { %v2458_v21 = vadd.f32 %v1754_v16, %v1690_v13  ;;  %v1757_v22 = vadd.f32 %v1756_v20, %v1755_v17 }
 0x11d   :  { %v2460_v23 = vadd.f32 %v1757_v22, %v1693_v19 }
 0x11e   :  { %v1694_v24 = vpop.f32.mrb[20].mxu0 }
 0x11f   :  { %v1758_v25 = vpop.f32.mrb[20].mxu1  ;;  %v1695_v26 = vpop.f32.mrb[21].mxu0 }
 0x120   :  { %v1696_v27 = vadd.f32 %v1695_v26, %v1694_v24  ;;  %v1759_v28 = vpop.f32.mrb[21].mxu1  ;;  %v1697_v30 = vpop.f32.mrb[22].mxu0  ;;  %v36_v24 = vld [vmem:[#allocation2] sm:$0xff] }
 0x121   :  { %v1760_v32 = vadd.f32 %v1759_v28, %v1758_v25  ;;  %v1761_v33 = vpop.f32.mrb[22].mxu1  ;;  %v1698_v34 = vpop.f32.mrb[23].mxu0  ;;  %v37_v28 = vld [vmem:[#allocation2 + $0x8] sm:$0xff] }
 0x122   :  { %v1699_v35 = vadd.f32 %v1698_v34, %v1697_v30  ;;  %v1762_v36 = vpop.f32.mrb[23].mxu1  ;;  %v1407_v34 = vpop.permute.xlu0 %1406 }
 0x123   :  { %v2462_v37 = vadd.f32 %v1760_v32, %v1696_v27  ;;  %v1763_v38 = vadd.f32 %v1762_v36, %v1761_v33 }
 0x125   :  { %v2464_v39 = vadd.f32 %v1763_v38, %v1699_v35 }
 0x126   :  { %v1700_v40 = vpop.f32.mrb[24].mxu0 }
 0x127   :  { %v1764_v41 = vpop.f32.mrb[24].mxu1  ;;  %v1701_v42 = vpop.f32.mrb[25].mxu0 }
 0x128   :  { %v1702_v44 = vadd.f32 %v1701_v42, %v1700_v40  ;;  %v1765_v46 = vpop.f32.mrb[25].mxu1  ;;  %v1703_v47 = vpop.f32.mrb[26].mxu0 }
 0x129   :  { %v1766_v48 = vadd.f32 %v1765_v46, %v1764_v41  ;;  %v1767_v49 = vpop.f32.mrb[26].mxu1  ;;  %v1704_v50 = vpop.f32.mrb[27].mxu0 }
 0x12a   :  { %v1705_v51 = vadd.f32 %v1704_v50, %v1703_v47  ;;  %v1768_v52 = vpop.f32.mrb[27].mxu1 }
 0x12b   :  { %v2466_v53 = vadd.f32 %v1766_v48, %v1702_v44  ;;  %v1769_v54 = vadd.f32 %v1768_v52, %v1767_v49  ;;  %v38_v49 = vld [vmem:[#allocation2 + $0x10] sm:$0xff] }
 0x12d   :  { %v2468_v55 = vadd.f32 %v1769_v54, %v1705_v51  ;;  %v39_v54 = vld [vmem:[#allocation2 + $0x18] sm:$0xff] }
 0x12e   :  { %v1706_v56 = vpop.f32.mrb[28].mxu0 }
 0x12f   :  { %v1770_v58 = vpop.f32.mrb[28].mxu1  ;;  %v1707_v60 = vpop.f32.mrb[29].mxu0 }
 0x130   :  { %v1708_v61 = vadd.f32 %v1707_v60, %v1706_v56  ;;  %v1771_v62 = vpop.f32.mrb[29].mxu1  ;;  %v1709_v63 = vpop.f32.mrb[30].mxu0 }
 0x131   :  { %v1772_v0 = vadd.f32 %v1771_v62, %v1770_v58  ;;  %v1773_v1 = vpop.f32.mrb[30].mxu1  ;;  %v1710_v2 = vpop.f32.mrb[31].mxu0 }
 0x132   :  { %v1711_v3 = vadd.f32 %v1710_v2, %v1709_v63  ;;  %v1774_v4 = vpop.f32.mrb[31].mxu1  ;;  %v1417_v56 = vpop.permute.xlu1 %1416 }
 0x133   :  { %v2470_v5 = vadd.f32 %v1772_v0, %v1708_v61  ;;  %v1775_v6 = vadd.f32 %v1774_v4, %v1773_v1  ;;  %v1412_v62 = vpop.permute.xlu0 %1411 }
 0x135   :  { %v2472_v8 = vadd.f32 %v1775_v6, %v1711_v3 }
 0x136   :  { %v1792_v10 = vpop.f32.mrb[32].mxu0 }
 0x137   :  { %v1856_v11 = vpop.f32.mrb[32].mxu1  ;;  %v1793_v12 = vpop.f32.mrb[33].mxu0 }
 0x138   :  { %v1794_v13 = vadd.f32 %v1793_v12, %v1792_v10  ;;  %v1857_v14 = vpop.f32.mrb[33].mxu1  ;;  %v1795_v15 = vpop.f32.mrb[34].mxu0 }
 0x139   :  { %v1858_v16 = vadd.f32 %v1857_v14, %v1856_v11  ;;  %v1859_v17 = vpop.f32.mrb[34].mxu1  ;;  %v1796_v18 = vpop.f32.mrb[35].mxu0 }
 0x13a   :  { %v1177_v19 = vadd.f32 %v1794_v13, %v2442_v29  ;;  %v1797_v20 = vadd.f32 %v1796_v18, %v1795_v15  ;;  %v1860_v22 = vpop.f32.mrb[35].mxu1 }
 0x13b   :  { %v1861_v25 = vadd.f32 %v1860_v22, %v1859_v17  ;;  %v40_v17 = vld [vmem:[#allocation2 + $0x20] sm:$0xff]  ;;  %v41_v22 = vld [vmem:[#allocation2 + $0x28] sm:$0xff] }
 0x13c   :  { %v1274_v26 = vadd.f32 %v1858_v16, %v1177_v19  ;;  %v1180_v27 = vadd.f32 %v1797_v20, %v2444_v31 }
 0x13e   :  { %v1336_v30 = vadd.f32 %v1274_v26, %v36_v24  ;;  %v1277_v32 = vadd.f32 %v1861_v25, %v1180_v27  ;;  %v1798_v33 = vpop.f32.mrb[36].mxu0  ;;  %v1422_v26 = vpop.permute.xlu1 %1421 }
 0x13f   :  { %v1862_v35 = vpop.f32.mrb[36].mxu1  ;;  %v1799_v36 = vpop.f32.mrb[37].mxu0 }
 0x140   :  { %1353 = vst.msk [vmem:[#allocation2] sm:$0xff] %vm19_vm0, %v1336_v30  ;;  %v1337_v38 = vadd.f32 %v1277_v32, %v37_v28  ;;  %v1800_v40 = vadd.f32 %v1799_v36, %v1798_v33  ;;  %v1863_v41 = vpop.f32.mrb[37].mxu1  ;;  %v1801_v29 = vpop.f32.mrb[38].mxu0 }
 0x141   :  { %v1864_v42 = vadd.f32 %v1863_v41, %v1862_v35  ;;  %v1865_v44 = vpop.f32.mrb[38].mxu1  ;;  %v1802_v46 = vpop.f32.mrb[39].mxu0 }
 0x142   :  { %1354 = vst.msk [vmem:[#allocation2 + $0x8] sm:$0xff] %vm19_vm0, %v1337_v38  ;;  %v1185_v31 = vadd.f32 %v1800_v40, %v2446_v43  ;;  %v1803_v47 = vadd.f32 %v1802_v46, %v1801_v29  ;;  %v1866_v48 = vpop.f32.mrb[39].mxu1 }
 0x143   :  { %v1867_v50 = vadd.f32 %v1866_v48, %v1865_v44 }
 0x144   :  { %v1282_v51 = vadd.f32 %v1864_v42, %v1185_v31  ;;  %v1188_v52 = vadd.f32 %v1803_v47, %v2448_v45  ;;  %v42_v31 = vld [vmem:[#allocation2 + $0x30] sm:$0xff] }
 0x146   :  { %v1338_v58 = vadd.f32 %v1282_v51, %v38_v49  ;;  %v1285_v60 = vadd.f32 %v1867_v50, %v1188_v52  ;;  %v1804_v61 = vpop.f32.mrb[40].mxu0  ;;  %v43_v50 = vld [vmem:[#allocation2 + $0x38] sm:$0xff]  ;;  %v1427_v51 = vpop.permute.xlu0 %1426 }
 0x147   :  { %v1372_v63 = vld [vmem:[#allocation2] sm:$0xff]  ;;  %v1868_v0 = vpop.f32.mrb[40].mxu1  ;;  %v1805_v1 = vpop.f32.mrb[41].mxu0 }
 0x148   :  { %1355 = vst.msk [vmem:[#allocation2 + $0x10] sm:$0xff] %vm19_vm0, %v1338_v58  ;;  %v1339_v2 = vadd.f32 %v1285_v60, %v39_v54  ;;  %v1484_v43 = vadd.f32 %v1407_v34, %v1372_v63  ;;  %v1806_v3 = vadd.f32 %v1805_v1, %v1804_v61  ;;  %v1869_v4 = vpop.f32.mrb[41].mxu1  ;;  %v1807_v6 = vpop.f32.mrb[42].mxu0 }
 0x149   :  { %v1870_v10 = vadd.f32 %v1869_v4, %v1868_v0  ;;  %v1871_v11 = vpop.f32.mrb[42].mxu1  ;;  %v1373_v12 = vld [vmem:[#allocation2 + $0x8] sm:$0xff]  ;;  %v1808_v45 = vpop.f32.mrb[43].mxu0 }
 0x14a   :  { %1356 = vst.msk [vmem:[#allocation2 + $0x18] sm:$0xff] %vm19_vm0, %v1339_v2  ;;  %1500 = vst.msk [vmem:[%s2573_s3] sm:$0xff] %vm19_vm0, %v1484_v43  ;;  %v1193_v13 = vadd.f32 %v1806_v3, %v2450_v57  ;;  %v1485_v14 = vadd.f32 %v1412_v62, %v1373_v12  ;;  %v1809_v15 = vadd.f32 %v1808_v45, %v1807_v6  ;;  %v1872_v16 = vpop.f32.mrb[43].mxu1  ;;  %v44_v45 = vld [vmem:[#allocation2 + $0x40] sm:$0xff] }
 0x14b   :  { %v1873_v18 = vadd.f32 %v1872_v16, %v1871_v11  ;;  %v1437_v16 = vpop.permute.xlu0 %1436 }
 0x14c   :  { %v1290_v19 = vadd.f32 %v1870_v10, %v1193_v13  ;;  %1501 = vst.msk [vmem:[%s2573_s3 + $0x8] sm:$0xff] %vm19_vm0, %v1485_v14  ;;  %v1196_v20 = vadd.f32 %v1809_v15, %v2452_v59 }
 0x14e   :  { %v1340_v24 = vadd.f32 %v1290_v19, %v40_v17  ;;  %v1293_v25 = vadd.f32 %v1873_v18, %v1196_v20  ;;  %v1810_v27 = vpop.f32.mrb[44].mxu0  ;;  %v45_v17 = vld [vmem:[#allocation2 + $0x48] sm:$0xff] }
 0x14f   :  { %v1374_v28 = vld [vmem:[#allocation2 + $0x10] sm:$0xff]  ;;  %v1874_v57 = vpop.f32.mrb[44].mxu1  ;;  %v1811_v30 = vpop.f32.mrb[45].mxu0 }
 0x150   :  { %1357 = vst.msk [vmem:[#allocation2 + $0x20] sm:$0xff] %vm19_vm0, %v1340_v24  ;;  %v1341_v32 = vadd.f32 %v1293_v25, %v41_v22  ;;  %v1486_v33 = vadd.f32 %v1417_v56, %v1374_v28  ;;  %v1812_v34 = vadd.f32 %v1811_v30, %v1810_v27  ;;  %v1875_v35 = vpop.f32.mrb[45].mxu1  ;;  %v1813_v36 = vpop.f32.mrb[46].mxu0 }
 0x151   :  { %v1375_v38 = vld [vmem:[#allocation2 + $0x18] sm:$0xff]  ;;  %v1876_v40 = vadd.f32 %v1875_v35, %v1874_v57  ;;  %v1877_v41 = vpop.f32.mrb[46].mxu1  ;;  %v1814_v29 = vpop.f32.mrb[47].mxu0 }
 0x152   :  { %1358 = vst.msk [vmem:[#allocation2 + $0x28] sm:$0xff] %vm19_vm0, %v1341_v32  ;;  %1502 = vst.msk [vmem:[%s2573_s3 + $0x10] sm:$0xff] %vm19_vm0, %v1486_v33  ;;  %v1487_v59 = vadd.f32 %v1422_v26, %v1375_v38  ;;  %v1201_v42 = vadd.f32 %v1812_v34, %v2454_v7  ;;  %v1815_v44 = vadd.f32 %v1814_v29, %v1813_v36  ;;  %v1878_v46 = vpop.f32.mrb[47].mxu1  ;;  %v1432_v56 = vpop.permute.xlu1 %1431 }
 0x153   :  { %v1879_v47 = vadd.f32 %v1878_v46, %v1877_v41  ;;  %v46_v41 = vld [vmem:[#allocation2 + $0x50] sm:$0xff]  ;;  %v47_v46 = vld [vmem:[#allocation2 + $0x58] sm:$0xff] }
 0x154   :  { %1503 = vst.msk [vmem:[%s2573_s3 + $0x18] sm:$0xff] %vm19_vm0, %v1487_v59  ;;  %v1298_v48 = vadd.f32 %v1876_v40, %v1201_v42  ;;  %v1204_v49 = vadd.f32 %v1815_v44, %v2456_v9  ;;  %v1447_v44 = vpop.permute.xlu0 %1446 }
 0x156   :  { %v1342_v52 = vadd.f32 %v1298_v48, %v42_v31  ;;  %v1301_v54 = vadd.f32 %v1879_v47, %v1204_v49  ;;  %v1816_v58 = vpop.f32.mrb[48].mxu0  ;;  %v1442_v18 = vpop.permute.xlu1 %1441 }
 0x157   :  { %v1376_v60 = vld [vmem:[#allocation2 + $0x20] sm:$0xff]  ;;  %v1880_v7 = vpop.f32.mrb[48].mxu1  ;;  %v1817_v61 = vpop.f32.mrb[49].mxu0 }
 0x158   :  { %1359 = vst.msk [vmem:[#allocation2 + $0x30] sm:$0xff] %vm19_vm0, %v1342_v52  ;;  %v1343_v62 = vadd.f32 %v1301_v54, %v43_v50  ;;  %v1488_v63 = vadd.f32 %v1427_v51, %v1376_v60  ;;  %v1818_v0 = vadd.f32 %v1817_v61, %v1816_v58  ;;  %v1881_v1 = vpop.f32.mrb[49].mxu1  ;;  %v1819_v2 = vpop.f32.mrb[50].mxu0 }
 0x159   :  { %v1377_v43 = vld [vmem:[#allocation2 + $0x28] sm:$0xff]  ;;  %v1882_v3 = vadd.f32 %v1881_v1, %v1880_v7  ;;  %v1883_v4 = vpop.f32.mrb[50].mxu1  ;;  %v1820_v9 = vpop.f32.mrb[51].mxu0 }
 0x15a   :  { %1360 = vst.msk [vmem:[#allocation2 + $0x38] sm:$0xff] %vm19_vm0, %v1343_v62  ;;  %v1489_v6 = vadd.f32 %v1432_v56, %v1377_v43  ;;  %1504 = vst.msk [vmem:[%s2573_s3 + $0x20] sm:$0xff] %vm19_vm0, %v1488_v63  ;;  %v1209_v10 = vadd.f32 %v1818_v0, %v2458_v21  ;;  %v1821_v11 = vadd.f32 %v1820_v9, %v1819_v2  ;;  %v1884_v12 = vpop.f32.mrb[51].mxu1  ;;  %v1452_v31 = vpop.permute.xlu1 %1451  ;;  %v48_v43 = vld [vmem:[#allocation2 + $0x60] sm:$0xff] }
 0x15b   :  { %v1885_v13 = vadd.f32 %v1884_v12, %v1883_v4 }
 0x15c   :  { %1505 = vst.msk [vmem:[%s2573_s3 + $0x28] sm:$0xff] %vm19_vm0, %v1489_v6  ;;  %v1306_v14 = vadd.f32 %v1882_v3, %v1209_v10  ;;  %v1212_v15 = vadd.f32 %v1821_v11, %v2460_v23  ;;  %v1457_v6 = vpop.permute.xlu0 %1456  ;;  %v49_v10 = vld [vmem:[#allocation2 + $0x68] sm:$0xff] }
 0x15e   :  { %v1344_v19 = vadd.f32 %v1306_v14, %v44_v45  ;;  %v1309_v20 = vadd.f32 %v1885_v13, %v1212_v15  ;;  %v1822_v22 = vpop.f32.mrb[52].mxu0  ;;  %v1462_v11 = vpop.permute.xlu1 %1461 }
 0x15f   :  { %v1378_v24 = vld [vmem:[#allocation2 + $0x30] sm:$0xff]  ;;  %v1886_v21 = vpop.f32.mrb[52].mxu1  ;;  %v1823_v25 = vpop.f32.mrb[53].mxu0 }
 0x160   :  { %v1490_v26 = vadd.f32 %v1437_v16, %v1378_v24  ;;  %1361 = vst.msk [vmem:[#allocation2 + $0x40] sm:$0xff] %vm19_vm0, %v1344_v19  ;;  %v1345_v27 = vadd.f32 %v1309_v20, %v45_v17  ;;  %v1824_v28 = vadd.f32 %v1823_v25, %v1822_v22  ;;  %v1887_v57 = vpop.f32.mrb[53].mxu1  ;;  %v1825_v30 = vpop.f32.mrb[54].mxu0 }
 0x161   :  { %v1379_v32 = vld [vmem:[#allocation2 + $0x38] sm:$0xff]  ;;  %v1888_v33 = vadd.f32 %v1887_v57, %v1886_v21  ;;  %v1889_v34 = vpop.f32.mrb[54].mxu1  ;;  %v1826_v23 = vpop.f32.mrb[55].mxu0  ;;  %v50_v57 = vld [vmem:[#allocation2 + $0x70] sm:$0xff] }
 0x162   :  { %v1491_v35 = vadd.f32 %v1442_v18, %v1379_v32  ;;  %1506 = vst.msk [vmem:[%s2573_s3 + $0x30] sm:$0xff] %vm19_vm0, %v1490_v26  ;;  %1362 = vst.msk [vmem:[#allocation2 + $0x48] sm:$0xff] %vm19_vm0, %v1345_v27  ;;  %v1217_v36 = vadd.f32 %v1824_v28, %v2462_v37  ;;  %v1827_v38 = vadd.f32 %v1826_v23, %v1825_v30  ;;  %v1890_v40 = vpop.f32.mrb[55].mxu1 }
 0x163   :  { %v1891_v29 = vadd.f32 %v1890_v40, %v1889_v34  ;;  %v51_v34 = vld [vmem:[#allocation2 + $0x78] sm:$0xff] }
 0x164   :  { %1507 = vst.msk [vmem:[%s2573_s3 + $0x38] sm:$0xff] %vm19_vm0, %v1491_v35  ;;  %v1314_v59 = vadd.f32 %v1888_v33, %v1217_v36  ;;  %v1220_v42 = vadd.f32 %v1827_v38, %v2464_v39  ;;  %v1467_v36 = vpop.permute.xlu0 %1466 }
 0x166   :  { %v1346_v47 = vadd.f32 %v1314_v59, %v46_v41  ;;  %v1317_v48 = vadd.f32 %v1891_v29, %v1220_v42  ;;  %v1828_v49 = vpop.f32.mrb[56].mxu0  ;;  %v1472_v41 = vpop.permute.xlu1 %1471 }
 0x167   :  { %v1380_v50 = vld [vmem:[#allocation2 + $0x40] sm:$0xff]  ;;  %v1892_v37 = vpop.f32.mrb[56].mxu1  ;;  %v1829_v51 = vpop.f32.mrb[57].mxu0 }
 0x168   :  { %v1492_v52 = vadd.f32 %v1447_v44, %v1380_v50  ;;  %1363 = vst.msk [vmem:[#allocation2 + $0x50] sm:$0xff] %vm19_vm0, %v1346_v47  ;;  %v1347_v54 = vadd.f32 %v1317_v48, %v47_v46  ;;  %v1830_v56 = vadd.f32 %v1829_v51, %v1828_v49  ;;  %v1893_v58 = vpop.f32.mrb[57].mxu1  ;;  %v1831_v60 = vpop.f32.mrb[58].mxu0 }
 0x169   :  { %v1381_v7 = vld [vmem:[#allocation2 + $0x48] sm:$0xff]  ;;  %v1894_v61 = vadd.f32 %v1893_v58, %v1892_v37  ;;  %v1895_v62 = vpop.f32.mrb[58].mxu1  ;;  %v1832_v39 = vpop.f32.mrb[59].mxu0 }
 0x16a   :  { %v1493_v63 = vadd.f32 %v1452_v31, %v1381_v7  ;;  %1508 = vst.msk [vmem:[%s2573_s3 + $0x40] sm:$0xff] %vm19_vm0, %v1492_v52  ;;  %1364 = vst.msk [vmem:[#allocation2 + $0x58] sm:$0xff] %vm19_vm0, %v1347_v54  ;;  %v1225_v0 = vadd.f32 %v1830_v56, %v2466_v53  ;;  %v1833_v1 = vadd.f32 %v1832_v39, %v1831_v60  ;;  %v1896_v2 = vpop.f32.mrb[59].mxu1  ;;  %v1482_v46 = vpop.permute.xlu1 %1481 }
 0x16b   :  { %v1897_v3 = vadd.f32 %v1896_v2, %v1895_v62 }
 0x16c   :  { %1509 = vst.msk [vmem:[%s2573_s3 + $0x48] sm:$0xff] %vm19_vm0, %v1493_v63  ;;  %v1322_v4 = vadd.f32 %v1894_v61, %v1225_v0  ;;  %v1228_v9 = vadd.f32 %v1833_v1, %v2468_v55 }
 0x16e   :  { %v1348_v12 = vadd.f32 %v1322_v4, %v48_v43  ;;  %v1325_v45 = vadd.f32 %v1897_v3, %v1228_v9  ;;  %v1834_v13 = vpop.f32.mrb[60].mxu0 }
 0x16f   :  { %v1382_v14 = vld [vmem:[#allocation2 + $0x50] sm:$0xff]  ;;  %v1898_v53 = vpop.f32.mrb[60].mxu1  ;;  %v1835_v15 = vpop.f32.mrb[61].mxu0 }
 0x170   :  { %v1494_v16 = vadd.f32 %v1457_v6, %v1382_v14  ;;  %1365 = vst.msk [vmem:[#allocation2 + $0x60] sm:$0xff] %vm19_vm0, %v1348_v12  ;;  %v1349_v17 = vadd.f32 %v1325_v45, %v49_v10  ;;  %v1836_v18 = vadd.f32 %v1835_v15, %v1834_v13  ;;  %v1899_v19 = vpop.f32.mrb[61].mxu1  ;;  %v1837_v20 = vpop.f32.mrb[62].mxu0 }
 0x171   :  { %v1383_v22 = vld [vmem:[#allocation2 + $0x58] sm:$0xff]  ;;  %v1900_v24 = vadd.f32 %v1899_v19, %v1898_v53  ;;  %v1901_v21 = vpop.f32.mrb[62].mxu1  ;;  %v1838_v55 = vpop.f32.mrb[63].mxu0 }
 0x172   :  { %1510 = vst.msk [vmem:[%s2573_s3 + $0x50] sm:$0xff] %vm19_vm0, %v1494_v16  ;;  %v1495_v25 = vadd.f32 %v1462_v11, %v1383_v22  ;;  %1366 = vst.msk [vmem:[#allocation2 + $0x68] sm:$0xff] %vm19_vm0, %v1349_v17  ;;  %v1233_v26 = vadd.f32 %v1836_v18, %v2470_v5  ;;  %v1839_v27 = vadd.f32 %v1838_v55, %v1837_v20  ;;  %v1902_v28 = vpop.f32.mrb[63].mxu1 }
 0x173   :  { %v1903_v30 = vadd.f32 %v1902_v28, %v1901_v21 }
 0x174   :  { %1511 = vst.msk [vmem:[%s2573_s3 + $0x58] sm:$0xff] %vm19_vm0, %v1495_v25  ;;  %v1330_v32 = vadd.f32 %v1900_v24, %v1233_v26  ;;  %v1236_v33 = vadd.f32 %v1839_v27, %v2472_v8  ;;  %v1477_v8 = vpop.permute.xlu0 %1476 }
 0x176   :  { %v1350_v23 = vadd.f32 %v1330_v32, %v50_v57  ;;  %v1333_v35 = vadd.f32 %v1903_v30, %v1236_v33 }
 0x177   :  { %v1384_v38 = vld [vmem:[#allocation2 + $0x60] sm:$0xff] }
 0x178   :  { %v1496_v40 = vadd.f32 %v1467_v36, %v1384_v38  ;;  %1367 = vst.msk [vmem:[#allocation2 + $0x70] sm:$0xff] %vm19_vm0, %v1350_v23  ;;  %v1351_v5 = vadd.f32 %v1333_v35, %v51_v34 }
 0x179   :  { %v1385_v29 = vld [vmem:[#allocation2 + $0x68] sm:$0xff] }
 0x17a   :  { %1512 = vst.msk [vmem:[%s2573_s3 + $0x60] sm:$0xff] %vm19_vm0, %v1496_v40  ;;  %v1497_v59 = vadd.f32 %v1472_v41, %v1385_v29  ;;  %1368 = vst.msk [vmem:[#allocation2 + $0x78] sm:$0xff] %vm19_vm0, %v1351_v5 }
 0x17c   :  { %1513 = vst.msk [vmem:[%s2573_s3 + $0x68] sm:$0xff] %vm19_vm0, %v1497_v59 }
 0x17f   :  { %v1386_v42 = vld [vmem:[#allocation2 + $0x70] sm:$0xff] }
 0x180   :  { %v1498_v44 = vadd.f32 %v1477_v8, %v1386_v42 }
 0x181   :  { %v1387_v31 = vld [vmem:[#allocation2 + $0x78] sm:$0xff] }
 0x182   :  { %1514 = vst.msk [vmem:[%s2573_s3 + $0x70] sm:$0xff] %vm19_vm0, %v1498_v44  ;;  %v1499_v47 = vadd.f32 %v1482_v46, %v1387_v31 }
 0x184   :  { %1515 = vst.msk [vmem:[%s2573_s3 + $0x78] sm:$0xff] %vm19_vm0, %v1499_v47 }

// kernel: discriminator_forward.18
= control target key start
LH: loop header
LB: loop body
LE: loop exit
PB: predicated region body
PF: predicated region fallthrough
CT: control target
= control target key end

     0   :  { %vm85_vm0 = vcmask 261120   ;;  %vm20_vm1 = vcmask 7168   ;;  %v579_v3 = vmov 0.0   ;;  %s1095_s0 = inlined_call_operand.vmem [shape: f32[128,32], index: 0, kind: input, shape index: {}]   ;;  %s1096_s1 = inlined_call_operand.vmem [shape: f32[128,1], index: 1, kind: input, shape index: {}]   ;;  %s1097_s2 = inlined_call_operand.vmem [shape: f32[128,1], index: 2, kind: input, shape index: {}]   ;;  %s1098_s3 = inlined_call_operand.vmem [shape: f32[128,1], index: 3, kind: output, shape index: {0}]   ;;  %s1099_s4 = inlined_call_operand.vmem [shape: f32[128,1], index: 4, kind: output, shape index: {1}]  }
   0x1   :  { %v608_v0 = vld [vmem:[%s1095_s0 + $0x10] sm:$0xff]  ;;  %v613_v1 = vld [vmem:[%s1095_s0] sm:$0xff]  ;;  %v618_v2 = vld [vmem:[%s1095_s0 + $0x18] sm:$0xff]  ;;  %23 = vst.msk [vmem:[#allocation2 + $0x10] sm:$0xff] %vm20_vm1, %v579_v3 }
   0x2   :  { %21 = vst.msk [vmem:[#allocation2] sm:$0xff] %vm20_vm1, %v579_v3  ;;  %22 = vst.msk [vmem:[#allocation2 + $0x8] sm:$0xff] %vm20_vm1, %v579_v3  ;;  %v92_v4 = vsel %vm85_vm0, %v608_v0, 0.0  ;;  %v86_v5 = vsel %vm85_vm0, %v613_v1, 0.0  ;;  %v54_v6 = vld [vmem:[%s1095_s0 + $0x8] sm:$0xff]  ;;  %v95_v7 = vsel %vm85_vm0, %v618_v2, 0.0  ;;  %v183_v31 = vmul.f32 %v613_v1, %v613_v1 }
   0x3   :  { %24 = vst.msk [vmem:[#allocation2 + $0x18] sm:$0xff] %vm20_vm1, %v579_v3  ;;  %25 = vst.msk [vmem:[#allocation2 + $0x20] sm:$0xff] %vm20_vm1, %v579_v3  ;;  %93 = vadd.xlane.f32.xlu1 %v92_v4  ;;  %87 = vadd.xlane.f32.xlu0 %v86_v5  ;;  %v89_v8 = vsel %vm85_vm0, %v54_v6, 0.0  ;;  %v58_v9 = vld [vmem:[%s1095_s0 + $0x28] sm:$0xff]  ;;  %v57_v10 = vld [vmem:[%s1095_s0 + $0x20] sm:$0xff]  ;;  %v184_v34 = vmul.f32 %v54_v6, %v54_v6  ;;  %v185_v35 = vmul.f32 %v608_v0, %v608_v0 }
   0x4   :  { %26 = vst.msk [vmem:[#allocation2 + $0x28] sm:$0xff] %vm20_vm1, %v579_v3  ;;  %27 = vst.msk [vmem:[#allocation2 + $0x30] sm:$0xff] %vm20_vm1, %v579_v3  ;;  %v101_v11 = vsel %vm85_vm0, %v58_v9, 0.0  ;;  %v98_v12 = vsel %vm85_vm0, %v57_v10, 0.0  ;;  %v60_v13 = vld [vmem:[%s1095_s0 + $0x38] sm:$0xff]  ;;  %v59_v14 = vld [vmem:[%s1095_s0 + $0x30] sm:$0xff]  ;;  %v186_v38 = vmul.f32 %v618_v2, %v618_v2  ;;  %v188_v41 = vmul.f32 %v58_v9, %v58_v9 }
   0x5   :  { %28 = vst.msk [vmem:[#allocation2 + $0x38] sm:$0xff] %vm20_vm1, %v579_v3  ;;  %29 = vst.msk [vmem:[#allocation2 + $0x40] sm:$0xff] %vm20_vm1, %v579_v3  ;;  %v107_v15 = vsel %vm85_vm0, %v60_v13, 0.0  ;;  %v104_v16 = vsel %vm85_vm0, %v59_v14, 0.0  ;;  %v62_v17 = vld [vmem:[%s1095_s0 + $0x48] sm:$0xff]  ;;  %v61_v18 = vld [vmem:[%s1095_s0 + $0x40] sm:$0xff]  ;;  %v187_v42 = vmul.f32 %v57_v10, %v57_v10  ;;  %v190_v45 = vmul.f32 %v60_v13, %v60_v13 }
   0x6   :  { %30 = vst.msk [vmem:[#allocation2 + $0x48] sm:$0xff] %vm20_vm1, %v579_v3  ;;  %31 = vst.msk [vmem:[#allocation2 + $0x50] sm:$0xff] %vm20_vm1, %v579_v3  ;;  %v113_v19 = vsel %vm85_vm0, %v62_v17, 0.0  ;;  %v110_v20 = vsel %vm85_vm0, %v61_v18, 0.0  ;;  %v64_v21 = vld [vmem:[%s1095_s0 + $0x58] sm:$0xff]  ;;  %v63_v22 = vld [vmem:[%s1095_s0 + $0x50] sm:$0xff]  ;;  %v189_v46 = vmul.f32 %v59_v14, %v59_v14  ;;  %v192_v49 = vmul.f32 %v62_v17, %v62_v17 }
   0x7   :  { %32 = vst.msk [vmem:[#allocation2 + $0x58] sm:$0xff] %vm20_vm1, %v579_v3  ;;  %33 = vst.msk [vmem:[#allocation2 + $0x60] sm:$0xff] %vm20_vm1, %v579_v3  ;;  %96 = vadd.xlane.f32.xlu1 %v95_v7  ;;  %90 = vadd.xlane.f32.xlu0 %v89_v8  ;;  %v119_v23 = vsel %vm85_vm0, %v64_v21, 0.0  ;;  %v116_v24 = vsel %vm85_vm0, %v63_v22, 0.0  ;;  %v66_v25 = vld [vmem:[%s1095_s0 + $0x68] sm:$0xff]  ;;  %v65_v26 = vld [vmem:[%s1095_s0 + $0x60] sm:$0xff]  ;;  %v191_v50 = vmul.f32 %v61_v18, %v61_v18 }
   0x8   :  { %34 = vst.msk [vmem:[#allocation2 + $0x68] sm:$0xff] %vm20_vm1, %v579_v3  ;;  %35 = vst.msk [vmem:[#allocation2 + $0x70] sm:$0xff] %vm20_vm1, %v579_v3  ;;  %v125_v27 = vsel %vm85_vm0, %v66_v25, 0.0  ;;  %v122_v28 = vsel %vm85_vm0, %v65_v26, 0.0  ;;  %v68_v29 = vld [vmem:[%s1095_s0 + $0x78] sm:$0xff]  ;;  %v67_v30 = vld [vmem:[%s1095_s0 + $0x70] sm:$0xff]  ;;  %v194_v53 = vmul.f32 %v64_v21, %v64_v21  ;;  %v193_v54 = vmul.f32 %v63_v22, %v63_v22 }
   0x9   :  { %36 = vst.msk [vmem:[#allocation2 + $0x78] sm:$0xff] %vm20_vm1, %v579_v3  ;;  %37 = vst.msk [vmem:[#allocation3] sm:$0xff] %vm20_vm1, %v579_v3  ;;  %v131_v32 = vsel %vm85_vm0, %v68_v29, 0.0  ;;  %v128_v33 = vsel %vm85_vm0, %v67_v30, 0.0  ;;  %v202_v36 = vsel %vm85_vm0, %v184_v34, 0.0  ;;  %v199_v37 = vsel %vm85_vm0, %v183_v31, 0.0 }
   0xa   :  { %38 = vst.msk [vmem:[#allocation3 + $0x8] sm:$0xff] %vm20_vm1, %v579_v3  ;;  %39 = vst.msk [vmem:[#allocation3 + $0x10] sm:$0xff] %vm20_vm1, %v579_v3  ;;  %v208_v39 = vsel %vm85_vm0, %v186_v38, 0.0  ;;  %v205_v40 = vsel %vm85_vm0, %v185_v35, 0.0  ;;  %v214_v43 = vsel %vm85_vm0, %v188_v41, 0.0  ;;  %v211_v44 = vsel %vm85_vm0, %v187_v42, 0.0 }
   0xb   :  { %40 = vst.msk [vmem:[#allocation3 + $0x18] sm:$0xff] %vm20_vm1, %v579_v3  ;;  %41 = vst.msk [vmem:[#allocation3 + $0x20] sm:$0xff] %vm20_vm1, %v579_v3  ;;  %102 = vadd.xlane.f32.xlu1 %v101_v11  ;;  %99 = vadd.xlane.f32.xlu0 %v98_v12  ;;  %v220_v47 = vsel %vm85_vm0, %v190_v45, 0.0  ;;  %v217_v48 = vsel %vm85_vm0, %v189_v46, 0.0  ;;  %v226_v51 = vsel %vm85_vm0, %v192_v49, 0.0  ;;  %v223_v52 = vsel %vm85_vm0, %v191_v50, 0.0 }
   0xc   :  { %42 = vst.msk [vmem:[#allocation3 + $0x28] sm:$0xff] %vm20_vm1, %v579_v3  ;;  %43 = vst.msk [vmem:[#allocation3 + $0x30] sm:$0xff] %vm20_vm1, %v579_v3  ;;  %v232_v55 = vsel %vm85_vm0, %v194_v53, 0.0  ;;  %v229_v56 = vsel %vm85_vm0, %v193_v54, 0.0  ;;  %v196_v57 = vmul.f32 %v66_v25, %v66_v25  ;;  %v195_v58 = vmul.f32 %v65_v26, %v65_v26  ;;  %v71_v1 = vld [vmem:[#allocation2 + $0x10] sm:$0xff]  ;;  %v69_v2 = vld [vmem:[#allocation2] sm:$0xff] }
   0xd   :  { %44 = vst.msk [vmem:[#allocation3 + $0x38] sm:$0xff] %vm20_vm1, %v579_v3  ;;  %45 = vst.msk [vmem:[#allocation3 + $0x40] sm:$0xff] %vm20_vm1, %v579_v3  ;;  %v198_v61 = vmul.f32 %v68_v29, %v68_v29  ;;  %v197_v62 = vmul.f32 %v67_v30, %v67_v30  ;;  %v72_v7 = vld [vmem:[#allocation2 + $0x18] sm:$0xff]  ;;  %v70_v8 = vld [vmem:[#allocation2 + $0x8] sm:$0xff] }
   0xe   :  { %46 = vst.msk [vmem:[#allocation3 + $0x48] sm:$0xff] %vm20_vm1, %v579_v3  ;;  %47 = vst.msk [vmem:[#allocation3 + $0x50] sm:$0xff] %vm20_vm1, %v579_v3  ;;  %v238_v59 = vsel %vm85_vm0, %v196_v57, 0.0  ;;  %v235_v60 = vsel %vm85_vm0, %v195_v58, 0.0  ;;  %v74_v13 = vld [vmem:[#allocation2 + $0x28] sm:$0xff]  ;;  %v73_v14 = vld [vmem:[#allocation2 + $0x20] sm:$0xff] }
   0xf   :  { %48 = vst.msk [vmem:[#allocation3 + $0x58] sm:$0xff] %vm20_vm1, %v579_v3  ;;  %49 = vst.msk [vmem:[#allocation3 + $0x60] sm:$0xff] %vm20_vm1, %v579_v3  ;;  %108 = vadd.xlane.f32.xlu1 %v107_v15  ;;  %105 = vadd.xlane.f32.xlu0 %v104_v16  ;;  %v244_v63 = vsel %vm85_vm0, %v198_v61, 0.0  ;;  %v241_v0 = vsel %vm85_vm0, %v197_v62, 0.0  ;;  %v78_v25 = vld [vmem:[#allocation2 + $0x48] sm:$0xff]  ;;  %v77_v26 = vld [vmem:[#allocation2 + $0x40] sm:$0xff] }
  0x10   :  { %50 = vst.msk [vmem:[#allocation3 + $0x68] sm:$0xff] %vm20_vm1, %v579_v3  ;;  %51 = vst.msk [vmem:[#allocation3 + $0x70] sm:$0xff] %vm20_vm1, %v579_v3  ;;  %v80_v31 = vld [vmem:[#allocation2 + $0x58] sm:$0xff]  ;;  %v81_v38 = vld [vmem:[#allocation2 + $0x60] sm:$0xff] }
  0x11   :  { %52 = vst.msk [vmem:[#allocation3 + $0x78] sm:$0xff] %vm20_vm1, %v579_v3  ;;  %v168_v49 = vld [vmem:[#allocation3 + $0x8] sm:$0xff]  ;;  %v167_v50 = vld [vmem:[#allocation3] sm:$0xff] }
  0x13   :  { %114 = vadd.xlane.f32.xlu1 %v113_v19  ;;  %111 = vadd.xlane.f32.xlu0 %v110_v20  ;;  %v76_v19 = vld [vmem:[#allocation2 + $0x38] sm:$0xff]  ;;  %v75_v20 = vld [vmem:[#allocation2 + $0x30] sm:$0xff] }
  0x17   :  { %120 = vadd.xlane.f32.xlu1 %v119_v23  ;;  %117 = vadd.xlane.f32.xlu0 %v116_v24 }
  0x1b   :  { %126 = vadd.xlane.f32.xlu1 %v125_v27  ;;  %123 = vadd.xlane.f32.xlu0 %v122_v28 }
  0x1f   :  { %132 = vadd.xlane.f32.xlu1 %v131_v32  ;;  %129 = vadd.xlane.f32.xlu0 %v128_v33  ;;  %v79_v32 = vld [vmem:[#allocation2 + $0x50] sm:$0xff] }
  0x23   :  { %203 = vadd.xlane.f32.xlu1 %v202_v36  ;;  %200 = vadd.xlane.f32.xlu0 %v199_v37  ;;  %v82_v37 = vld [vmem:[#allocation2 + $0x68] sm:$0xff] }
  0x27   :  { %209 = vadd.xlane.f32.xlu1 %v208_v39  ;;  %206 = vadd.xlane.f32.xlu0 %v205_v40 }
  0x2b   :  { %215 = vadd.xlane.f32.xlu1 %v214_v43  ;;  %212 = vadd.xlane.f32.xlu0 %v211_v44  ;;  %v84_v43 = vld [vmem:[#allocation2 + $0x78] sm:$0xff]  ;;  %v83_v44 = vld [vmem:[#allocation2 + $0x70] sm:$0xff] }
  0x2f   :  { %221 = vadd.xlane.f32.xlu1 %v220_v47  ;;  %218 = vadd.xlane.f32.xlu0 %v217_v48 }
  0x33   :  { %227 = vadd.xlane.f32.xlu1 %v226_v51  ;;  %224 = vadd.xlane.f32.xlu0 %v223_v52 }
  0x37   :  { %233 = vadd.xlane.f32.xlu1 %v232_v55  ;;  %230 = vadd.xlane.f32.xlu0 %v229_v56  ;;  %v170_v55 = vld [vmem:[#allocation3 + $0x18] sm:$0xff]  ;;  %v169_v56 = vld [vmem:[#allocation3 + $0x10] sm:$0xff] }
  0x3b   :  { %239 = vadd.xlane.f32.xlu1 %v238_v59  ;;  %236 = vadd.xlane.f32.xlu0 %v235_v60 }
  0x3f   :  { %245 = vadd.xlane.f32.xlu1 %v244_v63  ;;  %242 = vadd.xlane.f32.xlu0 %v241_v0  ;;  %v172_v63 = vld [vmem:[#allocation3 + $0x28] sm:$0xff]  ;;  %v171_v0 = vld [vmem:[#allocation3 + $0x20] sm:$0xff] }
  0x90   :  { %v94_v3 = vpop.xlane.xlu1 %93  ;;  %v88_v4 = vpop.xlane.xlu0 %87 }
  0x91   :  { %v136_v5 = vadd.f32 %v94_v3, %v71_v1  ;;  %v134_v6 = vadd.f32 %v88_v4, %v69_v2 }
  0x93   :  { %153 = vst.msk [vmem:[#allocation2 + $0x10] sm:$0xff] %vm20_vm1, %v136_v5  ;;  %151 = vst.msk [vmem:[#allocation2] sm:$0xff] %vm20_vm1, %v134_v6 }
  0x94   :  { %v97_v9 = vpop.xlane.xlu1 %96  ;;  %v91_v10 = vpop.xlane.xlu0 %90 }
  0x95   :  { %v137_v11 = vadd.f32 %v97_v9, %v72_v7  ;;  %v135_v12 = vadd.f32 %v91_v10, %v70_v8  ;;  %v174_v7 = vld [vmem:[#allocation3 + $0x38] sm:$0xff] }
  0x97   :  { %154 = vst.msk [vmem:[#allocation2 + $0x18] sm:$0xff] %vm20_vm1, %v137_v11  ;;  %152 = vst.msk [vmem:[#allocation2 + $0x8] sm:$0xff] %vm20_vm1, %v135_v12 }
  0x98   :  { %v103_v15 = vpop.xlane.xlu1 %102  ;;  %v100_v16 = vpop.xlane.xlu0 %99 }
  0x99   :  { %v139_v17 = vadd.f32 %v103_v15, %v74_v13  ;;  %v138_v18 = vadd.f32 %v100_v16, %v73_v14 }
  0x9a   :  { %v282_v57 = vld [vmem:[#allocation2] sm:$0xff]  ;;  %v284_v1 = vld [vmem:[#allocation2 + $0x10] sm:$0xff] }
  0x9b   :  { %156 = vst.msk [vmem:[#allocation2 + $0x28] sm:$0xff] %vm20_vm1, %v139_v17  ;;  %155 = vst.msk [vmem:[#allocation2 + $0x20] sm:$0xff] %vm20_vm1, %v138_v18  ;;  %v750_v2 = vmul.f32 0.03125, %v282_v57  ;;  %v756_v13 = vmul.f32 0.03125, %v284_v1  ;;  %v173_v17 = vld [vmem:[#allocation3 + $0x30] sm:$0xff] }
  0x9c   :  { %v109_v21 = vpop.xlane.xlu1 %108  ;;  %v106_v22 = vpop.xlane.xlu0 %105 }
  0x9d   :  { %v141_v23 = vadd.f32 %v109_v21, %v76_v19  ;;  %v140_v24 = vadd.f32 %v106_v22, %v75_v20  ;;  %v346_v18 = vmul.f32 %v750_v2, %v750_v2 }
  0x9e   :  { %v283_v58 = vld [vmem:[#allocation2 + $0x8] sm:$0xff]  ;;  %v285_v3 = vld [vmem:[#allocation2 + $0x18] sm:$0xff] }
  0x9f   :  { %158 = vst.msk [vmem:[#allocation2 + $0x38] sm:$0xff] %vm20_vm1, %v141_v23  ;;  %157 = vst.msk [vmem:[#allocation2 + $0x30] sm:$0xff] %vm20_vm1, %v140_v24  ;;  %v752_v4 = vmul.f32 0.03125, %v283_v58  ;;  %v758_v14 = vmul.f32 0.03125, %v285_v3 }
  0xa0   :  { %v115_v27 = vpop.xlane.xlu1 %114  ;;  %v112_v28 = vpop.xlane.xlu0 %111 }
  0xa1   :  { %v143_v29 = vadd.f32 %v115_v27, %v78_v25  ;;  %v142_v30 = vadd.f32 %v112_v28, %v77_v26  ;;  %v347_v19 = vmul.f32 %v752_v4, %v752_v4 }
  0xa2   :  { %v287_v8 = vld [vmem:[#allocation2 + $0x28] sm:$0xff]  ;;  %v286_v9 = vld [vmem:[#allocation2 + $0x20] sm:$0xff] }
  0xa3   :  { %160 = vst.msk [vmem:[#allocation2 + $0x48] sm:$0xff] %vm20_vm1, %v143_v29  ;;  %159 = vst.msk [vmem:[#allocation2 + $0x40] sm:$0xff] %vm20_vm1, %v142_v30  ;;  %v766_v23 = vmul.f32 0.03125, %v287_v8  ;;  %v768_v24 = vmul.f32 0.03125, %v286_v9 }
  0xa4   :  { %v121_v33 = vpop.xlane.xlu1 %120  ;;  %v118_v34 = vpop.xlane.xlu0 %117 }
  0xa5   :  { %v145_v35 = vadd.f32 %v121_v33, %v80_v31  ;;  %v144_v36 = vadd.f32 %v118_v34, %v79_v32  ;;  %v348_v33 = vmul.f32 %v756_v13, %v756_v13  ;;  %v349_v34 = vmul.f32 %v758_v14, %v758_v14 }
  0xa6   :  { %v289_v10 = vld [vmem:[#allocation2 + $0x38] sm:$0xff]  ;;  %v288_v20 = vld [vmem:[#allocation2 + $0x30] sm:$0xff] }
  0xa7   :  { %162 = vst.msk [vmem:[#allocation2 + $0x58] sm:$0xff] %vm20_vm1, %v145_v35  ;;  %161 = vst.msk [vmem:[#allocation2 + $0x50] sm:$0xff] %vm20_vm1, %v144_v36  ;;  %v770_v25 = vmul.f32 0.03125, %v289_v10  ;;  %v776_v35 = vmul.f32 0.03125, %v288_v20 }
  0xa8   :  { %v127_v39 = vpop.xlane.xlu1 %126  ;;  %v124_v40 = vpop.xlane.xlu0 %123 }
  0xa9   :  { %v147_v41 = vadd.f32 %v127_v39, %v82_v37  ;;  %v146_v42 = vadd.f32 %v124_v40, %v81_v38  ;;  %v176_v38 = vld [vmem:[#allocation3 + $0x48] sm:$0xff] }
  0xaa   :  { %v291_v28 = vld [vmem:[#allocation2 + $0x48] sm:$0xff]  ;;  %v290_v39 = vld [vmem:[#allocation2 + $0x40] sm:$0xff] }
  0xab   :  { %164 = vst.msk [vmem:[#allocation2 + $0x68] sm:$0xff] %vm20_vm1, %v147_v41  ;;  %163 = vst.msk [vmem:[#allocation2 + $0x60] sm:$0xff] %vm20_vm1, %v146_v42  ;;  %v794_v57 = vmul.f32 0.03125, %v290_v39 }
  0xac   :  { %v133_v45 = vpop.xlane.xlu1 %132  ;;  %v130_v46 = vpop.xlane.xlu0 %129 }
  0xad   :  { %v149_v47 = vadd.f32 %v133_v45, %v84_v43  ;;  %v148_v48 = vadd.f32 %v130_v46, %v83_v44  ;;  %v175_v44 = vld [vmem:[#allocation3 + $0x40] sm:$0xff]  ;;  %v351_v45 = vmul.f32 %v766_v23, %v766_v23  ;;  %v350_v46 = vmul.f32 %v768_v24, %v768_v24 }
  0xaf   :  { %166 = vst.msk [vmem:[#allocation2 + $0x78] sm:$0xff] %vm20_vm1, %v149_v47  ;;  %165 = vst.msk [vmem:[#allocation2 + $0x70] sm:$0xff] %vm20_vm1, %v148_v48  ;;  %v786_v47 = vmul.f32 %v770_v25, %v770_v25  ;;  %v788_v48 = vmul.f32 0.03125, %v291_v28 }
  0xb0   :  { %v204_v51 = vpop.xlane.xlu1 %203  ;;  %v201_v52 = vpop.xlane.xlu0 %200 }
  0xb1   :  { %v248_v53 = vadd.f32 %v204_v51, %v168_v49  ;;  %v247_v54 = vadd.f32 %v201_v52, %v167_v50  ;;  %v293_v51 = vld [vmem:[#allocation2 + $0x58] sm:$0xff] }
  0xb2   :  { %v800_v8 = vmul.f32 0.03125, %v293_v51  ;;  %v294_v28 = vld [vmem:[#allocation2 + $0x60] sm:$0xff]  ;;  %v181_v51 = vld [vmem:[#allocation3 + $0x70] sm:$0xff] }
  0xb3   :  { %264 = vst.msk [vmem:[#allocation3 + $0x8] sm:$0xff] %vm20_vm1, %v248_v53  ;;  %263 = vst.msk [vmem:[#allocation3] sm:$0xff] %vm20_vm1, %v247_v54 }
  0xb4   :  { %v210_v59 = vpop.xlane.xlu1 %209  ;;  %v207_v60 = vpop.xlane.xlu0 %206 }
  0xb5   :  { %v250_v61 = vadd.f32 %v210_v59, %v170_v55  ;;  %v249_v62 = vadd.f32 %v207_v60, %v169_v56  ;;  %v792_v56 = vmul.f32 %v776_v35, %v776_v35 }
  0xb6   :  { %v297_v39 = vld [vmem:[#allocation2 + $0x78] sm:$0xff] }
  0xb7   :  { %266 = vst.msk [vmem:[#allocation3 + $0x18] sm:$0xff] %vm20_vm1, %v250_v61  ;;  %265 = vst.msk [vmem:[#allocation3 + $0x10] sm:$0xff] %vm20_vm1, %v249_v62  ;;  %v178_v62 = vld [vmem:[#allocation3 + $0x58] sm:$0xff] }
  0xb8   :  { %v216_v5 = vpop.xlane.xlu1 %215  ;;  %v213_v6 = vpop.xlane.xlu0 %212 }
  0xb9   :  { %v252_v11 = vadd.f32 %v216_v5, %v172_v63  ;;  %v251_v12 = vadd.f32 %v213_v6, %v171_v0  ;;  %v292_v63 = vld [vmem:[#allocation2 + $0x50] sm:$0xff]  ;;  %v295_v0 = vld [vmem:[#allocation2 + $0x68] sm:$0xff] }
  0xba   :  { %v315_v15 = vld [vmem:[#allocation3 + $0x8] sm:$0xff]  ;;  %v314_v16 = vld [vmem:[#allocation3] sm:$0xff]  ;;  %v177_v6 = vld [vmem:[#allocation3 + $0x50] sm:$0xff] }
  0xbb   :  { %v331_v21 = vmul.f32 0.03125, %v315_v15  ;;  %v330_v22 = vmul.f32 0.03125, %v314_v16  ;;  %268 = vst.msk [vmem:[#allocation3 + $0x28] sm:$0xff] %vm20_vm1, %v252_v11  ;;  %267 = vst.msk [vmem:[#allocation3 + $0x20] sm:$0xff] %vm20_vm1, %v251_v12 }
  0xbc   :  { %v222_v26 = vpop.xlane.xlu1 %221  ;;  %v219_v27 = vpop.xlane.xlu0 %218 }
  0xbd   :  { %v363_v29 = vsub.f32 %v331_v21, %v347_v19  ;;  %v362_v30 = vsub.f32 %v330_v22, %v346_v18  ;;  %v254_v31 = vadd.f32 %v222_v26, %v174_v7  ;;  %v253_v32 = vadd.f32 %v219_v27, %v173_v17  ;;  %v180_v27 = vld [vmem:[#allocation3 + $0x68] sm:$0xff] }
  0xbe   :  { %v317_v36 = vld [vmem:[#allocation3 + $0x18] sm:$0xff]  ;;  %v316_v37 = vld [vmem:[#allocation3 + $0x10] sm:$0xff]  ;;  %v798_v7 = vmul.f32 %v788_v48, %v788_v48  ;;  %v804_v18 = vmul.f32 0.03125, %v292_v63  ;;  %v806_v19 = vmul.f32 0.03125, %v295_v0 }
  0xbf   :  { %v379_v40 = vmax.f32 %v363_v29, 0.0  ;;  %v378_v41 = vmax.f32 %v362_v30, 0.0  ;;  %v333_v42 = vmul.f32 0.03125, %v317_v36  ;;  %v332_v43 = vmul.f32 0.03125, %v316_v37  ;;  %270 = vst.msk [vmem:[#allocation3 + $0x38] sm:$0xff] %vm20_vm1, %v254_v31  ;;  %269 = vst.msk [vmem:[#allocation3 + $0x30] sm:$0xff] %vm20_vm1, %v253_v32 }
  0xc0   :  { %v228_v49 = vpop.xlane.xlu1 %227  ;;  %v225_v50 = vpop.xlane.xlu0 %224  ;;  %v179_v32 = vld [vmem:[#allocation3 + $0x60] sm:$0xff] }
  0xc1   :  { %v395_v52 = vadd.f32 1e-05, %v379_v40  ;;  %v394_v53 = vadd.f32 1e-05, %v378_v41  ;;  %v365_v54 = vsub.f32 %v333_v42, %v349_v34  ;;  %v364_v55 = vsub.f32 %v332_v43, %v348_v33 }
  0xc2   :  { %v319_v58 = vld [vmem:[#allocation3 + $0x28] sm:$0xff]  ;;  %v318_v59 = vld [vmem:[#allocation3 + $0x20] sm:$0xff]  ;;  %v256_v60 = vadd.f32 %v228_v49, %v176_v38  ;;  %v255_v61 = vadd.f32 %v225_v50, %v175_v44  ;;  %v811_v33 = vmul.f32 %v794_v57, %v794_v57  ;;  %v815_v34 = vmul.f32 %v800_v8, %v800_v8  ;;  %v182_v50 = vld [vmem:[#allocation3 + $0x78] sm:$0xff] }
  0xc3   :  { %547 = vrsqrt.f32 %v395_v52  ;;  %v381_v1 = vmax.f32 %v365_v54, 0.0  ;;  %v380_v3 = vmax.f32 %v364_v55, 0.0  ;;  %v335_v5 = vmul.f32 0.03125, %v319_v58 }
  0xc4   :  { %549 = vrsqrt.f32 %v394_v53  ;;  %v334_v9 = vmul.f32 0.03125, %v318_v59  ;;  %272 = vst.msk [vmem:[#allocation3 + $0x48] sm:$0xff] %vm20_vm1, %v256_v60  ;;  %271 = vst.msk [vmem:[#allocation3 + $0x40] sm:$0xff] %vm20_vm1, %v255_v61  ;;  %v234_v10 = vpop.xlane.xlu1 %233  ;;  %v231_v11 = vpop.xlane.xlu0 %230  ;;  %v822_v44 = vmul.f32 %v804_v18, %v804_v18  ;;  %v828_v52 = vmul.f32 %v806_v19, %v806_v19  ;;  %v296_v59 = vld [vmem:[#allocation2 + $0x70] sm:$0xff]  ;;  %v426_v60 = vld [vmem:[%s1096_s1] sm:$0xff] }
  0xc5   :  { %v397_v12 = vadd.f32 1e-05, %v381_v1  ;;  %v396_v15 = vadd.f32 1e-05, %v380_v3  ;;  %v367_v16 = vsub.f32 %v335_v5, %v351_v45  ;;  %v258_v17 = vadd.f32 %v234_v10, %v178_v62 }
  0xc6   :  { %v366_v20 = vsub.f32 %v334_v9, %v350_v46  ;;  %v321_v21 = vld [vmem:[#allocation3 + $0x38] sm:$0xff]  ;;  %v320_v22 = vld [vmem:[#allocation3 + $0x30] sm:$0xff]  ;;  %v257_v26 = vadd.f32 %v231_v11, %v177_v6  ;;  %v824_v45 = vmul.f32 0.03125, %v294_v28  ;;  %v834_v58 = vmul.f32 0.03125, %v297_v39 }
  0xc7   :  { %551 = vrsqrt.f32 %v397_v12  ;;  %v383_v29 = vmax.f32 %v367_v16, 0.0  ;;  %v337_v30 = vmul.f32 0.03125, %v321_v21  ;;  %v336_v31 = vmul.f32 0.03125, %v320_v22  ;;  %274 = vst.msk [vmem:[#allocation3 + $0x58] sm:$0xff] %vm20_vm1, %v258_v17  ;;  %v475_v21 = vld [vmem:[%s1097_s2 + $0x8] sm:$0xff] }
  0xc8   :  { %553 = vrsqrt.f32 %v396_v15  ;;  %v382_v36 = vmax.f32 %v366_v20, 0.0  ;;  %273 = vst.msk [vmem:[#allocation3 + $0x50] sm:$0xff] %vm20_vm1, %v257_v26  ;;  %v240_v37 = vpop.xlane.xlu1 %239  ;;  %v237_v38 = vpop.xlane.xlu0 %236  ;;  %v842_v11 = vmul.f32 %v824_v45, %v824_v45  ;;  %v846_v20 = vmul.f32 0.03125, %v296_v59  ;;  %v429_v26 = vld [vmem:[%s1096_s1 + $0x18] sm:$0xff] }
  0xc9   :  { %v399_v40 = vadd.f32 1e-05, %v383_v29  ;;  %v369_v41 = vsub.f32 %v337_v30, %v786_v47  ;;  %v368_v42 = vsub.f32 %v336_v31, %v792_v56  ;;  %v260_v43 = vadd.f32 %v240_v37, %v180_v27  ;;  %v427_v47 = vld [vmem:[%s1096_s1 + $0x8] sm:$0xff]  ;;  %v474_v29 = vld [vmem:[%s1097_s2] sm:$0xff]  ;;  %v428_v30 = vld [vmem:[%s1096_s1 + $0x10] sm:$0xff] }
  0xca   :  { %v398_v46 = vadd.f32 1e-05, %v382_v36  ;;  %v259_v49 = vadd.f32 %v237_v38, %v179_v32  ;;  %v869_v36 = vmul.f32 %v834_v58, %v834_v58 }
  0xcb   :  { %555 = vrsqrt.f32 %v399_v40  ;;  %v385_v53 = vmax.f32 %v369_v41, 0.0  ;;  %v384_v54 = vmax.f32 %v368_v42, 0.0  ;;  %v323_v55 = vld [vmem:[#allocation3 + $0x48] sm:$0xff]  ;;  %v322_v56 = vld [vmem:[#allocation3 + $0x40] sm:$0xff]  ;;  %276 = vst.msk [vmem:[#allocation3 + $0x68] sm:$0xff] %vm20_vm1, %v260_v43 }
  0xcc   :  { %557 = vrsqrt.f32 %v398_v46  ;;  %v339_v61 = vmul.f32 0.03125, %v323_v55  ;;  %v338_v62 = vmul.f32 0.03125, %v322_v56  ;;  %275 = vst.msk [vmem:[#allocation3 + $0x60] sm:$0xff] %vm20_vm1, %v259_v49  ;;  %v246_v63 = vpop.xlane.xlu1 %245  ;;  %v243_v0 = vpop.xlane.xlu0 %242  ;;  %v476_v55 = vld [vmem:[%s1097_s2 + $0x10] sm:$0xff] }
  0xcd   :  { %v548_v1 = vpop.eup %547  ;;  %v401_v3 = vadd.f32 1e-05, %v385_v53  ;;  %v400_v5 = vadd.f32 1e-05, %v384_v54  ;;  %v262_v6 = vadd.f32 %v246_v63, %v182_v50  ;;  %v261_v9 = vadd.f32 %v243_v0, %v181_v51  ;;  %v477_v50 = vld [vmem:[%s1097_s2 + $0x18] sm:$0xff] }
  0xce   :  { %v550_v10 = vpop.eup %549  ;;  %v443_v12 = vmul.f32 %v548_v1, %v427_v47  ;;  %v371_v15 = vsub.f32 %v339_v61, %v798_v7  ;;  %v370_v16 = vsub.f32 %v338_v62, %v811_v33  ;;  %v325_v17 = vld [vmem:[#allocation3 + $0x58] sm:$0xff]  ;;  %v431_v47 = vld [vmem:[%s1096_s1 + $0x28] sm:$0xff] }
  0xcf   :  { %v442_v22 = vmul.f32 %v550_v10, %v426_v60  ;;  %559 = vrsqrt.f32 %v401_v3  ;;  %v341_v27 = vmul.f32 0.03125, %v325_v17  ;;  %v324_v28 = vld [vmem:[#allocation3 + $0x50] sm:$0xff]  ;;  %278 = vst.msk [vmem:[#allocation3 + $0x78] sm:$0xff] %vm20_vm1, %v262_v6  ;;  %277 = vst.msk [vmem:[#allocation3 + $0x70] sm:$0xff] %vm20_vm1, %v261_v9 }
  0xd0   :  { %459 = vst.msk [vmem:[%s1098_s3 + $0x8] sm:$0xff] %vm20_vm1, %v443_v12  ;;  %v491_v7 = vmul.f32 %v443_v12, %v752_v4  ;;  %561 = vrsqrt.f32 %v400_v5  ;;  %v387_v31 = vmax.f32 %v371_v15, 0.0  ;;  %v386_v32 = vmax.f32 %v370_v16, 0.0  ;;  %v479_v12 = vld [vmem:[%s1097_s2 + $0x28] sm:$0xff]  ;;  %v432_v17 = vld [vmem:[%s1096_s1 + $0x30] sm:$0xff] }
  0xd1   :  { %v552_v33 = vpop.eup %551  ;;  %458 = vst.msk [vmem:[%s1098_s3] sm:$0xff] %vm20_vm1, %v442_v22  ;;  %v490_v4 = vmul.f32 %v442_v22, %v750_v2  ;;  %v373_v37 = vsub.f32 %v341_v27, %v815_v34  ;;  %v340_v38 = vmul.f32 0.03125, %v324_v28  ;;  %v360_v28 = vmul.f32 %v846_v20, %v846_v20 }
  0xd2   :  { %v554_v39 = vpop.eup %553  ;;  %v507_v40 = vsub.f32 %v475_v21, %v491_v7  ;;  %v445_v41 = vmul.f32 %v552_v33, %v429_v26  ;;  %v403_v42 = vadd.f32 1e-05, %v387_v31  ;;  %v402_v43 = vadd.f32 1e-05, %v386_v32  ;;  %v327_v46 = vld [vmem:[#allocation3 + $0x68] sm:$0xff] }
  0xd3   :  { %v506_v49 = vsub.f32 %v474_v29, %v490_v4  ;;  %v444_v51 = vmul.f32 %v554_v39, %v428_v30  ;;  %v389_v2 = vmax.f32 %v373_v37, 0.0  ;;  %v372_v34 = vsub.f32 %v340_v38, %v822_v44  ;;  %v326_v53 = vld [vmem:[#allocation3 + $0x60] sm:$0xff]  ;;  %v481_v37 = vld [vmem:[%s1097_s2 + $0x38] sm:$0xff] }
  0xd4   :  { %523 = vst.msk [vmem:[%s1099_s4 + $0x8] sm:$0xff] %vm20_vm1, %v507_v40  ;;  %461 = vst.msk [vmem:[%s1098_s3 + $0x18] sm:$0xff] %vm20_vm1, %v445_v41  ;;  %v493_v54 = vmul.f32 %v445_v41, %v758_v14  ;;  %v430_v44 = vld [vmem:[%s1096_s1 + $0x20] sm:$0xff]  ;;  %563 = vrsqrt.f32 %v403_v42  ;;  %v343_v56 = vmul.f32 0.03125, %v327_v46  ;;  %v342_v59 = vmul.f32 0.03125, %v326_v53  ;;  %v480_v41 = vld [vmem:[%s1097_s2 + $0x30] sm:$0xff] }
  0xd5   :  { %v556_v60 = vpop.eup %555  ;;  %522 = vst.msk [vmem:[%s1099_s4] sm:$0xff] %vm20_vm1, %v506_v49  ;;  %460 = vst.msk [vmem:[%s1098_s3 + $0x10] sm:$0xff] %vm20_vm1, %v444_v51  ;;  %v492_v14 = vmul.f32 %v444_v51, %v756_v13  ;;  %565 = vrsqrt.f32 %v402_v43  ;;  %v405_v61 = vadd.f32 1e-05, %v389_v2  ;;  %v388_v62 = vmax.f32 %v372_v34, 0.0  ;;  %v433_v13 = vld [vmem:[%s1096_s1 + $0x38] sm:$0xff] }
  0xd6   :  { %v558_v63 = vpop.eup %557  ;;  %v509_v0 = vsub.f32 %v477_v50, %v493_v54  ;;  %v447_v1 = vmul.f32 %v556_v60, %v431_v47  ;;  %v375_v3 = vsub.f32 %v343_v56, %v828_v52  ;;  %v374_v5 = vsub.f32 %v342_v59, %v842_v11  ;;  %v329_v6 = vld [vmem:[#allocation3 + $0x78] sm:$0xff]  ;;  %v328_v9 = vld [vmem:[#allocation3 + $0x70] sm:$0xff]  ;;  %v478_v11 = vld [vmem:[%s1097_s2 + $0x20] sm:$0xff] }
  0xd7   :  { %v508_v10 = vsub.f32 %v476_v55, %v492_v14  ;;  %v446_v15 = vmul.f32 %v558_v63, %v430_v44  ;;  %567 = vrsqrt.f32 %v405_v61  ;;  %v404_v16 = vadd.f32 1e-05, %v388_v62  ;;  %v434_v42 = vld [vmem:[%s1096_s1 + $0x40] sm:$0xff]  ;;  %v437_v34 = vld [vmem:[%s1096_s1 + $0x58] sm:$0xff]  ;;  %v436_v60 = vld [vmem:[%s1096_s1 + $0x50] sm:$0xff] }
  0xd8   :  { %525 = vst.msk [vmem:[%s1099_s4 + $0x18] sm:$0xff] %vm20_vm1, %v509_v0  ;;  %463 = vst.msk [vmem:[%s1098_s3 + $0x28] sm:$0xff] %vm20_vm1, %v447_v1  ;;  %v495_v52 = vmul.f32 %v447_v1, %v766_v23  ;;  %v391_v21 = vmax.f32 %v375_v3, 0.0  ;;  %v390_v22 = vmax.f32 %v374_v5, 0.0  ;;  %v345_v26 = vmul.f32 0.03125, %v329_v6  ;;  %v482_v59 = vld [vmem:[%s1097_s2 + $0x40] sm:$0xff] }
  0xd9   :  { %v560_v27 = vpop.eup %559  ;;  %524 = vst.msk [vmem:[%s1099_s4 + $0x10] sm:$0xff] %vm20_vm1, %v508_v10  ;;  %462 = vst.msk [vmem:[%s1098_s3 + $0x20] sm:$0xff] %vm20_vm1, %v446_v15  ;;  %v494_v23 = vmul.f32 %v446_v15, %v768_v24  ;;  %569 = vrsqrt.f32 %v404_v16  ;;  %v344_v7 = vmul.f32 0.03125, %v328_v9  ;;  %v485_v63 = vld [vmem:[%s1097_s2 + $0x58] sm:$0xff]  ;;  %v484_v5 = vld [vmem:[%s1097_s2 + $0x50] sm:$0xff] }
  0xda   :  { %v562_v29 = vpop.eup %561  ;;  %v511_v30 = vsub.f32 %v479_v12, %v495_v52  ;;  %v449_v31 = vmul.f32 %v560_v27, %v433_v13  ;;  %v407_v32 = vadd.f32 1e-05, %v391_v21  ;;  %v406_v33 = vadd.f32 1e-05, %v390_v22  ;;  %v438_v6 = vld [vmem:[%s1096_s1 + $0x60] sm:$0xff]  ;;  %v487_v16 = vld [vmem:[%s1097_s2 + $0x68] sm:$0xff] }
  0xdb   :  { %v510_v4 = vsub.f32 %v478_v11, %v494_v23  ;;  %v448_v38 = vmul.f32 %v562_v29, %v432_v17  ;;  %v377_v39 = vsub.f32 %v345_v26, %v869_v36  ;;  %v376_v40 = vsub.f32 %v344_v7, %v360_v28  ;;  %v435_v36 = vld [vmem:[%s1096_s1 + $0x48] sm:$0xff]  ;;  %v486_v11 = vld [vmem:[%s1097_s2 + $0x60] sm:$0xff]  ;;  %v441_v17 = vld [vmem:[%s1096_s1 + $0x78] sm:$0xff] }
  0xdc   :  { %527 = vst.msk [vmem:[%s1099_s4 + $0x28] sm:$0xff] %vm20_vm1, %v511_v30  ;;  %465 = vst.msk [vmem:[%s1098_s3 + $0x38] sm:$0xff] %vm20_vm1, %v449_v31  ;;  %v497_v24 = vmul.f32 %v449_v31, %v770_v25  ;;  %571 = vrsqrt.f32 %v407_v32  ;;  %v440_v21 = vld [vmem:[%s1096_s1 + $0x70] sm:$0xff]  ;;  %v489_v7 = vld [vmem:[%s1097_s2 + $0x78] sm:$0xff] }
  0xdd   :  { %526 = vst.msk [vmem:[%s1099_s4 + $0x20] sm:$0xff] %vm20_vm1, %v510_v4  ;;  %464 = vst.msk [vmem:[%s1098_s3 + $0x30] sm:$0xff] %vm20_vm1, %v448_v38  ;;  %v496_v25 = vmul.f32 %v448_v38, %v776_v35  ;;  %573 = vrsqrt.f32 %v406_v33  ;;  %v393_v43 = vmax.f32 %v377_v39, 0.0  ;;  %v392_v46 = vmax.f32 %v376_v40, 0.0  ;;  %v483_v35 = vld [vmem:[%s1097_s2 + $0x48] sm:$0xff]  ;;  %v488_v30 = vld [vmem:[%s1097_s2 + $0x70] sm:$0xff] }
  0xde   :  { %v564_v49 = vpop.eup %563  ;;  %v513_v50 = vsub.f32 %v481_v37, %v497_v24 }
  0xdf   :  { %v566_v51 = vpop.eup %565  ;;  %v512_v47 = vsub.f32 %v480_v41, %v496_v25  ;;  %v451_v2 = vmul.f32 %v564_v49, %v435_v36  ;;  %v409_v53 = vadd.f32 1e-05, %v393_v43  ;;  %v408_v54 = vadd.f32 1e-05, %v392_v46 }
  0xe0   :  { %529 = vst.msk [vmem:[%s1099_s4 + $0x38] sm:$0xff] %vm20_vm1, %v513_v50  ;;  %v450_v55 = vmul.f32 %v566_v51, %v434_v42 }
  0xe1   :  { %v568_v44 = vpop.eup %567  ;;  %528 = vst.msk [vmem:[%s1099_s4 + $0x30] sm:$0xff] %vm20_vm1, %v512_v47  ;;  %467 = vst.msk [vmem:[%s1098_s3 + $0x48] sm:$0xff] %vm20_vm1, %v451_v2  ;;  %v499_v56 = vmul.f32 %v451_v2, %v788_v48  ;;  %575 = vrsqrt.f32 %v409_v53 }
  0xe2   :  { %466 = vst.msk [vmem:[%s1098_s3 + $0x40] sm:$0xff] %vm20_vm1, %v450_v55  ;;  %v498_v14 = vmul.f32 %v450_v55, %v794_v57  ;;  %v453_v61 = vmul.f32 %v568_v44, %v437_v34  ;;  %577 = vrsqrt.f32 %v408_v54  ;;  %v439_v57 = vld [vmem:[%s1096_s1 + $0x68] sm:$0xff] }
  0xe3   :  { %v570_v62 = vpop.eup %569  ;;  %v515_v48 = vsub.f32 %v483_v35, %v499_v56 }
  0xe4   :  { %v514_v0 = vsub.f32 %v482_v59, %v498_v14  ;;  %469 = vst.msk [vmem:[%s1098_s3 + $0x58] sm:$0xff] %vm20_vm1, %v453_v61  ;;  %v501_v1 = vmul.f32 %v453_v61, %v800_v8  ;;  %v452_v3 = vmul.f32 %v570_v62, %v436_v60 }
  0xe5   :  { %531 = vst.msk [vmem:[%s1099_s4 + $0x48] sm:$0xff] %vm20_vm1, %v515_v48 }
  0xe6   :  { %v572_v9 = vpop.eup %571  ;;  %530 = vst.msk [vmem:[%s1099_s4 + $0x40] sm:$0xff] %vm20_vm1, %v514_v0  ;;  %v517_v8 = vsub.f32 %v485_v63, %v501_v1  ;;  %468 = vst.msk [vmem:[%s1098_s3 + $0x50] sm:$0xff] %vm20_vm1, %v452_v3  ;;  %v500_v10 = vmul.f32 %v452_v3, %v804_v18 }
  0xe7   :  { %v574_v12 = vpop.eup %573  ;;  %v455_v15 = vmul.f32 %v572_v9, %v439_v57 }
  0xe8   :  { %533 = vst.msk [vmem:[%s1099_s4 + $0x58] sm:$0xff] %vm20_vm1, %v517_v8  ;;  %v516_v13 = vsub.f32 %v484_v5, %v500_v10  ;;  %v454_v52 = vmul.f32 %v574_v12, %v438_v6 }
  0xe9   :  { %471 = vst.msk [vmem:[%s1098_s3 + $0x68] sm:$0xff] %vm20_vm1, %v455_v15  ;;  %v503_v18 = vmul.f32 %v455_v15, %v806_v19 }
  0xea   :  { %532 = vst.msk [vmem:[%s1099_s4 + $0x50] sm:$0xff] %vm20_vm1, %v516_v13  ;;  %470 = vst.msk [vmem:[%s1098_s3 + $0x60] sm:$0xff] %vm20_vm1, %v454_v52  ;;  %v502_v19 = vmul.f32 %v454_v52, %v824_v45 }
  0xeb   :  { %v576_v22 = vpop.eup %575  ;;  %v519_v26 = vsub.f32 %v487_v16, %v503_v18 }
  0xec   :  { %v578_v27 = vpop.eup %577  ;;  %v518_v28 = vsub.f32 %v486_v11, %v502_v19  ;;  %v457_v23 = vmul.f32 %v576_v22, %v441_v17 }
  0xed   :  { %535 = vst.msk [vmem:[%s1099_s4 + $0x68] sm:$0xff] %vm20_vm1, %v519_v26  ;;  %v456_v29 = vmul.f32 %v578_v27, %v440_v21 }
  0xee   :  { %534 = vst.msk [vmem:[%s1099_s4 + $0x60] sm:$0xff] %vm20_vm1, %v518_v28  ;;  %473 = vst.msk [vmem:[%s1098_s3 + $0x78] sm:$0xff] %vm20_vm1, %v457_v23  ;;  %v505_v45 = vmul.f32 %v457_v23, %v834_v58 }
  0xef   :  { %472 = vst.msk [vmem:[%s1098_s3 + $0x70] sm:$0xff] %vm20_vm1, %v456_v29  ;;  %v504_v31 = vmul.f32 %v456_v29, %v846_v20 }
  0xf0   :  { %v521_v32 = vsub.f32 %v489_v7, %v505_v45 }
  0xf1   :  { %v520_v33 = vsub.f32 %v488_v30, %v504_v31 }
  0xf2   :  { %537 = vst.msk [vmem:[%s1099_s4 + $0x78] sm:$0xff] %vm20_vm1, %v521_v32 }
  0xf3   :  { %536 = vst.msk [vmem:[%s1099_s4 + $0x70] sm:$0xff] %vm20_vm1, %v520_v33 }

// kernel: discriminator_forward.19
= control target key start
LH: loop header
LB: loop body
LE: loop exit
PB: predicated region body
PF: predicated region fallthrough
CT: control target
= control target key end

     0   :  { %v422_v0 = vmov 0   ;;  %vm366_vm2 = vcmask 257024   ;;  %s675_s1 = inlined_call_operand.vmem [shape: f32[128,1], index: 1, kind: input, shape index: {}]   ;;  %s676_s2 = inlined_call_operand.vmem [shape: f32[128,1], index: 2, kind: input, shape index: {}]   ;;  %s677_s0 = inlined_call_operand.vmem [shape: f32[128,32], index: 0, kind: input, shape index: {}]   ;;  %s678_s3 = inlined_call_operand.vmem [shape: bf16[128,32], index: 3, kind: output, shape index: {}]  }
   0x1   :  { %421 = vset.pattern.permute.xlu1 %v422_v0  ;;  %420 = vset.pattern.permute.xlu0 %v422_v0  ;;  %v32_v1 = vld [vmem:[%s675_s1 + $0x10] sm:$0xff]  ;;  %v30_v2 = vld [vmem:[%s675_s1] sm:$0xff]  ;;  %v33_v3 = vld [vmem:[%s675_s1 + $0x18] sm:$0xff] }
   0x2   :  { %58 = vperm.xlu1 %421, %v32_v1   ;;  %48 = vperm.xlu0 %420, %v30_v2   ;;  %v31_v4 = vld [vmem:[%s675_s1 + $0x8] sm:$0xff]  ;;  %v34_v6 = vld [vmem:[%s675_s1 + $0x20] sm:$0xff]  ;;  %v37_v7 = vld [vmem:[%s675_s1 + $0x38] sm:$0xff] }
   0x3   :  { %v35_v5 = vld [vmem:[%s675_s1 + $0x28] sm:$0xff]  ;;  %v36_v8 = vld [vmem:[%s675_s1 + $0x30] sm:$0xff]  ;;  %v38_v10 = vld [vmem:[%s675_s1 + $0x40] sm:$0xff] }
   0x4   :  { %v39_v9 = vld [vmem:[%s675_s1 + $0x48] sm:$0xff]  ;;  %v41_v11 = vld [vmem:[%s675_s1 + $0x58] sm:$0xff]  ;;  %v40_v12 = vld [vmem:[%s675_s1 + $0x50] sm:$0xff] }
   0x5   :  { %v43_v13 = vld [vmem:[%s675_s1 + $0x68] sm:$0xff]  ;;  %v42_v14 = vld [vmem:[%s675_s1 + $0x60] sm:$0xff]  ;;  %v45_v15 = vld [vmem:[%s675_s1 + $0x78] sm:$0xff] }
   0x6   :  { %63 = vperm.xlu1 %421, %v33_v3   ;;  %53 = vperm.xlu0 %420, %v31_v4   ;;  %v44_v16 = vld [vmem:[%s675_s1 + $0x70] sm:$0xff]  ;;  %v143_v17 = vld [vmem:[%s676_s2 + $0x8] sm:$0xff]  ;;  %v142_v18 = vld [vmem:[%s676_s2] sm:$0xff] }
   0x7   :  { %v145_v19 = vld [vmem:[%s676_s2 + $0x18] sm:$0xff]  ;;  %v144_v20 = vld [vmem:[%s676_s2 + $0x10] sm:$0xff]  ;;  %v147_v21 = vld [vmem:[%s676_s2 + $0x28] sm:$0xff] }
   0x8   :  { %v146_v22 = vld [vmem:[%s676_s2 + $0x20] sm:$0xff]  ;;  %v149_v23 = vld [vmem:[%s676_s2 + $0x38] sm:$0xff]  ;;  %v148_v24 = vld [vmem:[%s676_s2 + $0x30] sm:$0xff] }
   0x9   :  { %v151_v25 = vld [vmem:[%s676_s2 + $0x48] sm:$0xff]  ;;  %v150_v26 = vld [vmem:[%s676_s2 + $0x40] sm:$0xff]  ;;  %v153_v27 = vld [vmem:[%s676_s2 + $0x58] sm:$0xff] }
   0xa   :  { %73 = vperm.xlu1 %421, %v35_v5   ;;  %68 = vperm.xlu0 %420, %v34_v6   ;;  %v152_v28 = vld [vmem:[%s676_s2 + $0x50] sm:$0xff]  ;;  %v155_v29 = vld [vmem:[%s676_s2 + $0x68] sm:$0xff]  ;;  %v154_v30 = vld [vmem:[%s676_s2 + $0x60] sm:$0xff] }
   0xb   :  { %v157_v31 = vld [vmem:[%s676_s2 + $0x78] sm:$0xff]  ;;  %v156_v32 = vld [vmem:[%s676_s2 + $0x70] sm:$0xff]  ;;  %v14_v47 = vld [vmem:[%s677_s0] sm:$0xff] }
   0xc   :  { %v15_v48 = vld [vmem:[%s677_s0 + $0x8] sm:$0xff]  ;;  %v16_v51 = vld [vmem:[%s677_s0 + $0x10] sm:$0xff]  ;;  %v17_v53 = vld [vmem:[%s677_s0 + $0x18] sm:$0xff] }
   0xd   :  { %v19_v61 = vld [vmem:[%s677_s0 + $0x28] sm:$0xff]  ;;  %v18_v62 = vld [vmem:[%s677_s0 + $0x20] sm:$0xff] }
   0xe   :  { %83 = vperm.xlu1 %421, %v37_v7   ;;  %78 = vperm.xlu0 %420, %v36_v8  }
  0x12   :  { %93 = vperm.xlu1 %421, %v39_v9   ;;  %88 = vperm.xlu0 %420, %v38_v10   ;;  %v21_v9 = vld [vmem:[%s677_s0 + $0x38] sm:$0xff]  ;;  %v20_v10 = vld [vmem:[%s677_s0 + $0x30] sm:$0xff] }
  0x16   :  { %103 = vperm.xlu1 %421, %v41_v11   ;;  %98 = vperm.xlu0 %420, %v40_v12  }
  0x1a   :  { %113 = vperm.xlu1 %421, %v43_v13   ;;  %108 = vperm.xlu0 %420, %v42_v14  }
  0x1e   :  { %123 = vperm.xlu1 %421, %v45_v15   ;;  %118 = vperm.xlu0 %420, %v44_v16  }
  0x22   :  { %165 = vperm.xlu1 %421, %v143_v17   ;;  %160 = vperm.xlu0 %420, %v142_v18  }
  0x26   :  { %175 = vperm.xlu1 %421, %v145_v19   ;;  %170 = vperm.xlu0 %420, %v144_v20  }
  0x2a   :  { %185 = vperm.xlu1 %421, %v147_v21   ;;  %180 = vperm.xlu0 %420, %v146_v22  }
  0x2e   :  { %195 = vperm.xlu1 %421, %v149_v23   ;;  %190 = vperm.xlu0 %420, %v148_v24   ;;  %v23_v23 = vld [vmem:[%s677_s0 + $0x48] sm:$0xff]  ;;  %v22_v24 = vld [vmem:[%s677_s0 + $0x40] sm:$0xff] }
  0x32   :  { %205 = vperm.xlu1 %421, %v151_v25   ;;  %200 = vperm.xlu0 %420, %v150_v26  }
  0x36   :  { %215 = vperm.xlu1 %421, %v153_v27   ;;  %210 = vperm.xlu0 %420, %v152_v28  }
  0x3a   :  { %225 = vperm.xlu1 %421, %v155_v29   ;;  %220 = vperm.xlu0 %420, %v154_v30  }
  0x3e   :  { %235 = vperm.xlu1 %421, %v157_v31   ;;  %230 = vperm.xlu0 %420, %v156_v32  }
  0x81   :  { %v59_v33 = vpop.permute.xlu1 %58  ;;  %v49_v34 = vpop.permute.xlu0 %48 }
  0x82   :  { %v126_v52 = vmul.f32 %v49_v34, %v14_v47  ;;  %v128_v59 = vmul.f32 %v59_v33, %v16_v51 }
  0x85   :  { %v64_v35 = vpop.permute.xlu1 %63  ;;  %v54_v36 = vpop.permute.xlu0 %53 }
  0x86   :  { %v127_v54 = vmul.f32 %v54_v36, %v15_v48  ;;  %v129_v60 = vmul.f32 %v64_v35, %v17_v53 }
  0x89   :  { %v74_v37 = vpop.permute.xlu1 %73  ;;  %v69_v38 = vpop.permute.xlu0 %68 }
  0x8a   :  { %v131_v7 = vmul.f32 %v74_v37, %v19_v61  ;;  %v130_v8 = vmul.f32 %v69_v38, %v18_v62  ;;  %v25_v37 = vld [vmem:[%s677_s0 + $0x58] sm:$0xff]  ;;  %v24_v38 = vld [vmem:[%s677_s0 + $0x50] sm:$0xff] }
  0x8d   :  { %v84_v39 = vpop.permute.xlu1 %83  ;;  %v79_v40 = vpop.permute.xlu0 %78 }
  0x8e   :  { %v133_v21 = vmul.f32 %v84_v39, %v21_v9  ;;  %v132_v22 = vmul.f32 %v79_v40, %v20_v10 }
  0x91   :  { %v539_v41 = vpop.permute.xlu1 %93  ;;  %v541_v42 = vpop.permute.xlu0 %88 }
  0x92   :  { %v135_v35 = vmul.f32 %v539_v41, %v23_v23  ;;  %v134_v36 = vmul.f32 %v541_v42, %v22_v24 }
  0x95   :  { %v543_v43 = vpop.permute.xlu1 %103  ;;  %v545_v44 = vpop.permute.xlu0 %98 }
  0x99   :  { %v547_v45 = vpop.permute.xlu1 %113  ;;  %v549_v46 = vpop.permute.xlu0 %108 }
  0x9d   :  { %v557_v49 = vpop.permute.xlu1 %123  ;;  %v559_v50 = vpop.permute.xlu0 %118 }
  0xa1   :  { %v166_v55 = vpop.permute.xlu1 %165  ;;  %v161_v56 = vpop.permute.xlu0 %160 }
  0xa2   :  { %v239_v57 = vadd.f32 %v166_v55, %v127_v54  ;;  %v238_v58 = vadd.f32 %v161_v56, %v126_v52  ;;  %v137_v55 = vmul.f32 %v543_v43, %v25_v37  ;;  %v136_v56 = vmul.f32 %v545_v44, %v24_v38 }
  0xa4   :  { %vm255_vm0 = vcmp.ge.f32.partialorder %v239_v57, 0.0  ;;  %v271_v63 = vmul.f32 0.2, %v239_v57  ;;  %vm254_vm1 = vcmp.ge.f32.partialorder %v238_v58, 0.0  ;;  %v270_v0 = vmul.f32 0.2, %v238_v58 }
  0xa5   :  { %v176_v1 = vpop.permute.xlu1 %175  ;;  %v171_v2 = vpop.permute.xlu0 %170 }
  0xa6   :  { %v287_v3 = vsel %vm255_vm0, %v239_v57, %v271_v63  ;;  %v286_v4 = vsel %vm254_vm1, %v238_v58, %v270_v0  ;;  %v241_v5 = vadd.f32 %v176_v1, %v129_v60  ;;  %v240_v6 = vadd.f32 %v171_v2, %v128_v59  ;;  %v27_v57 = vld [vmem:[%s677_s0 + $0x68] sm:$0xff]  ;;  %v26_v58 = vld [vmem:[%s677_s0 + $0x60] sm:$0xff] }
  0xa7   :  { %v404_v11 = vpack.c.bf16 %v287_v3, %v287_v3  ;;  %v403_v12 = vpack.c.bf16 %v286_v4, %v286_v4  ;;  %v139_v3 = vmul.f32 %v547_v45, %v27_v57  ;;  %v138_v4 = vmul.f32 %v549_v46, %v26_v58 }
  0xa8   :  { %vm257_vm3 = vcmp.ge.f32.partialorder %v241_v5, 0.0  ;;  %v273_v13 = vmul.f32 0.2, %v241_v5  ;;  %vm256_vm4 = vcmp.ge.f32.partialorder %v240_v6, 0.0  ;;  %v272_v14 = vmul.f32 0.2, %v240_v6 }
  0xa9   :  { %368 = vst.msk [vmem:[%s678_s3 + $0x4] sm:$0xf] %vm366_vm2, %v404_v11  ;;  %367 = vst.msk [vmem:[%s678_s3] sm:$0xf] %vm366_vm2, %v403_v12  ;;  %v186_v15 = vpop.permute.xlu1 %185  ;;  %v181_v16 = vpop.permute.xlu0 %180 }
  0xaa   :  { %v289_v17 = vsel %vm257_vm3, %v241_v5, %v273_v13  ;;  %v288_v18 = vsel %vm256_vm4, %v240_v6, %v272_v14  ;;  %v243_v19 = vadd.f32 %v186_v15, %v131_v7  ;;  %v242_v20 = vadd.f32 %v181_v16, %v130_v8  ;;  %v29_v5 = vld [vmem:[%s677_s0 + $0x78] sm:$0xff]  ;;  %v28_v6 = vld [vmem:[%s677_s0 + $0x70] sm:$0xff] }
  0xab   :  { %v406_v25 = vpack.c.bf16 %v289_v17, %v289_v17  ;;  %v405_v26 = vpack.c.bf16 %v288_v18, %v288_v18  ;;  %v141_v15 = vmul.f32 %v557_v49, %v29_v5  ;;  %v140_v16 = vmul.f32 %v559_v50, %v28_v6 }
  0xac   :  { %vm259_vm5 = vcmp.ge.f32.partialorder %v243_v19, 0.0  ;;  %v275_v27 = vmul.f32 0.2, %v243_v19  ;;  %vm258_vm6 = vcmp.ge.f32.partialorder %v242_v20, 0.0  ;;  %v274_v28 = vmul.f32 0.2, %v242_v20 }
  0xad   :  { %370 = vst.msk [vmem:[%s678_s3 + $0xc] sm:$0xf] %vm366_vm2, %v406_v25  ;;  %369 = vst.msk [vmem:[%s678_s3 + $0x8] sm:$0xf] %vm366_vm2, %v405_v26  ;;  %v196_v29 = vpop.permute.xlu1 %195  ;;  %v191_v30 = vpop.permute.xlu0 %190 }
  0xae   :  { %v291_v31 = vsel %vm259_vm5, %v243_v19, %v275_v27  ;;  %v290_v32 = vsel %vm258_vm6, %v242_v20, %v274_v28  ;;  %v245_v33 = vadd.f32 %v196_v29, %v133_v21  ;;  %v244_v34 = vadd.f32 %v191_v30, %v132_v22 }
  0xaf   :  { %v408_v39 = vpack.c.bf16 %v291_v31, %v291_v31  ;;  %v407_v40 = vpack.c.bf16 %v290_v32, %v290_v32 }
  0xb0   :  { %vm261_vm7 = vcmp.ge.f32.partialorder %v245_v33, 0.0  ;;  %v277_v47 = vmul.f32 0.2, %v245_v33  ;;  %vm260_vm8 = vcmp.ge.f32.partialorder %v244_v34, 0.0  ;;  %v276_v48 = vmul.f32 0.2, %v244_v34 }
  0xb1   :  { %372 = vst.msk [vmem:[%s678_s3 + $0x14] sm:$0xf] %vm366_vm2, %v408_v39  ;;  %371 = vst.msk [vmem:[%s678_s3 + $0x10] sm:$0xf] %vm366_vm2, %v407_v40  ;;  %v206_v41 = vpop.permute.xlu1 %205  ;;  %v201_v42 = vpop.permute.xlu0 %200 }
  0xb2   :  { %v293_v51 = vsel %vm261_vm7, %v245_v33, %v277_v47  ;;  %v292_v52 = vsel %vm260_vm8, %v244_v34, %v276_v48  ;;  %v247_v53 = vadd.f32 %v206_v41, %v135_v35  ;;  %v246_v54 = vadd.f32 %v201_v42, %v134_v36 }
  0xb3   :  { %v410_v59 = vpack.c.bf16 %v293_v51, %v293_v51  ;;  %v409_v60 = vpack.c.bf16 %v292_v52, %v292_v52 }
  0xb4   :  { %vm263_vm9 = vcmp.ge.f32.partialorder %v247_v53, 0.0  ;;  %v279_v61 = vmul.f32 0.2, %v247_v53  ;;  %vm262_vm10 = vcmp.ge.f32.partialorder %v246_v54, 0.0  ;;  %v278_v62 = vmul.f32 0.2, %v246_v54 }
  0xb5   :  { %374 = vst.msk [vmem:[%s678_s3 + $0x1c] sm:$0xf] %vm366_vm2, %v410_v59  ;;  %373 = vst.msk [vmem:[%s678_s3 + $0x18] sm:$0xf] %vm366_vm2, %v409_v60  ;;  %v216_v43 = vpop.permute.xlu1 %215  ;;  %v211_v44 = vpop.permute.xlu0 %210 }
  0xb6   :  { %v295_v63 = vsel %vm263_vm9, %v247_v53, %v279_v61  ;;  %v294_v0 = vsel %vm262_vm10, %v246_v54, %v278_v62  ;;  %v249_v1 = vadd.f32 %v216_v43, %v137_v55  ;;  %v248_v2 = vadd.f32 %v211_v44, %v136_v56 }
  0xb7   :  { %v412_v7 = vpack.c.bf16 %v295_v63, %v295_v63  ;;  %v411_v8 = vpack.c.bf16 %v294_v0, %v294_v0 }
  0xb8   :  { %vm265_vm11 = vcmp.ge.f32.partialorder %v249_v1, 0.0  ;;  %v281_v9 = vmul.f32 0.2, %v249_v1  ;;  %vm264_vm12 = vcmp.ge.f32.partialorder %v248_v2, 0.0  ;;  %v280_v10 = vmul.f32 0.2, %v248_v2 }
  0xb9   :  { %376 = vst.msk [vmem:[%s678_s3 + $0x24] sm:$0xf] %vm366_vm2, %v412_v7  ;;  %375 = vst.msk [vmem:[%s678_s3 + $0x20] sm:$0xf] %vm366_vm2, %v411_v8  ;;  %v226_v45 = vpop.permute.xlu1 %225  ;;  %v221_v46 = vpop.permute.xlu0 %220 }
  0xba   :  { %v297_v11 = vsel %vm265_vm11, %v249_v1, %v281_v9  ;;  %v296_v12 = vsel %vm264_vm12, %v248_v2, %v280_v10  ;;  %v251_v13 = vadd.f32 %v226_v45, %v139_v3  ;;  %v250_v14 = vadd.f32 %v221_v46, %v138_v4 }
  0xbb   :  { %v414_v17 = vpack.c.bf16 %v297_v11, %v297_v11  ;;  %v413_v18 = vpack.c.bf16 %v296_v12, %v296_v12 }
  0xbc   :  { %vm267_vm13 = vcmp.ge.f32.partialorder %v251_v13, 0.0  ;;  %v283_v19 = vmul.f32 0.2, %v251_v13  ;;  %vm266_vm14 = vcmp.ge.f32.partialorder %v250_v14, 0.0  ;;  %v282_v20 = vmul.f32 0.2, %v250_v14 }
  0xbd   :  { %378 = vst.msk [vmem:[%s678_s3 + $0x2c] sm:$0xf] %vm366_vm2, %v414_v17  ;;  %377 = vst.msk [vmem:[%s678_s3 + $0x28] sm:$0xf] %vm366_vm2, %v413_v18  ;;  %v236_v21 = vpop.permute.xlu1 %235  ;;  %v231_v49 = vpop.permute.xlu0 %230 }
  0xbe   :  { %v299_v22 = vsel %vm267_vm13, %v251_v13, %v283_v19  ;;  %v298_v50 = vsel %vm266_vm14, %v250_v14, %v282_v20  ;;  %v253_v23 = vadd.f32 %v236_v21, %v141_v15  ;;  %v252_v24 = vadd.f32 %v231_v49, %v140_v16 }
  0xbf   :  { %v416_v25 = vpack.c.bf16 %v299_v22, %v299_v22  ;;  %v415_v26 = vpack.c.bf16 %v298_v50, %v298_v50 }
  0xc0   :  { %vm269_vm15 = vcmp.ge.f32.partialorder %v253_v23, 0.0  ;;  %v285_v27 = vmul.f32 0.2, %v253_v23  ;;  %vm268_vm0 = vcmp.ge.f32.partialorder %v252_v24, 0.0  ;;  %v284_v28 = vmul.f32 0.2, %v252_v24 }
  0xc1   :  { %380 = vst.msk [vmem:[%s678_s3 + $0x34] sm:$0xf] %vm366_vm2, %v416_v25  ;;  %379 = vst.msk [vmem:[%s678_s3 + $0x30] sm:$0xf] %vm366_vm2, %v415_v26 }
  0xc2   :  { %v301_v29 = vsel %vm269_vm15, %v253_v23, %v285_v27  ;;  %v300_v30 = vsel %vm268_vm0, %v252_v24, %v284_v28 }
  0xc3   :  { %v418_v31 = vpack.c.bf16 %v301_v29, %v301_v29  ;;  %v417_v32 = vpack.c.bf16 %v300_v30, %v300_v30 }
  0xc5   :  { %382 = vst.msk [vmem:[%s678_s3 + $0x3c] sm:$0xf] %vm366_vm2, %v418_v31  ;;  %381 = vst.msk [vmem:[%s678_s3 + $0x38] sm:$0xf] %vm366_vm2, %v417_v32 }

</bundles_post_ra>
